<compile_context>
chip_gen: v7x
topology: tpu7x:2x2x1
jax: 0.10.0
libtpu: 0.0.40
codegen_flags: <defaults>
</compile_context>

<pallas_src>
import functools
import math

import jax
import jax.numpy as jnp
from jax import lax
from jax.experimental import pallas as pl
from jax.experimental.pallas import tpu as pltpu

EPS = 1e-5
_SQRT_HALF = 0.7071067811865476


# ----------------------------- in-kernel helpers -----------------------------

def _ln(x, w, b):
    """LayerNorm over the last axis; x is f32, w/b are (1, E) f32 values."""
    mu = jnp.mean(x, axis=-1, keepdims=True)
    var = jnp.mean((x - mu) ** 2, axis=-1, keepdims=True)
    return (x - mu) * lax.rsqrt(var + EPS) * w + b


def _erf(x):
    # TODO(synk): Mosaic erf lowering is not guaranteed; exact-GELU uses the
    # Abramowitz-Stegun 7.1.26 polynomial (|err| < 1.5e-7) so it stays fused.
    a1, a2, a3, a4, a5 = (0.254829592, -0.284496736, 1.421413741,
                          -1.453152027, 1.061405429)
    p = 0.3275911
    sgn = jnp.where(x < 0.0, -1.0, 1.0)
    ax = jnp.abs(x)
    t = 1.0 / (1.0 + p * ax)
    poly = ((((a5 * t + a4) * t + a3) * t + a2) * t + a1) * t
    return sgn * (1.0 - poly * jnp.exp(-ax * ax))


def _gelu_exact(x):
    return 0.5 * x * (1.0 + _erf(x * _SQRT_HALF))


def _mha(xq, xkv, wq_ref, wk_ref, wv_ref, bq_ref, bk_ref, bv_ref,
         wo_ref, bo, n_head, scale):
    """All-heads attention on VMEM-resident activations.

    xq: (Tq, E) f32, xkv: (Tk, E) f32.
    wq/wk/wv refs: (H, E, Dh); bq/bk/bv refs: (H, 1, Dh); wo ref: (H, Dh, E);
    bo: (1, E) value.  Per-head outputs are accumulated straight through the
    out-projection, so no lane-dim concat/transpose is ever materialized.
    """
    tq, e = xq.shape
    out = jnp.zeros((tq, e), jnp.float32)
    for h in range(n_head):                      # static unroll over heads
        qh = jnp.dot(xq, wq_ref[h], preferred_element_type=jnp.float32) + bq_ref[h]
        kh = jnp.dot(xkv, wk_ref[h], preferred_element_type=jnp.float32) + bk_ref[h]
        vh = jnp.dot(xkv, wv_ref[h], preferred_element_type=jnp.float32) + bv_ref[h]
        s = lax.dot_general(qh, kh, (((1,), (1,)), ((), ())),
                            preferred_element_type=jnp.float32) * scale
        s = s - jnp.max(s, axis=-1, keepdims=True)
        p = jnp.exp(s)
        p = p * pl.reciprocal(jnp.sum(p, axis=-1, keepdims=True), approx=True)
        oh = jnp.dot(p, vh, preferred_element_type=jnp.float32)
        out = out + jnp.dot(oh, wo_ref[h], preferred_element_type=jnp.float32)
    return out + bo


# --------------------------------- kernels -----------------------------------

def _block_kernel(x_ref, ln1w_ref, ln1b_ref,
                  wq_ref, wk_ref, wv_ref, bq_ref, bk_ref, bv_ref, wo_ref, bo_ref,
                  ln2w_ref, ln2b_ref, w1_ref, b1_ref, w2_ref, b2_ref,
                  o_ref, *, n_head):
    """One full transformer Block for one batch element, fused in VMEM."""
    x = x_ref[...].astype(jnp.float32)                       # (T, E)
    e = x.shape[-1]
    scale = 1.0 / math.sqrt(e // n_head)

    # Attention branch.
    xn = _ln(x, ln1w_ref[...], ln1b_ref[...])
    x = x + _mha(xn, xn, wq_ref, wk_ref, wv_ref, bq_ref, bk_ref, bv_ref,
                 wo_ref, bo_ref[...], n_head, scale)

    # MLP branch (GELU + residual folded into the epilogue).
    xn2 = _ln(x, ln2w_ref[...], ln2b_ref[...])
    h = jnp.dot(xn2, w1_ref[...], preferred_element_type=jnp.float32) + b1_ref[...]
    h = _gelu_exact(h)
    h = jnp.dot(h, w2_ref[...], preferred_element_type=jnp.float32) + b2_ref[...]
    o_ref[...] = (x + h).astype(o_ref.dtype)


def _encoder_tail_kernel(x_ref, pool_ref,
                         lnq_w_ref, lnq_b_ref, lnkv_w_ref, lnkv_b_ref,
                         wq_ref, wk_ref, wv_ref, bq_ref, bk_ref, bv_ref,
                         wo_ref, bo_ref, pw_ref, pb_ref,
                         lnw_ref, lnb_ref, pos_ref, o_ref, *, n_head):
    """Fused: mean-pool -> cross-attn -> proj -> residual -> LN -> +pos."""
    xe = x_ref[...].astype(jnp.float32)                      # (T, E)
    e = xe.shape[-1]
    scale = 1.0 / math.sqrt(e // n_head)

    patches = jnp.dot(pool_ref[...], xe,
                      preferred_element_type=jnp.float32)    # (P, E) mean pool
    q = _ln(patches, lnq_w_ref[...], lnq_b_ref[...])
    kv = _ln(xe, lnkv_w_ref[...], lnkv_b_ref[...])
    att = _mha(q, kv, wq_ref, wk_ref, wv_ref, bq_ref, bk_ref, bv_ref,
               wo_ref, bo_ref[...], n_head, scale)
    att = jnp.dot(att, pw_ref[...], preferred_element_type=jnp.float32) + pb_ref[...]
    y = _ln(q + att, lnw_ref[...], lnb_ref[...])   # residual with *normalized* query
    o_ref[...] = (y + pos_ref[...]).astype(o_ref.dtype)      # fused pos-embedding add


def _layernorm_kernel(x_ref, w_ref, b_ref, o_ref):
    o_ref[...] = _ln(x_ref[...].astype(jnp.float32),
                     w_ref[...], b_ref[...]).astype(o_ref.dtype)


# ------------------------------ kernel wrappers -------------------------------

def _rep(shape):
    """BlockSpec for a weight that stays resident (same block every step)."""
    return pl.BlockSpec(shape, lambda i, _s=shape: (0,) * len(_s))


def _split_mha_params(p, n_head):
    """Standard (E,3E)/(3E,)/(E,E) MHA params -> head-split kernel layouts."""
    wqkv, bqkv, wo = p["wqkv"], p["bqkv"], p["wo"]
    e = wo.shape[0]
    dh = e // n_head

    def wsplit(w):                                   # (E, E) -> (H, E, Dh)
        return w.reshape(e, n_head, dh).transpose(1, 0, 2)

    wq3, wk3, wv3 = (wsplit(wqkv[:, :e]), wsplit(wqkv[:, e:2 * e]),
                     wsplit(wqkv[:, 2 * e:]))
    bq3 = bqkv[:e].reshape(n_head, 1, dh)
    bk3 = bqkv[e:2 * e].reshape(n_head, 1, dh)
    bv3 = bqkv[2 * e:].reshape(n_head, 1, dh)
    wo3 = wo.reshape(n_head, dh, e)                  # (H, Dh, E)
    return wq3, wk3, wv3, bq3, bk3, bv3, wo3


def _mha_specs(e, n_head):
    dh = e // n_head
    return ([_rep((n_head, e, dh))] * 3 + [_rep((n_head, 1, dh))] * 3 +
            [_rep((n_head, dh, e)), _rep((1, e))])


def transformer_block(x, p, n_head):
    b, t, e = x.shape
    wq3, wk3, wv3, bq3, bk3, bv3, wo3 = _split_mha_params(p["attn"], n_head)
    return pl.pallas_call(
        functools.partial(_block_kernel, n_head=n_head),
        grid=(b,),
        in_specs=[pl.BlockSpec((None, t, e), lambda i: (i, 0, 0)),
                  _rep((1, e)), _rep((1, e))]
                 + _mha_specs(e, n_head)
                 + [_rep((1, e)), _rep((1, e)),
                    _rep((e, 4 * e)), _rep((1, 4 * e)),
                    _rep((4 * e, e)), _rep((1, e))],
        out_specs=pl.BlockSpec((None, t, e), lambda i: (i, 0, 0)),
        out_shape=jax.ShapeDtypeStruct((b, t, e), x.dtype),
        compiler_params=pltpu.CompilerParams(dimension_semantics=("parallel",)),
    )(x,
      p["ln1_w"].reshape(1, e), p["ln1_b"].reshape(1, e),
      wq3, wk3, wv3, bq3, bk3, bv3, wo3, p["attn"]["bo"].reshape(1, e),
      p["ln2_w"].reshape(1, e), p["ln2_b"].reshape(1, e),
      p["fc1_w"], p["fc1_b"].reshape(1, 4 * e),
      p["fc2_w"], p["fc2_b"].reshape(1, e))


def _encoder_tail(x_emb, p, cfg, pos):
    b, t, e = x_emb.shape
    ps = cfg["patch_size"]
    n_patches = t // ps
    n_head = cfg["n_head"]
    cr = p["cross"]
    # Mean pool as a (P, T) matmul (MXU-friendly, no in-kernel reshapes).
    pool = ((jnp.arange(t)[None, :] // ps) == jnp.arange(n_patches)[:, None]
            ).astype(jnp.float32) / float(ps)
    wq3, wk3, wv3, bq3, bk3, bv3, wo3 = _split_mha_params(cr["attn"], n_head)
    return pl.pallas_call(
        functools.partial(_encoder_tail_kernel, n_head=n_head),
        grid=(b,),
        in_specs=[pl.BlockSpec((None, t, e), lambda i: (i, 0, 0)),
                  _rep((n_patches, t)),
                  _rep((1, e)), _rep((1, e)), _rep((1, e)), _rep((1, e))]
                 + _mha_specs(e, n_head)
                 + [_rep((e, e)), _rep((1, e)),
                    _rep((1, e)), _rep((1, e)),
                    _rep((n_patches, e))],
        out_specs=pl.BlockSpec((None, n_patches, e), lambda i: (i, 0, 0)),
        out_shape=jax.ShapeDtypeStruct((b, n_patches, e), x_emb.dtype),
        compiler_params=pltpu.CompilerParams(dimension_semantics=("parallel",)),
    )(x_emb, pool,
      cr["lnq_w"].reshape(1, e), cr["lnq_b"].reshape(1, e),
      cr["lnkv_w"].reshape(1, e), cr["lnkv_b"].reshape(1, e),
      wq3, wk3, wv3, bq3, bk3, bv3, wo3, cr["attn"]["bo"].reshape(1, e),
      cr["proj_w"], cr["proj_b"].reshape(1, e),
      p["ln_w"].reshape(1, e), p["ln_b"].reshape(1, e),
      pos)


def layernorm(x, w, b):
    """Row-tiled LayerNorm (used only for the final ln_f)."""
    shp = x.shape
    d = shp[-1]
    x2 = x.reshape(-1, d)
    rows = x2.shape[0]
    tm = rows if rows <= 512 else 512
    out = pl.pallas_call(
        _layernorm_kernel,
        grid=(pl.cdiv(rows, tm),),
        in_specs=[pl.BlockSpec((tm, d), lambda i: (i, 0)),
                  _rep((1, d)), _rep((1, d))],
        out_specs=pl.BlockSpec((tm, d), lambda i: (i, 0)),
        out_shape=jax.ShapeDtypeStruct((rows, d), x.dtype),
        compiler_params=pltpu.CompilerParams(dimension_semantics=("parallel",)),
    )(x2, w.reshape(1, d), b.reshape(1, d))
    return out.reshape(shp)


# -------------------------------- model glue ----------------------------------

def hash_ngram_embedding(x, hash_sizes, hash_table_size, tables, n_embd):
    # uint32 arithmetic == mod 2**32 each step, matching the torch reference's
    # `(h*257 + byte) % 2**32` exactly; gathers stay in JAX.
    b, t = x.shape
    emb = jnp.zeros((b, t, n_embd), jnp.float32)
    for n in hash_sizes:
        if t < n:
            continue
        length = t - n + 1
        h = jnp.zeros((b, length), jnp.uint32)
        for i in range(n):
            window = x[:, i:i + length].astype(jnp.uint32)
            h = h * jnp.uint32(257) + window
        idx = (h % jnp.uint32(hash_table_size)).astype(jnp.int32)
        he = jnp.take(tables[f"hash_{n}"], idx, axis=0)       # (B, L, E)
        emb = emb.at[:, n - 1:t, :].add(he)
    return emb / float(len(hash_sizes))


def local_encoder(x, p, cfg, pos_embedding):
    b, t = x.shape
    e = cfg["n_embd"]
    x_emb = jnp.take(p["byte_emb"], x, axis=0)
    x_emb = x_emb + hash_ngram_embedding(
        x, cfg["hash_sizes"], cfg["hash_table_size"], p["hash_tables"], e)
    for bp in p["blocks"]:
        x_emb = transformer_block(x_emb, bp, cfg["n_head"])

    ps = cfg["patch_size"]
    if t % ps != 0:   # reference pads AFTER the encoder blocks
        pad_len = ps - t % ps
        pad = jnp.zeros((b, pad_len), jnp.int32)
        pad_emb = jnp.take(p["byte_emb"], pad, axis=0)
        pad_emb = pad_emb + hash_ngram_embedding(
            pad, cfg["hash_sizes"], cfg["hash_table_size"], p["hash_tables"], e)
        x_emb = jnp.concatenate([x_emb, pad_emb], axis=1)
        t += pad_len

    n_patches = t // ps
    pos = pos_embedding[0, :n_patches, :]
    return _encoder_tail(x_emb, p, cfg, pos)


def byte_latent_transformer(x, params, cfg):
    # pos-embedding add is fused into the encoder-tail kernel epilogue.
    patches = local_encoder(x, params["local_encoder"], cfg, params["pos_embedding"])
    for bp in params["latent"]["blocks"]:
        patches = transformer_block(patches, bp, cfg["n_head"])
    return layernorm(patches, params["latent"]["lnf_w"], params["latent"]["lnf_b"])


# ------------------------------ parameter init --------------------------------

def init_params(key, cfg):
    e = cfg["n_embd"]
    keys = iter(jax.random.split(key, 64))

    def nrm(shape, std=0.02):
        return jax.random.normal(next(keys), shape, jnp.float32) * std

    def ln_params():
        return jnp.ones((e,), jnp.float32), jnp.zeros((e,), jnp.float32)

    def mha_params():
        return {"wqkv": nrm((e, 3 * e)), "bqkv": jnp.zeros((3 * e,), jnp.float32),
                "wo": nrm((e, e)), "bo": jnp.zeros((e,), jnp.float32)}

    def block_params():
        w1, b1 = ln_params()
        w2, b2 = ln_params()
        return {"ln1_w": w1, "ln1_b": b1, "attn": mha_params(),
                "ln2_w": w2, "ln2_b": b2,
                "fc1_w": nrm((e, 4 * e)), "fc1_b": jnp.zeros((4 * e,), jnp.float32),
                "fc2_w": nrm((4 * e, e)), "fc2_b": jnp.zeros((e,), jnp.float32)}

    lnq_w, lnq_b = ln_params()
    lnkv_w, lnkv_b = ln_params()
    enc_ln_w, enc_ln_b = ln_params()
    lnf_w, lnf_b = ln_params()

    n_pos = math.ceil(cfg["block_size"] / cfg["patch_size"])
    return {
        "local_encoder": {
            "byte_emb": nrm((cfg["vocab_size"], e)),
            "hash_tables": {f"hash_{n}": nrm((cfg["hash_table_size"], e))
                            for n in cfg["hash_sizes"]},
            "blocks": [block_params() for _ in range(cfg["n_layers_encoder"])],
            "cross": {"lnq_w": lnq_w, "lnq_b": lnq_b,
                      "lnkv_w": lnkv_w, "lnkv_b": lnkv_b,
                      "attn": mha_params(),
                      "proj_w": nrm((e, e)),
                      "proj_b": jnp.zeros((e,), jnp.float32)},
            "ln_w": enc_ln_w, "ln_b": enc_ln_b,
        },
        "pos_embedding": nrm((1, n_pos, e)),
        "latent": {
            "blocks": [block_params() for _ in range(cfg["n_layers_latent"])],
            "lnf_w": lnf_w, "lnf_b": lnf_b,
        },
    }


# ----------------------------------- main --------------------------------------

if __name__ == "__main__":
    cfg = dict(
        vocab_size=16,
        n_embd=32,
        n_head=4,
        n_layers_encoder=1,
        n_layers_latent=1,
        dropout=0.0,          # eval semantics: dropout == identity
        patch_size=4,
        hash_sizes=(2, 3),
        hash_table_size=64,
        block_size=16,
    )
    key = jax.random.PRNGKey(0)
    pkey, xkey = jax.random.split(key)
    params = init_params(pkey, cfg)

    B, T = 2, 16
    x = jax.random.randint(xkey, (B, T), 0, cfg["vocab_size"], dtype=jnp.int32)

    fwd = jax.jit(lambda xx, pp: byte_latent_transformer(xx, pp, cfg))
    out = jax.block_until_ready(fwd(x, params))

    assert out.shape == (B, T // cfg["patch_size"], cfg["n_embd"]), out.shape
    assert out.dtype == jnp.float32
    assert bool(jnp.all(jnp.isfinite(out)))
    print("KERNEL_OK")
</pallas_src>

<mosaic_0001>
module attributes {stable_mosaic.version = 11 : i64} {
  func.func @_block_kernel(%arg0: i32, %arg1: memref<1x16x32xf32, #tpu.memory_space<vmem>>, %arg2: memref<1x32xf32, #tpu.memory_space<vmem>>, %arg3: memref<1x32xf32, #tpu.memory_space<vmem>>, %arg4: memref<4x32x8xf32, #tpu.memory_space<vmem>>, %arg5: memref<4x32x8xf32, #tpu.memory_space<vmem>>, %arg6: memref<4x32x8xf32, #tpu.memory_space<vmem>>, %arg7: memref<4x1x8xf32, #tpu.memory_space<vmem>>, %arg8: memref<4x1x8xf32, #tpu.memory_space<vmem>>, %arg9: memref<4x1x8xf32, #tpu.memory_space<vmem>>, %arg10: memref<4x8x32xf32, #tpu.memory_space<vmem>>, %arg11: memref<1x32xf32, #tpu.memory_space<vmem>>, %arg12: memref<1x32xf32, #tpu.memory_space<vmem>>, %arg13: memref<1x32xf32, #tpu.memory_space<vmem>>, %arg14: memref<32x128xf32, #tpu.memory_space<vmem>>, %arg15: memref<1x128xf32, #tpu.memory_space<vmem>>, %arg16: memref<128x32xf32, #tpu.memory_space<vmem>>, %arg17: memref<1x32xf32, #tpu.memory_space<vmem>>, %arg18: memref<1x16x32xf32, #tpu.memory_space<vmem>>) attributes {dimension_semantics = [#tpu.dimension_semantics<parallel>], iteration_bounds = array<i64: 2>, scalar_prefetch = 0 : i64, scratch_operands = 0 : i64, tpu.core_type = #tpu.core_type<tc>, window_params = [{transform_indices = @transform_0, window_bounds = array<i64: 1, 16, 32>}, {pipeline_mode = #tpu.pipeline_mode<synchronous>, transform_indices = @transform_1, window_bounds = array<i64: 1, 32>}, {pipeline_mode = #tpu.pipeline_mode<synchronous>, transform_indices = @transform_2, window_bounds = array<i64: 1, 32>}, {pipeline_mode = #tpu.pipeline_mode<synchronous>, transform_indices = @transform_3, window_bounds = array<i64: 4, 32, 8>}, {pipeline_mode = #tpu.pipeline_mode<synchronous>, transform_indices = @transform_4, window_bounds = array<i64: 4, 32, 8>}, {pipeline_mode = #tpu.pipeline_mode<synchronous>, transform_indices = @transform_5, window_bounds = array<i64: 4, 32, 8>}, {pipeline_mode = #tpu.pipeline_mode<synchronous>, transform_indices = @transform_6, window_bounds = array<i64: 4, 1, 8>}, {pipeline_mode = #tpu.pipeline_mode<synchronous>, transform_indices = @transform_7, window_bounds = array<i64: 4, 1, 8>}, {pipeline_mode = #tpu.pipeline_mode<synchronous>, transform_indices = @transform_8, window_bounds = array<i64: 4, 1, 8>}, {pipeline_mode = #tpu.pipeline_mode<synchronous>, transform_indices = @transform_9, window_bounds = array<i64: 4, 8, 32>}, {pipeline_mode = #tpu.pipeline_mode<synchronous>, transform_indices = @transform_10, window_bounds = array<i64: 1, 32>}, {pipeline_mode = #tpu.pipeline_mode<synchronous>, transform_indices = @transform_11, window_bounds = array<i64: 1, 32>}, {pipeline_mode = #tpu.pipeline_mode<synchronous>, transform_indices = @transform_12, window_bounds = array<i64: 1, 32>}, {pipeline_mode = #tpu.pipeline_mode<synchronous>, transform_indices = @transform_13, window_bounds = array<i64: 32, 128>}, {pipeline_mode = #tpu.pipeline_mode<synchronous>, transform_indices = @transform_14, window_bounds = array<i64: 1, 128>}, {pipeline_mode = #tpu.pipeline_mode<synchronous>, transform_indices = @transform_15, window_bounds = array<i64: 128, 32>}, {pipeline_mode = #tpu.pipeline_mode<synchronous>, transform_indices = @transform_16, window_bounds = array<i64: 1, 32>}, {transform_indices = @transform_17, window_bounds = array<i64: 1, 16, 32>}]} {
    %c0 = arith.constant 0 : index
    %c0_0 = arith.constant 0 : index
    %c0_1 = arith.constant 0 : index
    %0 = vector.load %arg1[%c0, %c0_0, %c0_1] : memref<1x16x32xf32, #tpu.memory_space<vmem>>, vector<1x16x32xf32>
    %1 = vector.shape_cast %0 : vector<1x16x32xf32> to vector<16x32xf32>
    %c0_2 = arith.constant 0 : index
    %c0_3 = arith.constant 0 : index
    %2 = vector.load %arg2[%c0_2, %c0_3] : memref<1x32xf32, #tpu.memory_space<vmem>>, vector<1x32xf32>
    %c0_4 = arith.constant 0 : index
    %c0_5 = arith.constant 0 : index
    %3 = vector.load %arg3[%c0_4, %c0_5] : memref<1x32xf32, #tpu.memory_space<vmem>>, vector<1x32xf32>
    %cst = arith.constant dense<0.000000e+00> : vector<16xf32>
    %4 = vector.multi_reduction <add>, %1, %cst [1] : vector<16x32xf32> to vector<16xf32>
    %5 = vector.shape_cast %4 : vector<16xf32> to vector<16x1xf32>
    %cst_6 = arith.constant 3.200000e+01 : f32
    %6 = vector.broadcast %cst_6 : f32 to vector<16x1xf32>
    %7 = arith.divf %5, %6 : vector<16x1xf32>
    %8 = vector.broadcast %7 : vector<16x1xf32> to vector<16x32xf32>
    %9 = arith.subf %1, %8 : vector<16x32xf32>
    %10 = arith.mulf %9, %9 : vector<16x32xf32>
    %cst_7 = arith.constant dense<0.000000e+00> : vector<16xf32>
    %11 = vector.multi_reduction <add>, %10, %cst_7 [1] : vector<16x32xf32> to vector<16xf32>
    %12 = vector.shape_cast %11 : vector<16xf32> to vector<16x1xf32>
    %cst_8 = arith.constant 3.200000e+01 : f32
    %13 = vector.broadcast %cst_8 : f32 to vector<16x1xf32>
    %14 = arith.divf %12, %13 : vector<16x1xf32>
    %15 = vector.broadcast %7 : vector<16x1xf32> to vector<16x32xf32>
    %16 = arith.subf %1, %15 : vector<16x32xf32>
    %cst_9 = arith.constant 9.99999974E-6 : f32
    %17 = vector.broadcast %cst_9 : f32 to vector<16x1xf32>
    %18 = arith.addf %14, %17 : vector<16x1xf32>
    %19 = math.rsqrt %18 : vector<16x1xf32>
    %20 = vector.broadcast %19 : vector<16x1xf32> to vector<16x32xf32>
    %21 = arith.mulf %16, %20 : vector<16x32xf32>
    %22 = vector.broadcast %2 : vector<1x32xf32> to vector<16x32xf32>
    %23 = arith.mulf %21, %22 : vector<16x32xf32>
    %24 = vector.broadcast %3 : vector<1x32xf32> to vector<16x32xf32>
    %25 = arith.addf %23, %24 : vector<16x32xf32>
    %c0_10 = arith.constant 0 : index
    %c0_11 = arith.constant 0 : index
    %26 = vector.load %arg11[%c0_10, %c0_11] : memref<1x32xf32, #tpu.memory_space<vmem>>, vector<1x32xf32>
    %cst_12 = arith.constant 0.000000e+00 : f32
    %27 = vector.broadcast %cst_12 : f32 to vector<16x32xf32>
    %c0_13 = arith.constant 0 : index
    %c0_14 = arith.constant 0 : index
    %c0_15 = arith.constant 0 : index
    %28 = vector.load %arg4[%c0_13, %c0_14, %c0_15] : memref<4x32x8xf32, #tpu.memory_space<vmem>>, vector<1x32x8xf32>
    %29 = vector.shape_cast %28 : vector<1x32x8xf32> to vector<32x8xf32>
    %cst_16 = arith.constant dense<0.000000e+00> : vector<16x8xf32>
    %30 = tpu.matmul %25, %29, %cst_16 {dimension_numbers = #tpu.dot_dimension_numbers<[1], [0], [0], [1], [0, 0, 1, 1], [], []>} : vector<16x32xf32>, vector<32x8xf32>, vector<16x8xf32> -> vector<16x8xf32>
    %c0_17 = arith.constant 0 : index
    %c0_18 = arith.constant 0 : index
    %c0_19 = arith.constant 0 : index
    %31 = vector.load %arg7[%c0_17, %c0_18, %c0_19] : memref<4x1x8xf32, #tpu.memory_space<vmem>>, vector<1x1x8xf32>
    %32 = vector.shape_cast %31 : vector<1x1x8xf32> to vector<1x8xf32>
    %33 = vector.broadcast %32 : vector<1x8xf32> to vector<16x8xf32>
    %34 = arith.addf %30, %33 : vector<16x8xf32>
    %c0_20 = arith.constant 0 : index
    %c0_21 = arith.constant 0 : index
    %c0_22 = arith.constant 0 : index
    %35 = vector.load %arg5[%c0_20, %c0_21, %c0_22] : memref<4x32x8xf32, #tpu.memory_space<vmem>>, vector<1x32x8xf32>
    %36 = vector.shape_cast %35 : vector<1x32x8xf32> to vector<32x8xf32>
    %cst_23 = arith.constant dense<0.000000e+00> : vector<16x8xf32>
    %37 = tpu.matmul %25, %36, %cst_23 {dimension_numbers = #tpu.dot_dimension_numbers<[1], [0], [0], [1], [0, 0, 1, 1], [], []>} : vector<16x32xf32>, vector<32x8xf32>, vector<16x8xf32> -> vector<16x8xf32>
    %c0_24 = arith.constant 0 : index
    %c0_25 = arith.constant 0 : index
    %c0_26 = arith.constant 0 : index
    %38 = vector.load %arg8[%c0_24, %c0_25, %c0_26] : memref<4x1x8xf32, #tpu.memory_space<vmem>>, vector<1x1x8xf32>
    %39 = vector.shape_cast %38 : vector<1x1x8xf32> to vector<1x8xf32>
    %40 = vector.broadcast %39 : vector<1x8xf32> to vector<16x8xf32>
    %41 = arith.addf %37, %40 : vector<16x8xf32>
    %c0_27 = arith.constant 0 : index
    %c0_28 = arith.constant 0 : index
    %c0_29 = arith.constant 0 : index
    %42 = vector.load %arg6[%c0_27, %c0_28, %c0_29] : memref<4x32x8xf32, #tpu.memory_space<vmem>>, vector<1x32x8xf32>
    %43 = vector.shape_cast %42 : vector<1x32x8xf32> to vector<32x8xf32>
    %cst_30 = arith.constant dense<0.000000e+00> : vector<16x8xf32>
    %44 = tpu.matmul %25, %43, %cst_30 {dimension_numbers = #tpu.dot_dimension_numbers<[1], [0], [0], [1], [0, 0, 1, 1], [], []>} : vector<16x32xf32>, vector<32x8xf32>, vector<16x8xf32> -> vector<16x8xf32>
    %c0_31 = arith.constant 0 : index
    %c0_32 = arith.constant 0 : index
    %c0_33 = arith.constant 0 : index
    %45 = vector.load %arg9[%c0_31, %c0_32, %c0_33] : memref<4x1x8xf32, #tpu.memory_space<vmem>>, vector<1x1x8xf32>
    %46 = vector.shape_cast %45 : vector<1x1x8xf32> to vector<1x8xf32>
    %47 = vector.broadcast %46 : vector<1x8xf32> to vector<16x8xf32>
    %48 = arith.addf %44, %47 : vector<16x8xf32>
    %cst_34 = arith.constant dense<0.000000e+00> : vector<16x16xf32>
    %49 = tpu.matmul %34, %41, %cst_34 {dimension_numbers = #tpu.dot_dimension_numbers<[1], [1], [0], [0], [0, 0, 1, 0], [], []>} : vector<16x8xf32>, vector<16x8xf32>, vector<16x16xf32> -> vector<16x16xf32>
    %cst_35 = arith.constant 0.353553385 : f32
    %50 = vector.broadcast %cst_35 : f32 to vector<16x16xf32>
    %51 = arith.mulf %49, %50 : vector<16x16xf32>
    %cst_36 = arith.constant dense<0xFF800000> : vector<16xf32>
    %52 = vector.multi_reduction <maximumf>, %51, %cst_36 [1] : vector<16x16xf32> to vector<16xf32>
    %53 = vector.shape_cast %52 : vector<16xf32> to vector<16x1xf32>
    %54 = vector.broadcast %53 : vector<16x1xf32> to vector<16x16xf32>
    %55 = arith.subf %51, %54 : vector<16x16xf32>
    %56 = math.exp %55 : vector<16x16xf32>
    %cst_37 = arith.constant dense<0.000000e+00> : vector<16xf32>
    %57 = vector.multi_reduction <add>, %56, %cst_37 [1] : vector<16x16xf32> to vector<16xf32>
    %58 = vector.shape_cast %57 : vector<16xf32> to vector<16x1xf32>
    %59 = tpu.reciprocal %58 {approx = true} : vector<16x1xf32> -> vector<16x1xf32>
    %60 = vector.broadcast %59 : vector<16x1xf32> to vector<16x16xf32>
    %61 = arith.mulf %56, %60 : vector<16x16xf32>
    %cst_38 = arith.constant dense<0.000000e+00> : vector<16x8xf32>
    %62 = tpu.matmul %61, %48, %cst_38 {dimension_numbers = #tpu.dot_dimension_numbers<[1], [0], [0], [1], [0, 0, 1, 1], [], []>} : vector<16x16xf32>, vector<16x8xf32>, vector<16x8xf32> -> vector<16x8xf32>
    %c0_39 = arith.constant 0 : index
    %c0_40 = arith.constant 0 : index
    %c0_41 = arith.constant 0 : index
    %63 = vector.load %arg10[%c0_39, %c0_40, %c0_41] : memref<4x8x32xf32, #tpu.memory_space<vmem>>, vector<1x8x32xf32>
    %64 = vector.shape_cast %63 : vector<1x8x32xf32> to vector<8x32xf32>
    %cst_42 = arith.constant dense<0.000000e+00> : vector<16x32xf32>
    %65 = tpu.matmul %62, %64, %cst_42 {dimension_numbers = #tpu.dot_dimension_numbers<[1], [0], [0], [1], [0, 0, 1, 1], [], []>} : vector<16x8xf32>, vector<8x32xf32>, vector<16x32xf32> -> vector<16x32xf32>
    %66 = arith.addf %27, %65 : vector<16x32xf32>
    %c1 = arith.constant 1 : index
    %c0_43 = arith.constant 0 : index
    %c0_44 = arith.constant 0 : index
    %67 = vector.load %arg4[%c1, %c0_43, %c0_44] : memref<4x32x8xf32, #tpu.memory_space<vmem>>, vector<1x32x8xf32>
    %68 = vector.shape_cast %67 : vector<1x32x8xf32> to vector<32x8xf32>
    %cst_45 = arith.constant dense<0.000000e+00> : vector<16x8xf32>
    %69 = tpu.matmul %25, %68, %cst_45 {dimension_numbers = #tpu.dot_dimension_numbers<[1], [0], [0], [1], [0, 0, 1, 1], [], []>} : vector<16x32xf32>, vector<32x8xf32>, vector<16x8xf32> -> vector<16x8xf32>
    %c1_46 = arith.constant 1 : index
    %c0_47 = arith.constant 0 : index
    %c0_48 = arith.constant 0 : index
    %70 = vector.load %arg7[%c1_46, %c0_47, %c0_48] : memref<4x1x8xf32, #tpu.memory_space<vmem>>, vector<1x1x8xf32>
    %71 = vector.shape_cast %70 : vector<1x1x8xf32> to vector<1x8xf32>
    %72 = vector.broadcast %71 : vector<1x8xf32> to vector<16x8xf32>
    %73 = arith.addf %69, %72 : vector<16x8xf32>
    %c1_49 = arith.constant 1 : index
    %c0_50 = arith.constant 0 : index
    %c0_51 = arith.constant 0 : index
    %74 = vector.load %arg5[%c1_49, %c0_50, %c0_51] : memref<4x32x8xf32, #tpu.memory_space<vmem>>, vector<1x32x8xf32>
    %75 = vector.shape_cast %74 : vector<1x32x8xf32> to vector<32x8xf32>
    %cst_52 = arith.constant dense<0.000000e+00> : vector<16x8xf32>
    %76 = tpu.matmul %25, %75, %cst_52 {dimension_numbers = #tpu.dot_dimension_numbers<[1], [0], [0], [1], [0, 0, 1, 1], [], []>} : vector<16x32xf32>, vector<32x8xf32>, vector<16x8xf32> -> vector<16x8xf32>
    %c1_53 = arith.constant 1 : index
    %c0_54 = arith.constant 0 : index
    %c0_55 = arith.constant 0 : index
    %77 = vector.load %arg8[%c1_53, %c0_54, %c0_55] : memref<4x1x8xf32, #tpu.memory_space<vmem>>, vector<1x1x8xf32>
    %78 = vector.shape_cast %77 : vector<1x1x8xf32> to vector<1x8xf32>
    %79 = vector.broadcast %78 : vector<1x8xf32> to vector<16x8xf32>
    %80 = arith.addf %76, %79 : vector<16x8xf32>
    %c1_56 = arith.constant 1 : index
    %c0_57 = arith.constant 0 : index
    %c0_58 = arith.constant 0 : index
    %81 = vector.load %arg6[%c1_56, %c0_57, %c0_58] : memref<4x32x8xf32, #tpu.memory_space<vmem>>, vector<1x32x8xf32>
    %82 = vector.shape_cast %81 : vector<1x32x8xf32> to vector<32x8xf32>
    %cst_59 = arith.constant dense<0.000000e+00> : vector<16x8xf32>
    %83 = tpu.matmul %25, %82, %cst_59 {dimension_numbers = #tpu.dot_dimension_numbers<[1], [0], [0], [1], [0, 0, 1, 1], [], []>} : vector<16x32xf32>, vector<32x8xf32>, vector<16x8xf32> -> vector<16x8xf32>
    %c1_60 = arith.constant 1 : index
    %c0_61 = arith.constant 0 : index
    %c0_62 = arith.constant 0 : index
    %84 = vector.load %arg9[%c1_60, %c0_61, %c0_62] : memref<4x1x8xf32, #tpu.memory_space<vmem>>, vector<1x1x8xf32>
    %85 = vector.shape_cast %84 : vector<1x1x8xf32> to vector<1x8xf32>
    %86 = vector.broadcast %85 : vector<1x8xf32> to vector<16x8xf32>
    %87 = arith.addf %83, %86 : vector<16x8xf32>
    %cst_63 = arith.constant dense<0.000000e+00> : vector<16x16xf32>
    %88 = tpu.matmul %73, %80, %cst_63 {dimension_numbers = #tpu.dot_dimension_numbers<[1], [1], [0], [0], [0, 0, 1, 0], [], []>} : vector<16x8xf32>, vector<16x8xf32>, vector<16x16xf32> -> vector<16x16xf32>
    %cst_64 = arith.constant 0.353553385 : f32
    %89 = vector.broadcast %cst_64 : f32 to vector<16x16xf32>
    %90 = arith.mulf %88, %89 : vector<16x16xf32>
    %cst_65 = arith.constant dense<0xFF800000> : vector<16xf32>
    %91 = vector.multi_reduction <maximumf>, %90, %cst_65 [1] : vector<16x16xf32> to vector<16xf32>
    %92 = vector.shape_cast %91 : vector<16xf32> to vector<16x1xf32>
    %93 = vector.broadcast %92 : vector<16x1xf32> to vector<16x16xf32>
    %94 = arith.subf %90, %93 : vector<16x16xf32>
    %95 = math.exp %94 : vector<16x16xf32>
    %cst_66 = arith.constant dense<0.000000e+00> : vector<16xf32>
    %96 = vector.multi_reduction <add>, %95, %cst_66 [1] : vector<16x16xf32> to vector<16xf32>
    %97 = vector.shape_cast %96 : vector<16xf32> to vector<16x1xf32>
    %98 = tpu.reciprocal %97 {approx = true} : vector<16x1xf32> -> vector<16x1xf32>
    %99 = vector.broadcast %98 : vector<16x1xf32> to vector<16x16xf32>
    %100 = arith.mulf %95, %99 : vector<16x16xf32>
    %cst_67 = arith.constant dense<0.000000e+00> : vector<16x8xf32>
    %101 = tpu.matmul %100, %87, %cst_67 {dimension_numbers = #tpu.dot_dimension_numbers<[1], [0], [0], [1], [0, 0, 1, 1], [], []>} : vector<16x16xf32>, vector<16x8xf32>, vector<16x8xf32> -> vector<16x8xf32>
    %c1_68 = arith.constant 1 : index
    %c0_69 = arith.constant 0 : index
    %c0_70 = arith.constant 0 : index
    %102 = vector.load %arg10[%c1_68, %c0_69, %c0_70] : memref<4x8x32xf32, #tpu.memory_space<vmem>>, vector<1x8x32xf32>
    %103 = vector.shape_cast %102 : vector<1x8x32xf32> to vector<8x32xf32>
    %cst_71 = arith.constant dense<0.000000e+00> : vector<16x32xf32>
    %104 = tpu.matmul %101, %103, %cst_71 {dimension_numbers = #tpu.dot_dimension_numbers<[1], [0], [0], [1], [0, 0, 1, 1], [], []>} : vector<16x8xf32>, vector<8x32xf32>, vector<16x32xf32> -> vector<16x32xf32>
    %105 = arith.addf %66, %104 : vector<16x32xf32>
    %c2 = arith.constant 2 : index
    %c0_72 = arith.constant 0 : index
    %c0_73 = arith.constant 0 : index
    %106 = vector.load %arg4[%c2, %c0_72, %c0_73] : memref<4x32x8xf32, #tpu.memory_space<vmem>>, vector<1x32x8xf32>
    %107 = vector.shape_cast %106 : vector<1x32x8xf32> to vector<32x8xf32>
    %cst_74 = arith.constant dense<0.000000e+00> : vector<16x8xf32>
    %108 = tpu.matmul %25, %107, %cst_74 {dimension_numbers = #tpu.dot_dimension_numbers<[1], [0], [0], [1], [0, 0, 1, 1], [], []>} : vector<16x32xf32>, vector<32x8xf32>, vector<16x8xf32> -> vector<16x8xf32>
    %c2_75 = arith.constant 2 : index
    %c0_76 = arith.constant 0 : index
    %c0_77 = arith.constant 0 : index
    %109 = vector.load %arg7[%c2_75, %c0_76, %c0_77] : memref<4x1x8xf32, #tpu.memory_space<vmem>>, vector<1x1x8xf32>
    %110 = vector.shape_cast %109 : vector<1x1x8xf32> to vector<1x8xf32>
    %111 = vector.broadcast %110 : vector<1x8xf32> to vector<16x8xf32>
    %112 = arith.addf %108, %111 : vector<16x8xf32>
    %c2_78 = arith.constant 2 : index
    %c0_79 = arith.constant 0 : index
    %c0_80 = arith.constant 0 : index
    %113 = vector.load %arg5[%c2_78, %c0_79, %c0_80] : memref<4x32x8xf32, #tpu.memory_space<vmem>>, vector<1x32x8xf32>
    %114 = vector.shape_cast %113 : vector<1x32x8xf32> to vector<32x8xf32>
    %cst_81 = arith.constant dense<0.000000e+00> : vector<16x8xf32>
    %115 = tpu.matmul %25, %114, %cst_81 {dimension_numbers = #tpu.dot_dimension_numbers<[1], [0], [0], [1], [0, 0, 1, 1], [], []>} : vector<16x32xf32>, vector<32x8xf32>, vector<16x8xf32> -> vector<16x8xf32>
    %c2_82 = arith.constant 2 : index
    %c0_83 = arith.constant 0 : index
    %c0_84 = arith.constant 0 : index
    %116 = vector.load %arg8[%c2_82, %c0_83, %c0_84] : memref<4x1x8xf32, #tpu.memory_space<vmem>>, vector<1x1x8xf32>
    %117 = vector.shape_cast %116 : vector<1x1x8xf32> to vector<1x8xf32>
    %118 = vector.broadcast %117 : vector<1x8xf32> to vector<16x8xf32>
    %119 = arith.addf %115, %118 : vector<16x8xf32>
    %c2_85 = arith.constant 2 : index
    %c0_86 = arith.constant 0 : index
    %c0_87 = arith.constant 0 : index
    %120 = vector.load %arg6[%c2_85, %c0_86, %c0_87] : memref<4x32x8xf32, #tpu.memory_space<vmem>>, vector<1x32x8xf32>
    %121 = vector.shape_cast %120 : vector<1x32x8xf32> to vector<32x8xf32>
    %cst_88 = arith.constant dense<0.000000e+00> : vector<16x8xf32>
    %122 = tpu.matmul %25, %121, %cst_88 {dimension_numbers = #tpu.dot_dimension_numbers<[1], [0], [0], [1], [0, 0, 1, 1], [], []>} : vector<16x32xf32>, vector<32x8xf32>, vector<16x8xf32> -> vector<16x8xf32>
    %c2_89 = arith.constant 2 : index
    %c0_90 = arith.constant 0 : index
    %c0_91 = arith.constant 0 : index
    %123 = vector.load %arg9[%c2_89, %c0_90, %c0_91] : memref<4x1x8xf32, #tpu.memory_space<vmem>>, vector<1x1x8xf32>
    %124 = vector.shape_cast %123 : vector<1x1x8xf32> to vector<1x8xf32>
    %125 = vector.broadcast %124 : vector<1x8xf32> to vector<16x8xf32>
    %126 = arith.addf %122, %125 : vector<16x8xf32>
    %cst_92 = arith.constant dense<0.000000e+00> : vector<16x16xf32>
    %127 = tpu.matmul %112, %119, %cst_92 {dimension_numbers = #tpu.dot_dimension_numbers<[1], [1], [0], [0], [0, 0, 1, 0], [], []>} : vector<16x8xf32>, vector<16x8xf32>, vector<16x16xf32> -> vector<16x16xf32>
    %cst_93 = arith.constant 0.353553385 : f32
    %128 = vector.broadcast %cst_93 : f32 to vector<16x16xf32>
    %129 = arith.mulf %127, %128 : vector<16x16xf32>
    %cst_94 = arith.constant dense<0xFF800000> : vector<16xf32>
    %130 = vector.multi_reduction <maximumf>, %129, %cst_94 [1] : vector<16x16xf32> to vector<16xf32>
    %131 = vector.shape_cast %130 : vector<16xf32> to vector<16x1xf32>
    %132 = vector.broadcast %131 : vector<16x1xf32> to vector<16x16xf32>
    %133 = arith.subf %129, %132 : vector<16x16xf32>
    %134 = math.exp %133 : vector<16x16xf32>
    %cst_95 = arith.constant dense<0.000000e+00> : vector<16xf32>
    %135 = vector.multi_reduction <add>, %134, %cst_95 [1] : vector<16x16xf32> to vector<16xf32>
    %136 = vector.shape_cast %135 : vector<16xf32> to vector<16x1xf32>
    %137 = tpu.reciprocal %136 {approx = true} : vector<16x1xf32> -> vector<16x1xf32>
    %138 = vector.broadcast %137 : vector<16x1xf32> to vector<16x16xf32>
    %139 = arith.mulf %134, %138 : vector<16x16xf32>
    %cst_96 = arith.constant dense<0.000000e+00> : vector<16x8xf32>
    %140 = tpu.matmul %139, %126, %cst_96 {dimension_numbers = #tpu.dot_dimension_numbers<[1], [0], [0], [1], [0, 0, 1, 1], [], []>} : vector<16x16xf32>, vector<16x8xf32>, vector<16x8xf32> -> vector<16x8xf32>
    %c2_97 = arith.constant 2 : index
    %c0_98 = arith.constant 0 : index
    %c0_99 = arith.constant 0 : index
    %141 = vector.load %arg10[%c2_97, %c0_98, %c0_99] : memref<4x8x32xf32, #tpu.memory_space<vmem>>, vector<1x8x32xf32>
    %142 = vector.shape_cast %141 : vector<1x8x32xf32> to vector<8x32xf32>
    %cst_100 = arith.constant dense<0.000000e+00> : vector<16x32xf32>
    %143 = tpu.matmul %140, %142, %cst_100 {dimension_numbers = #tpu.dot_dimension_numbers<[1], [0], [0], [1], [0, 0, 1, 1], [], []>} : vector<16x8xf32>, vector<8x32xf32>, vector<16x32xf32> -> vector<16x32xf32>
    %144 = arith.addf %105, %143 : vector<16x32xf32>
    %c3 = arith.constant 3 : index
    %c0_101 = arith.constant 0 : index
    %c0_102 = arith.constant 0 : index
    %145 = vector.load %arg4[%c3, %c0_101, %c0_102] : memref<4x32x8xf32, #tpu.memory_space<vmem>>, vector<1x32x8xf32>
    %146 = vector.shape_cast %145 : vector<1x32x8xf32> to vector<32x8xf32>
    %cst_103 = arith.constant dense<0.000000e+00> : vector<16x8xf32>
    %147 = tpu.matmul %25, %146, %cst_103 {dimension_numbers = #tpu.dot_dimension_numbers<[1], [0], [0], [1], [0, 0, 1, 1], [], []>} : vector<16x32xf32>, vector<32x8xf32>, vector<16x8xf32> -> vector<16x8xf32>
    %c3_104 = arith.constant 3 : index
    %c0_105 = arith.constant 0 : index
    %c0_106 = arith.constant 0 : index
    %148 = vector.load %arg7[%c3_104, %c0_105, %c0_106] : memref<4x1x8xf32, #tpu.memory_space<vmem>>, vector<1x1x8xf32>
    %149 = vector.shape_cast %148 : vector<1x1x8xf32> to vector<1x8xf32>
    %150 = vector.broadcast %149 : vector<1x8xf32> to vector<16x8xf32>
    %151 = arith.addf %147, %150 : vector<16x8xf32>
    %c3_107 = arith.constant 3 : index
    %c0_108 = arith.constant 0 : index
    %c0_109 = arith.constant 0 : index
    %152 = vector.load %arg5[%c3_107, %c0_108, %c0_109] : memref<4x32x8xf32, #tpu.memory_space<vmem>>, vector<1x32x8xf32>
    %153 = vector.shape_cast %152 : vector<1x32x8xf32> to vector<32x8xf32>
    %cst_110 = arith.constant dense<0.000000e+00> : vector<16x8xf32>
    %154 = tpu.matmul %25, %153, %cst_110 {dimension_numbers = #tpu.dot_dimension_numbers<[1], [0], [0], [1], [0, 0, 1, 1], [], []>} : vector<16x32xf32>, vector<32x8xf32>, vector<16x8xf32> -> vector<16x8xf32>
    %c3_111 = arith.constant 3 : index
    %c0_112 = arith.constant 0 : index
    %c0_113 = arith.constant 0 : index
    %155 = vector.load %arg8[%c3_111, %c0_112, %c0_113] : memref<4x1x8xf32, #tpu.memory_space<vmem>>, vector<1x1x8xf32>
    %156 = vector.shape_cast %155 : vector<1x1x8xf32> to vector<1x8xf32>
    %157 = vector.broadcast %156 : vector<1x8xf32> to vector<16x8xf32>
    %158 = arith.addf %154, %157 : vector<16x8xf32>
    %c3_114 = arith.constant 3 : index
    %c0_115 = arith.constant 0 : index
    %c0_116 = arith.constant 0 : index
    %159 = vector.load %arg6[%c3_114, %c0_115, %c0_116] : memref<4x32x8xf32, #tpu.memory_space<vmem>>, vector<1x32x8xf32>
    %160 = vector.shape_cast %159 : vector<1x32x8xf32> to vector<32x8xf32>
    %cst_117 = arith.constant dense<0.000000e+00> : vector<16x8xf32>
    %161 = tpu.matmul %25, %160, %cst_117 {dimension_numbers = #tpu.dot_dimension_numbers<[1], [0], [0], [1], [0, 0, 1, 1], [], []>} : vector<16x32xf32>, vector<32x8xf32>, vector<16x8xf32> -> vector<16x8xf32>
    %c3_118 = arith.constant 3 : index
    %c0_119 = arith.constant 0 : index
    %c0_120 = arith.constant 0 : index
    %162 = vector.load %arg9[%c3_118, %c0_119, %c0_120] : memref<4x1x8xf32, #tpu.memory_space<vmem>>, vector<1x1x8xf32>
    %163 = vector.shape_cast %162 : vector<1x1x8xf32> to vector<1x8xf32>
    %164 = vector.broadcast %163 : vector<1x8xf32> to vector<16x8xf32>
    %165 = arith.addf %161, %164 : vector<16x8xf32>
    %cst_121 = arith.constant dense<0.000000e+00> : vector<16x16xf32>
    %166 = tpu.matmul %151, %158, %cst_121 {dimension_numbers = #tpu.dot_dimension_numbers<[1], [1], [0], [0], [0, 0, 1, 0], [], []>} : vector<16x8xf32>, vector<16x8xf32>, vector<16x16xf32> -> vector<16x16xf32>
    %cst_122 = arith.constant 0.353553385 : f32
    %167 = vector.broadcast %cst_122 : f32 to vector<16x16xf32>
    %168 = arith.mulf %166, %167 : vector<16x16xf32>
    %cst_123 = arith.constant dense<0xFF800000> : vector<16xf32>
    %169 = vector.multi_reduction <maximumf>, %168, %cst_123 [1] : vector<16x16xf32> to vector<16xf32>
    %170 = vector.shape_cast %169 : vector<16xf32> to vector<16x1xf32>
    %171 = vector.broadcast %170 : vector<16x1xf32> to vector<16x16xf32>
    %172 = arith.subf %168, %171 : vector<16x16xf32>
    %173 = math.exp %172 : vector<16x16xf32>
    %cst_124 = arith.constant dense<0.000000e+00> : vector<16xf32>
    %174 = vector.multi_reduction <add>, %173, %cst_124 [1] : vector<16x16xf32> to vector<16xf32>
    %175 = vector.shape_cast %174 : vector<16xf32> to vector<16x1xf32>
    %176 = tpu.reciprocal %175 {approx = true} : vector<16x1xf32> -> vector<16x1xf32>
    %177 = vector.broadcast %176 : vector<16x1xf32> to vector<16x16xf32>
    %178 = arith.mulf %173, %177 : vector<16x16xf32>
    %cst_125 = arith.constant dense<0.000000e+00> : vector<16x8xf32>
    %179 = tpu.matmul %178, %165, %cst_125 {dimension_numbers = #tpu.dot_dimension_numbers<[1], [0], [0], [1], [0, 0, 1, 1], [], []>} : vector<16x16xf32>, vector<16x8xf32>, vector<16x8xf32> -> vector<16x8xf32>
    %c3_126 = arith.constant 3 : index
    %c0_127 = arith.constant 0 : index
    %c0_128 = arith.constant 0 : index
    %180 = vector.load %arg10[%c3_126, %c0_127, %c0_128] : memref<4x8x32xf32, #tpu.memory_space<vmem>>, vector<1x8x32xf32>
    %181 = vector.shape_cast %180 : vector<1x8x32xf32> to vector<8x32xf32>
    %cst_129 = arith.constant dense<0.000000e+00> : vector<16x32xf32>
    %182 = tpu.matmul %179, %181, %cst_129 {dimension_numbers = #tpu.dot_dimension_numbers<[1], [0], [0], [1], [0, 0, 1, 1], [], []>} : vector<16x8xf32>, vector<8x32xf32>, vector<16x32xf32> -> vector<16x32xf32>
    %183 = arith.addf %144, %182 : vector<16x32xf32>
    %184 = vector.broadcast %26 : vector<1x32xf32> to vector<16x32xf32>
    %185 = arith.addf %183, %184 : vector<16x32xf32>
    %186 = arith.addf %1, %185 : vector<16x32xf32>
    %c0_130 = arith.constant 0 : index
    %c0_131 = arith.constant 0 : index
    %187 = vector.load %arg12[%c0_130, %c0_131] : memref<1x32xf32, #tpu.memory_space<vmem>>, vector<1x32xf32>
    %c0_132 = arith.constant 0 : index
    %c0_133 = arith.constant 0 : index
    %188 = vector.load %arg13[%c0_132, %c0_133] : memref<1x32xf32, #tpu.memory_space<vmem>>, vector<1x32xf32>
    %cst_134 = arith.constant dense<0.000000e+00> : vector<16xf32>
    %189 = vector.multi_reduction <add>, %186, %cst_134 [1] : vector<16x32xf32> to vector<16xf32>
    %190 = vector.shape_cast %189 : vector<16xf32> to vector<16x1xf32>
    %cst_135 = arith.constant 3.200000e+01 : f32
    %191 = vector.broadcast %cst_135 : f32 to vector<16x1xf32>
    %192 = arith.divf %190, %191 : vector<16x1xf32>
    %193 = vector.broadcast %192 : vector<16x1xf32> to vector<16x32xf32>
    %194 = arith.subf %186, %193 : vector<16x32xf32>
    %195 = arith.mulf %194, %194 : vector<16x32xf32>
    %cst_136 = arith.constant dense<0.000000e+00> : vector<16xf32>
    %196 = vector.multi_reduction <add>, %195, %cst_136 [1] : vector<16x32xf32> to vector<16xf32>
    %197 = vector.shape_cast %196 : vector<16xf32> to vector<16x1xf32>
    %cst_137 = arith.constant 3.200000e+01 : f32
    %198 = vector.broadcast %cst_137 : f32 to vector<16x1xf32>
    %199 = arith.divf %197, %198 : vector<16x1xf32>
    %200 = vector.broadcast %192 : vector<16x1xf32> to vector<16x32xf32>
    %201 = arith.subf %186, %200 : vector<16x32xf32>
    %cst_138 = arith.constant 9.99999974E-6 : f32
    %202 = vector.broadcast %cst_138 : f32 to vector<16x1xf32>
    %203 = arith.addf %199, %202 : vector<16x1xf32>
    %204 = math.rsqrt %203 : vector<16x1xf32>
    %205 = vector.broadcast %204 : vector<16x1xf32> to vector<16x32xf32>
    %206 = arith.mulf %201, %205 : vector<16x32xf32>
    %207 = vector.broadcast %187 : vector<1x32xf32> to vector<16x32xf32>
    %208 = arith.mulf %206, %207 : vector<16x32xf32>
    %209 = vector.broadcast %188 : vector<1x32xf32> to vector<16x32xf32>
    %210 = arith.addf %208, %209 : vector<16x32xf32>
    %c0_139 = arith.constant 0 : index
    %c0_140 = arith.constant 0 : index
    %211 = vector.load %arg14[%c0_139, %c0_140] : memref<32x128xf32, #tpu.memory_space<vmem>>, vector<32x128xf32>
    %cst_141 = arith.constant dense<0.000000e+00> : vector<16x128xf32>
    %212 = tpu.matmul %210, %211, %cst_141 {dimension_numbers = #tpu.dot_dimension_numbers<[1], [0], [0], [1], [0, 0, 1, 1], [], []>} : vector<16x32xf32>, vector<32x128xf32>, vector<16x128xf32> -> vector<16x128xf32>
    %c0_142 = arith.constant 0 : index
    %c0_143 = arith.constant 0 : index
    %213 = vector.load %arg15[%c0_142, %c0_143] : memref<1x128xf32, #tpu.memory_space<vmem>>, vector<1x128xf32>
    %214 = vector.broadcast %213 : vector<1x128xf32> to vector<16x128xf32>
    %215 = arith.addf %212, %214 : vector<16x128xf32>
    %cst_144 = arith.constant 5.000000e-01 : f32
    %216 = vector.broadcast %cst_144 : f32 to vector<16x128xf32>
    %217 = arith.mulf %216, %215 : vector<16x128xf32>
    %cst_145 = arith.constant 0.707106769 : f32
    %218 = vector.broadcast %cst_145 : f32 to vector<16x128xf32>
    %219 = arith.mulf %215, %218 : vector<16x128xf32>
    %cst_146 = arith.constant 0.000000e+00 : f32
    %220 = vector.broadcast %cst_146 : f32 to vector<16x128xf32>
    %221 = arith.cmpf olt, %219, %220 : vector<16x128xf32>
    %cst_147 = arith.constant -1.000000e+00 : f32
    %cst_148 = arith.constant 1.000000e+00 : f32
    %222 = vector.broadcast %cst_147 : f32 to vector<16x128xf32>
    %223 = vector.broadcast %cst_148 : f32 to vector<16x128xf32>
    %224 = arith.select %221, %222, %223 : vector<16x128xi1>, vector<16x128xf32>
    %225 = math.absf %219 : vector<16x128xf32>
    %cst_149 = arith.constant 0.327591091 : f32
    %226 = vector.broadcast %cst_149 : f32 to vector<16x128xf32>
    %227 = arith.mulf %226, %225 : vector<16x128xf32>
    %cst_150 = arith.constant 1.000000e+00 : f32
    %228 = vector.broadcast %cst_150 : f32 to vector<16x128xf32>
    %229 = arith.addf %228, %227 : vector<16x128xf32>
    %cst_151 = arith.constant 1.000000e+00 : f32
    %230 = vector.broadcast %cst_151 : f32 to vector<16x128xf32>
    %231 = arith.divf %230, %229 : vector<16x128xf32>
    %cst_152 = arith.constant 1.06140542 : f32
    %232 = vector.broadcast %cst_152 : f32 to vector<16x128xf32>
    %233 = arith.mulf %232, %231 : vector<16x128xf32>
    %cst_153 = arith.constant -1.45315206 : f32
    %234 = vector.broadcast %cst_153 : f32 to vector<16x128xf32>
    %235 = arith.addf %233, %234 : vector<16x128xf32>
    %236 = arith.mulf %235, %231 : vector<16x128xf32>
    %cst_154 = arith.constant 1.42141378 : f32
    %237 = vector.broadcast %cst_154 : f32 to vector<16x128xf32>
    %238 = arith.addf %236, %237 : vector<16x128xf32>
    %239 = arith.mulf %238, %231 : vector<16x128xf32>
    %cst_155 = arith.constant -0.284496725 : f32
    %240 = vector.broadcast %cst_155 : f32 to vector<16x128xf32>
    %241 = arith.addf %239, %240 : vector<16x128xf32>
    %242 = arith.mulf %241, %231 : vector<16x128xf32>
    %cst_156 = arith.constant 0.254829586 : f32
    %243 = vector.broadcast %cst_156 : f32 to vector<16x128xf32>
    %244 = arith.addf %242, %243 : vector<16x128xf32>
    %245 = arith.mulf %244, %231 : vector<16x128xf32>
    %cst_157 = arith.constant 0.000000e+00 : f32
    %246 = vector.broadcast %cst_157 : f32 to vector<16x128xf32>
    %247 = arith.subf %246, %225 : vector<16x128xf32>
    %248 = arith.mulf %247, %225 : vector<16x128xf32>
    %249 = math.exp %248 : vector<16x128xf32>
    %250 = arith.mulf %245, %249 : vector<16x128xf32>
    %cst_158 = arith.constant 1.000000e+00 : f32
    %251 = vector.broadcast %cst_158 : f32 to vector<16x128xf32>
    %252 = arith.subf %251, %250 : vector<16x128xf32>
    %253 = arith.mulf %224, %252 : vector<16x128xf32>
    %cst_159 = arith.constant 1.000000e+00 : f32
    %254 = vector.broadcast %cst_159 : f32 to vector<16x128xf32>
    %255 = arith.addf %254, %253 : vector<16x128xf32>
    %256 = arith.mulf %217, %255 : vector<16x128xf32>
    %c0_160 = arith.constant 0 : index
    %c0_161 = arith.constant 0 : index
    %257 = vector.load %arg16[%c0_160, %c0_161] : memref<128x32xf32, #tpu.memory_space<vmem>>, vector<128x32xf32>
    %cst_162 = arith.constant dense<0.000000e+00> : vector<16x32xf32>
    %258 = tpu.matmul %256, %257, %cst_162 {dimension_numbers = #tpu.dot_dimension_numbers<[1], [0], [0], [1], [0, 0, 1, 1], [], []>} : vector<16x128xf32>, vector<128x32xf32>, vector<16x32xf32> -> vector<16x32xf32>
    %c0_163 = arith.constant 0 : index
    %c0_164 = arith.constant 0 : index
    %259 = vector.load %arg17[%c0_163, %c0_164] : memref<1x32xf32, #tpu.memory_space<vmem>>, vector<1x32xf32>
    %260 = vector.broadcast %259 : vector<1x32xf32> to vector<16x32xf32>
    %261 = arith.addf %258, %260 : vector<16x32xf32>
    %262 = arith.addf %186, %261 : vector<16x32xf32>
    %c0_165 = arith.constant 0 : index
    %c0_166 = arith.constant 0 : index
    %c0_167 = arith.constant 0 : index
    %263 = vector.load %arg18[%c0_165, %c0_166, %c0_167] : memref<1x16x32xf32, #tpu.memory_space<vmem>>, vector<1x16x32xf32>
    %264 = vector.shape_cast %263 : vector<1x16x32xf32> to vector<16x32xf32>
    %265 = vector.shape_cast %262 : vector<16x32xf32> to vector<1x16x32xf32>
    tpu.vector_store %arg18[%c0_165, %c0_166, %c0_167], %265 {strides = array<i32>} : memref<1x16x32xf32, #tpu.memory_space<vmem>>, vector<1x16x32xf32>,
    return
  }
  func.func @transform_0(%arg0: i32) -> (i32, i32, i32) {
    %c0_i32 = arith.constant 0 : i32
    %c0_i32_0 = arith.constant 0 : i32
    %c0_i32_1 = arith.constant 0 : i32
    return %arg0, %c0_i32, %c0_i32_0 : i32, i32, i32
  }
  func.func @transform_1(%arg0: i32) -> (i32, i32) {
    %c0_i32 = arith.constant 0 : i32
    %c0_i32_0 = arith.constant 0 : i32
    %c0_i32_1 = arith.constant 0 : i32
    return %c0_i32, %c0_i32_0 : i32, i32
  }
  func.func @transform_2(%arg0: i32) -> (i32, i32) {
    %c0_i32 = arith.constant 0 : i32
    %c0_i32_0 = arith.constant 0 : i32
    %c0_i32_1 = arith.constant 0 : i32
    return %c0_i32, %c0_i32_0 : i32, i32
  }
  func.func @transform_3(%arg0: i32) -> (i32, i32, i32) {
    %c0_i32 = arith.constant 0 : i32
    %c0_i32_0 = arith.constant 0 : i32
    %c0_i32_1 = arith.constant 0 : i32
    %c0_i32_2 = arith.constant 0 : i32
    return %c0_i32, %c0_i32_0, %c0_i32_1 : i32, i32, i32
  }
  func.func @transform_4(%arg0: i32) -> (i32, i32, i32) {
    %c0_i32 = arith.constant 0 : i32
    %c0_i32_0 = arith.constant 0 : i32
    %c0_i32_1 = arith.constant 0 : i32
    %c0_i32_2 = arith.constant 0 : i32
    return %c0_i32, %c0_i32_0, %c0_i32_1 : i32, i32, i32
  }
  func.func @transform_5(%arg0: i32) -> (i32, i32, i32) {
    %c0_i32 = arith.constant 0 : i32
    %c0_i32_0 = arith.constant 0 : i32
    %c0_i32_1 = arith.constant 0 : i32
    %c0_i32_2 = arith.constant 0 : i32
    return %c0_i32, %c0_i32_0, %c0_i32_1 : i32, i32, i32
  }
  func.func @transform_6(%arg0: i32) -> (i32, i32, i32) {
    %c0_i32 = arith.constant 0 : i32
    %c0_i32_0 = arith.constant 0 : i32
    %c0_i32_1 = arith.constant 0 : i32
    %c0_i32_2 = arith.constant 0 : i32
    return %c0_i32, %c0_i32_0, %c0_i32_1 : i32, i32, i32
  }
  func.func @transform_7(%arg0: i32) -> (i32, i32, i32) {
    %c0_i32 = arith.constant 0 : i32
    %c0_i32_0 = arith.constant 0 : i32
    %c0_i32_1 = arith.constant 0 : i32
    %c0_i32_2 = arith.constant 0 : i32
    return %c0_i32, %c0_i32_0, %c0_i32_1 : i32, i32, i32
  }
  func.func @transform_8(%arg0: i32) -> (i32, i32, i32) {
    %c0_i32 = arith.constant 0 : i32
    %c0_i32_0 = arith.constant 0 : i32
    %c0_i32_1 = arith.constant 0 : i32
    %c0_i32_2 = arith.constant 0 : i32
    return %c0_i32, %c0_i32_0, %c0_i32_1 : i32, i32, i32
  }
  func.func @transform_9(%arg0: i32) -> (i32, i32, i32) {
    %c0_i32 = arith.constant 0 : i32
    %c0_i32_0 = arith.constant 0 : i32
    %c0_i32_1 = arith.constant 0 : i32
    %c0_i32_2 = arith.constant 0 : i32
    return %c0_i32, %c0_i32_0, %c0_i32_1 : i32, i32, i32
  }
  func.func @transform_10(%arg0: i32) -> (i32, i32) {
    %c0_i32 = arith.constant 0 : i32
    %c0_i32_0 = arith.constant 0 : i32
    %c0_i32_1 = arith.constant 0 : i32
    return %c0_i32, %c0_i32_0 : i32, i32
  }
  func.func @transform_11(%arg0: i32) -> (i32, i32) {
    %c0_i32 = arith.constant 0 : i32
    %c0_i32_0 = arith.constant 0 : i32
    %c0_i32_1 = arith.constant 0 : i32
    return %c0_i32, %c0_i32_0 : i32, i32
  }
  func.func @transform_12(%arg0: i32) -> (i32, i32) {
    %c0_i32 = arith.constant 0 : i32
    %c0_i32_0 = arith.constant 0 : i32
    %c0_i32_1 = arith.constant 0 : i32
    return %c0_i32, %c0_i32_0 : i32, i32
  }
  func.func @transform_13(%arg0: i32) -> (i32, i32) {
    %c0_i32 = arith.constant 0 : i32
    %c0_i32_0 = arith.constant 0 : i32
    %c0_i32_1 = arith.constant 0 : i32
    return %c0_i32, %c0_i32_0 : i32, i32
  }
  func.func @transform_14(%arg0: i32) -> (i32, i32) {
    %c0_i32 = arith.constant 0 : i32
    %c0_i32_0 = arith.constant 0 : i32
    %c0_i32_1 = arith.constant 0 : i32
    return %c0_i32, %c0_i32_0 : i32, i32
  }
  func.func @transform_15(%arg0: i32) -> (i32, i32) {
    %c0_i32 = arith.constant 0 : i32
    %c0_i32_0 = arith.constant 0 : i32
    %c0_i32_1 = arith.constant 0 : i32
    return %c0_i32, %c0_i32_0 : i32, i32
  }
  func.func @transform_16(%arg0: i32) -> (i32, i32) {
    %c0_i32 = arith.constant 0 : i32
    %c0_i32_0 = arith.constant 0 : i32
    %c0_i32_1 = arith.constant 0 : i32
    return %c0_i32, %c0_i32_0 : i32, i32
  }
  func.func @transform_17(%arg0: i32) -> (i32, i32, i32) {
    %c0_i32 = arith.constant 0 : i32
    %c0_i32_0 = arith.constant 0 : i32
    %c0_i32_1 = arith.constant 0 : i32
    return %arg0, %c0_i32, %c0_i32_0 : i32, i32, i32
  }
}

module attributes {stable_mosaic.version = 11 : i64} {
  func.func @_layernorm_kernel(%arg0: i32, %arg1: memref<8x32xf32, #tpu.memory_space<vmem>>, %arg2: memref<1x32xf32, #tpu.memory_space<vmem>>, %arg3: memref<1x32xf32, #tpu.memory_space<vmem>>, %arg4: memref<8x32xf32, #tpu.memory_space<vmem>>) attributes {dimension_semantics = [#tpu.dimension_semantics<parallel>], iteration_bounds = array<i64: 1>, scalar_prefetch = 0 : i64, scratch_operands = 0 : i64, tpu.core_type = #tpu.core_type<tc>, window_params = [{transform_indices = @transform_0, window_bounds = array<i64: 8, 32>}, {pipeline_mode = #tpu.pipeline_mode<synchronous>, transform_indices = @transform_1, window_bounds = array<i64: 1, 32>}, {pipeline_mode = #tpu.pipeline_mode<synchronous>, transform_indices = @transform_2, window_bounds = array<i64: 1, 32>}, {transform_indices = @transform_3, window_bounds = array<i64: 8, 32>}]} {
    %c0 = arith.constant 0 : index
    %c0_0 = arith.constant 0 : index
    %0 = vector.load %arg1[%c0, %c0_0] : memref<8x32xf32, #tpu.memory_space<vmem>>, vector<8x32xf32>
    %c0_1 = arith.constant 0 : index
    %c0_2 = arith.constant 0 : index
    %1 = vector.load %arg2[%c0_1, %c0_2] : memref<1x32xf32, #tpu.memory_space<vmem>>, vector<1x32xf32>
    %c0_3 = arith.constant 0 : index
    %c0_4 = arith.constant 0 : index
    %2 = vector.load %arg3[%c0_3, %c0_4] : memref<1x32xf32, #tpu.memory_space<vmem>>, vector<1x32xf32>
    %cst = arith.constant dense<0.000000e+00> : vector<8xf32>
    %3 = vector.multi_reduction <add>, %0, %cst [1] : vector<8x32xf32> to vector<8xf32>
    %4 = vector.shape_cast %3 : vector<8xf32> to vector<8x1xf32>
    %cst_5 = arith.constant 3.200000e+01 : f32
    %5 = vector.broadcast %cst_5 : f32 to vector<8x1xf32>
    %6 = arith.divf %4, %5 : vector<8x1xf32>
    %7 = vector.broadcast %6 : vector<8x1xf32> to vector<8x32xf32>
    %8 = arith.subf %0, %7 : vector<8x32xf32>
    %9 = arith.mulf %8, %8 : vector<8x32xf32>
    %cst_6 = arith.constant dense<0.000000e+00> : vector<8xf32>
    %10 = vector.multi_reduction <add>, %9, %cst_6 [1] : vector<8x32xf32> to vector<8xf32>
    %11 = vector.shape_cast %10 : vector<8xf32> to vector<8x1xf32>
    %cst_7 = arith.constant 3.200000e+01 : f32
    %12 = vector.broadcast %cst_7 : f32 to vector<8x1xf32>
    %13 = arith.divf %11, %12 : vector<8x1xf32>
    %14 = vector.broadcast %6 : vector<8x1xf32> to vector<8x32xf32>
    %15 = arith.subf %0, %14 : vector<8x32xf32>
    %cst_8 = arith.constant 9.99999974E-6 : f32
    %16 = vector.broadcast %cst_8 : f32 to vector<8x1xf32>
    %17 = arith.addf %13, %16 : vector<8x1xf32>
    %18 = math.rsqrt %17 : vector<8x1xf32>
    %19 = vector.broadcast %18 : vector<8x1xf32> to vector<8x32xf32>
    %20 = arith.mulf %15, %19 : vector<8x32xf32>
    %21 = vector.broadcast %1 : vector<1x32xf32> to vector<8x32xf32>
    %22 = arith.mulf %20, %21 : vector<8x32xf32>
    %23 = vector.broadcast %2 : vector<1x32xf32> to vector<8x32xf32>
    %24 = arith.addf %22, %23 : vector<8x32xf32>
    %c0_9 = arith.constant 0 : index
    %c0_10 = arith.constant 0 : index
    %25 = vector.load %arg4[%c0_9, %c0_10] : memref<8x32xf32, #tpu.memory_space<vmem>>, vector<8x32xf32>
    tpu.vector_store %arg4[%c0_9, %c0_10], %24 {strides = array<i32>} : memref<8x32xf32, #tpu.memory_space<vmem>>, vector<8x32xf32>,
    return
  }
  func.func @transform_0(%arg0: i32) -> (i32, i32) {
    %c0_i32 = arith.constant 0 : i32
    %c0_i32_0 = arith.constant 0 : i32
    return %arg0, %c0_i32 : i32, i32
  }
  func.func @transform_1(%arg0: i32) -> (i32, i32) {
    %c0_i32 = arith.constant 0 : i32
    %c0_i32_0 = arith.constant 0 : i32
    %c0_i32_1 = arith.constant 0 : i32
    return %c0_i32, %c0_i32_0 : i32, i32
  }
  func.func @transform_2(%arg0: i32) -> (i32, i32) {
    %c0_i32 = arith.constant 0 : i32
    %c0_i32_0 = arith.constant 0 : i32
    %c0_i32_1 = arith.constant 0 : i32
    return %c0_i32, %c0_i32_0 : i32, i32
  }
  func.func @transform_3(%arg0: i32) -> (i32, i32) {
    %c0_i32 = arith.constant 0 : i32
    %c0_i32_0 = arith.constant 0 : i32
    return %arg0, %c0_i32 : i32, i32
  }
}

module attributes {stable_mosaic.version = 11 : i64} {
  func.func @_encoder_tail_kernel(%arg0: i32, %arg1: memref<1x16x32xf32, #tpu.memory_space<vmem>>, %arg2: memref<4x16xf32, #tpu.memory_space<vmem>>, %arg3: memref<1x32xf32, #tpu.memory_space<vmem>>, %arg4: memref<1x32xf32, #tpu.memory_space<vmem>>, %arg5: memref<1x32xf32, #tpu.memory_space<vmem>>, %arg6: memref<1x32xf32, #tpu.memory_space<vmem>>, %arg7: memref<4x32x8xf32, #tpu.memory_space<vmem>>, %arg8: memref<4x32x8xf32, #tpu.memory_space<vmem>>, %arg9: memref<4x32x8xf32, #tpu.memory_space<vmem>>, %arg10: memref<4x1x8xf32, #tpu.memory_space<vmem>>, %arg11: memref<4x1x8xf32, #tpu.memory_space<vmem>>, %arg12: memref<4x1x8xf32, #tpu.memory_space<vmem>>, %arg13: memref<4x8x32xf32, #tpu.memory_space<vmem>>, %arg14: memref<1x32xf32, #tpu.memory_space<vmem>>, %arg15: memref<32x32xf32, #tpu.memory_space<vmem>>, %arg16: memref<1x32xf32, #tpu.memory_space<vmem>>, %arg17: memref<1x32xf32, #tpu.memory_space<vmem>>, %arg18: memref<1x32xf32, #tpu.memory_space<vmem>>, %arg19: memref<4x32xf32, #tpu.memory_space<vmem>>, %arg20: memref<1x4x32xf32, #tpu.memory_space<vmem>>) attributes {dimension_semantics = [#tpu.dimension_semantics<parallel>], iteration_bounds = array<i64: 2>, scalar_prefetch = 0 : i64, scratch_operands = 0 : i64, tpu.core_type = #tpu.core_type<tc>, window_params = [{transform_indices = @transform_0, window_bounds = array<i64: 1, 16, 32>}, {pipeline_mode = #tpu.pipeline_mode<synchronous>, transform_indices = @transform_1, window_bounds = array<i64: 4, 16>}, {pipeline_mode = #tpu.pipeline_mode<synchronous>, transform_indices = @transform_2, window_bounds = array<i64: 1, 32>}, {pipeline_mode = #tpu.pipeline_mode<synchronous>, transform_indices = @transform_3, window_bounds = array<i64: 1, 32>}, {pipeline_mode = #tpu.pipeline_mode<synchronous>, transform_indices = @transform_4, window_bounds = array<i64: 1, 32>}, {pipeline_mode = #tpu.pipeline_mode<synchronous>, transform_indices = @transform_5, window_bounds = array<i64: 1, 32>}, {pipeline_mode = #tpu.pipeline_mode<synchronous>, transform_indices = @transform_6, window_bounds = array<i64: 4, 32, 8>}, {pipeline_mode = #tpu.pipeline_mode<synchronous>, transform_indices = @transform_7, window_bounds = array<i64: 4, 32, 8>}, {pipeline_mode = #tpu.pipeline_mode<synchronous>, transform_indices = @transform_8, window_bounds = array<i64: 4, 32, 8>}, {pipeline_mode = #tpu.pipeline_mode<synchronous>, transform_indices = @transform_9, window_bounds = array<i64: 4, 1, 8>}, {pipeline_mode = #tpu.pipeline_mode<synchronous>, transform_indices = @transform_10, window_bounds = array<i64: 4, 1, 8>}, {pipeline_mode = #tpu.pipeline_mode<synchronous>, transform_indices = @transform_11, window_bounds = array<i64: 4, 1, 8>}, {pipeline_mode = #tpu.pipeline_mode<synchronous>, transform_indices = @transform_12, window_bounds = array<i64: 4, 8, 32>}, {pipeline_mode = #tpu.pipeline_mode<synchronous>, transform_indices = @transform_13, window_bounds = array<i64: 1, 32>}, {pipeline_mode = #tpu.pipeline_mode<synchronous>, transform_indices = @transform_14, window_bounds = array<i64: 32, 32>}, {pipeline_mode = #tpu.pipeline_mode<synchronous>, transform_indices = @transform_15, window_bounds = array<i64: 1, 32>}, {pipeline_mode = #tpu.pipeline_mode<synchronous>, transform_indices = @transform_16, window_bounds = array<i64: 1, 32>}, {pipeline_mode = #tpu.pipeline_mode<synchronous>, transform_indices = @transform_17, window_bounds = array<i64: 1, 32>}, {pipeline_mode = #tpu.pipeline_mode<synchronous>, transform_indices = @transform_18, window_bounds = array<i64: 4, 32>}, {transform_indices = @transform_19, window_bounds = array<i64: 1, 4, 32>}]} {
    %c0 = arith.constant 0 : index
    %c0_0 = arith.constant 0 : index
    %c0_1 = arith.constant 0 : index
    %0 = vector.load %arg1[%c0, %c0_0, %c0_1] : memref<1x16x32xf32, #tpu.memory_space<vmem>>, vector<1x16x32xf32>
    %1 = vector.shape_cast %0 : vector<1x16x32xf32> to vector<16x32xf32>
    %c0_2 = arith.constant 0 : index
    %c0_3 = arith.constant 0 : index
    %2 = vector.load %arg2[%c0_2, %c0_3] : memref<4x16xf32, #tpu.memory_space<vmem>>, vector<4x16xf32>
    %cst = arith.constant dense<0.000000e+00> : vector<4x32xf32>
    %3 = tpu.matmul %2, %1, %cst {dimension_numbers = #tpu.dot_dimension_numbers<[1], [0], [0], [1], [0, 0, 1, 1], [], []>} : vector<4x16xf32>, vector<16x32xf32>, vector<4x32xf32> -> vector<4x32xf32>
    %c0_4 = arith.constant 0 : index
    %c0_5 = arith.constant 0 : index
    %4 = vector.load %arg3[%c0_4, %c0_5] : memref<1x32xf32, #tpu.memory_space<vmem>>, vector<1x32xf32>
    %c0_6 = arith.constant 0 : index
    %c0_7 = arith.constant 0 : index
    %5 = vector.load %arg4[%c0_6, %c0_7] : memref<1x32xf32, #tpu.memory_space<vmem>>, vector<1x32xf32>
    %cst_8 = arith.constant dense<0.000000e+00> : vector<4xf32>
    %6 = vector.multi_reduction <add>, %3, %cst_8 [1] : vector<4x32xf32> to vector<4xf32>
    %7 = vector.shape_cast %6 : vector<4xf32> to vector<4x1xf32>
    %cst_9 = arith.constant 3.200000e+01 : f32
    %8 = vector.broadcast %cst_9 : f32 to vector<4x1xf32>
    %9 = arith.divf %7, %8 : vector<4x1xf32>
    %10 = vector.broadcast %9 : vector<4x1xf32> to vector<4x32xf32>
    %11 = arith.subf %3, %10 : vector<4x32xf32>
    %12 = arith.mulf %11, %11 : vector<4x32xf32>
    %cst_10 = arith.constant dense<0.000000e+00> : vector<4xf32>
    %13 = vector.multi_reduction <add>, %12, %cst_10 [1] : vector<4x32xf32> to vector<4xf32>
    %14 = vector.shape_cast %13 : vector<4xf32> to vector<4x1xf32>
    %cst_11 = arith.constant 3.200000e+01 : f32
    %15 = vector.broadcast %cst_11 : f32 to vector<4x1xf32>
    %16 = arith.divf %14, %15 : vector<4x1xf32>
    %17 = vector.broadcast %9 : vector<4x1xf32> to vector<4x32xf32>
    %18 = arith.subf %3, %17 : vector<4x32xf32>
    %cst_12 = arith.constant 9.99999974E-6 : f32
    %19 = vector.broadcast %cst_12 : f32 to vector<4x1xf32>
    %20 = arith.addf %16, %19 : vector<4x1xf32>
    %21 = math.rsqrt %20 : vector<4x1xf32>
    %22 = vector.broadcast %21 : vector<4x1xf32> to vector<4x32xf32>
    %23 = arith.mulf %18, %22 : vector<4x32xf32>
    %24 = vector.broadcast %4 : vector<1x32xf32> to vector<4x32xf32>
    %25 = arith.mulf %23, %24 : vector<4x32xf32>
    %26 = vector.broadcast %5 : vector<1x32xf32> to vector<4x32xf32>
    %27 = arith.addf %25, %26 : vector<4x32xf32>
    %c0_13 = arith.constant 0 : index
    %c0_14 = arith.constant 0 : index
    %28 = vector.load %arg5[%c0_13, %c0_14] : memref<1x32xf32, #tpu.memory_space<vmem>>, vector<1x32xf32>
    %c0_15 = arith.constant 0 : index
    %c0_16 = arith.constant 0 : index
    %29 = vector.load %arg6[%c0_15, %c0_16] : memref<1x32xf32, #tpu.memory_space<vmem>>, vector<1x32xf32>
    %cst_17 = arith.constant dense<0.000000e+00> : vector<16xf32>
    %30 = vector.multi_reduction <add>, %1, %cst_17 [1] : vector<16x32xf32> to vector<16xf32>
    %31 = vector.shape_cast %30 : vector<16xf32> to vector<16x1xf32>
    %cst_18 = arith.constant 3.200000e+01 : f32
    %32 = vector.broadcast %cst_18 : f32 to vector<16x1xf32>
    %33 = arith.divf %31, %32 : vector<16x1xf32>
    %34 = vector.broadcast %33 : vector<16x1xf32> to vector<16x32xf32>
    %35 = arith.subf %1, %34 : vector<16x32xf32>
    %36 = arith.mulf %35, %35 : vector<16x32xf32>
    %cst_19 = arith.constant dense<0.000000e+00> : vector<16xf32>
    %37 = vector.multi_reduction <add>, %36, %cst_19 [1] : vector<16x32xf32> to vector<16xf32>
    %38 = vector.shape_cast %37 : vector<16xf32> to vector<16x1xf32>
    %cst_20 = arith.constant 3.200000e+01 : f32
    %39 = vector.broadcast %cst_20 : f32 to vector<16x1xf32>
    %40 = arith.divf %38, %39 : vector<16x1xf32>
    %41 = vector.broadcast %33 : vector<16x1xf32> to vector<16x32xf32>
    %42 = arith.subf %1, %41 : vector<16x32xf32>
    %cst_21 = arith.constant 9.99999974E-6 : f32
    %43 = vector.broadcast %cst_21 : f32 to vector<16x1xf32>
    %44 = arith.addf %40, %43 : vector<16x1xf32>
    %45 = math.rsqrt %44 : vector<16x1xf32>
    %46 = vector.broadcast %45 : vector<16x1xf32> to vector<16x32xf32>
    %47 = arith.mulf %42, %46 : vector<16x32xf32>
    %48 = vector.broadcast %28 : vector<1x32xf32> to vector<16x32xf32>
    %49 = arith.mulf %47, %48 : vector<16x32xf32>
    %50 = vector.broadcast %29 : vector<1x32xf32> to vector<16x32xf32>
    %51 = arith.addf %49, %50 : vector<16x32xf32>
    %c0_22 = arith.constant 0 : index
    %c0_23 = arith.constant 0 : index
    %52 = vector.load %arg14[%c0_22, %c0_23] : memref<1x32xf32, #tpu.memory_space<vmem>>, vector<1x32xf32>
    %cst_24 = arith.constant 0.000000e+00 : f32
    %53 = vector.broadcast %cst_24 : f32 to vector<4x32xf32>
    %c0_25 = arith.constant 0 : index
    %c0_26 = arith.constant 0 : index
    %c0_27 = arith.constant 0 : index
    %54 = vector.load %arg7[%c0_25, %c0_26, %c0_27] : memref<4x32x8xf32, #tpu.memory_space<vmem>>, vector<1x32x8xf32>
    %55 = vector.shape_cast %54 : vector<1x32x8xf32> to vector<32x8xf32>
    %cst_28 = arith.constant dense<0.000000e+00> : vector<4x8xf32>
    %56 = tpu.matmul %27, %55, %cst_28 {dimension_numbers = #tpu.dot_dimension_numbers<[1], [0], [0], [1], [0, 0, 1, 1], [], []>} : vector<4x32xf32>, vector<32x8xf32>, vector<4x8xf32> -> vector<4x8xf32>
    %c0_29 = arith.constant 0 : index
    %c0_30 = arith.constant 0 : index
    %c0_31 = arith.constant 0 : index
    %57 = vector.load %arg10[%c0_29, %c0_30, %c0_31] : memref<4x1x8xf32, #tpu.memory_space<vmem>>, vector<1x1x8xf32>
    %58 = vector.shape_cast %57 : vector<1x1x8xf32> to vector<1x8xf32>
    %59 = vector.broadcast %58 : vector<1x8xf32> to vector<4x8xf32>
    %60 = arith.addf %56, %59 : vector<4x8xf32>
    %c0_32 = arith.constant 0 : index
    %c0_33 = arith.constant 0 : index
    %c0_34 = arith.constant 0 : index
    %61 = vector.load %arg8[%c0_32, %c0_33, %c0_34] : memref<4x32x8xf32, #tpu.memory_space<vmem>>, vector<1x32x8xf32>
    %62 = vector.shape_cast %61 : vector<1x32x8xf32> to vector<32x8xf32>
    %cst_35 = arith.constant dense<0.000000e+00> : vector<16x8xf32>
    %63 = tpu.matmul %51, %62, %cst_35 {dimension_numbers = #tpu.dot_dimension_numbers<[1], [0], [0], [1], [0, 0, 1, 1], [], []>} : vector<16x32xf32>, vector<32x8xf32>, vector<16x8xf32> -> vector<16x8xf32>
    %c0_36 = arith.constant 0 : index
    %c0_37 = arith.constant 0 : index
    %c0_38 = arith.constant 0 : index
    %64 = vector.load %arg11[%c0_36, %c0_37, %c0_38] : memref<4x1x8xf32, #tpu.memory_space<vmem>>, vector<1x1x8xf32>
    %65 = vector.shape_cast %64 : vector<1x1x8xf32> to vector<1x8xf32>
    %66 = vector.broadcast %65 : vector<1x8xf32> to vector<16x8xf32>
    %67 = arith.addf %63, %66 : vector<16x8xf32>
    %c0_39 = arith.constant 0 : index
    %c0_40 = arith.constant 0 : index
    %c0_41 = arith.constant 0 : index
    %68 = vector.load %arg9[%c0_39, %c0_40, %c0_41] : memref<4x32x8xf32, #tpu.memory_space<vmem>>, vector<1x32x8xf32>
    %69 = vector.shape_cast %68 : vector<1x32x8xf32> to vector<32x8xf32>
    %cst_42 = arith.constant dense<0.000000e+00> : vector<16x8xf32>
    %70 = tpu.matmul %51, %69, %cst_42 {dimension_numbers = #tpu.dot_dimension_numbers<[1], [0], [0], [1], [0, 0, 1, 1], [], []>} : vector<16x32xf32>, vector<32x8xf32>, vector<16x8xf32> -> vector<16x8xf32>
    %c0_43 = arith.constant 0 : index
    %c0_44 = arith.constant 0 : index
    %c0_45 = arith.constant 0 : index
    %71 = vector.load %arg12[%c0_43, %c0_44, %c0_45] : memref<4x1x8xf32, #tpu.memory_space<vmem>>, vector<1x1x8xf32>
    %72 = vector.shape_cast %71 : vector<1x1x8xf32> to vector<1x8xf32>
    %73 = vector.broadcast %72 : vector<1x8xf32> to vector<16x8xf32>
    %74 = arith.addf %70, %73 : vector<16x8xf32>
    %cst_46 = arith.constant dense<0.000000e+00> : vector<4x16xf32>
    %75 = tpu.matmul %60, %67, %cst_46 {dimension_numbers = #tpu.dot_dimension_numbers<[1], [1], [0], [0], [0, 0, 1, 0], [], []>} : vector<4x8xf32>, vector<16x8xf32>, vector<4x16xf32> -> vector<4x16xf32>
    %cst_47 = arith.constant 0.353553385 : f32
    %76 = vector.broadcast %cst_47 : f32 to vector<4x16xf32>
    %77 = arith.mulf %75, %76 : vector<4x16xf32>
    %cst_48 = arith.constant dense<0xFF800000> : vector<4xf32>
    %78 = vector.multi_reduction <maximumf>, %77, %cst_48 [1] : vector<4x16xf32> to vector<4xf32>
    %79 = vector.shape_cast %78 : vector<4xf32> to vector<4x1xf32>
    %80 = vector.broadcast %79 : vector<4x1xf32> to vector<4x16xf32>
    %81 = arith.subf %77, %80 : vector<4x16xf32>
    %82 = math.exp %81 : vector<4x16xf32>
    %cst_49 = arith.constant dense<0.000000e+00> : vector<4xf32>
    %83 = vector.multi_reduction <add>, %82, %cst_49 [1] : vector<4x16xf32> to vector<4xf32>
    %84 = vector.shape_cast %83 : vector<4xf32> to vector<4x1xf32>
    %85 = tpu.reciprocal %84 {approx = true} : vector<4x1xf32> -> vector<4x1xf32>
    %86 = vector.broadcast %85 : vector<4x1xf32> to vector<4x16xf32>
    %87 = arith.mulf %82, %86 : vector<4x16xf32>
    %cst_50 = arith.constant dense<0.000000e+00> : vector<4x8xf32>
    %88 = tpu.matmul %87, %74, %cst_50 {dimension_numbers = #tpu.dot_dimension_numbers<[1], [0], [0], [1], [0, 0, 1, 1], [], []>} : vector<4x16xf32>, vector<16x8xf32>, vector<4x8xf32> -> vector<4x8xf32>
    %c0_51 = arith.constant 0 : index
    %c0_52 = arith.constant 0 : index
    %c0_53 = arith.constant 0 : index
    %89 = vector.load %arg13[%c0_51, %c0_52, %c0_53] : memref<4x8x32xf32, #tpu.memory_space<vmem>>, vector<1x8x32xf32>
    %90 = vector.shape_cast %89 : vector<1x8x32xf32> to vector<8x32xf32>
    %cst_54 = arith.constant dense<0.000000e+00> : vector<4x32xf32>
    %91 = tpu.matmul %88, %90, %cst_54 {dimension_numbers = #tpu.dot_dimension_numbers<[1], [0], [0], [1], [0, 0, 1, 1], [], []>} : vector<4x8xf32>, vector<8x32xf32>, vector<4x32xf32> -> vector<4x32xf32>
    %92 = arith.addf %53, %91 : vector<4x32xf32>
    %c1 = arith.constant 1 : index
    %c0_55 = arith.constant 0 : index
    %c0_56 = arith.constant 0 : index
    %93 = vector.load %arg7[%c1, %c0_55, %c0_56] : memref<4x32x8xf32, #tpu.memory_space<vmem>>, vector<1x32x8xf32>
    %94 = vector.shape_cast %93 : vector<1x32x8xf32> to vector<32x8xf32>
    %cst_57 = arith.constant dense<0.000000e+00> : vector<4x8xf32>
    %95 = tpu.matmul %27, %94, %cst_57 {dimension_numbers = #tpu.dot_dimension_numbers<[1], [0], [0], [1], [0, 0, 1, 1], [], []>} : vector<4x32xf32>, vector<32x8xf32>, vector<4x8xf32> -> vector<4x8xf32>
    %c1_58 = arith.constant 1 : index
    %c0_59 = arith.constant 0 : index
    %c0_60 = arith.constant 0 : index
    %96 = vector.load %arg10[%c1_58, %c0_59, %c0_60] : memref<4x1x8xf32, #tpu.memory_space<vmem>>, vector<1x1x8xf32>
    %97 = vector.shape_cast %96 : vector<1x1x8xf32> to vector<1x8xf32>
    %98 = vector.broadcast %97 : vector<1x8xf32> to vector<4x8xf32>
    %99 = arith.addf %95, %98 : vector<4x8xf32>
    %c1_61 = arith.constant 1 : index
    %c0_62 = arith.constant 0 : index
    %c0_63 = arith.constant 0 : index
    %100 = vector.load %arg8[%c1_61, %c0_62, %c0_63] : memref<4x32x8xf32, #tpu.memory_space<vmem>>, vector<1x32x8xf32>
    %101 = vector.shape_cast %100 : vector<1x32x8xf32> to vector<32x8xf32>
    %cst_64 = arith.constant dense<0.000000e+00> : vector<16x8xf32>
    %102 = tpu.matmul %51, %101, %cst_64 {dimension_numbers = #tpu.dot_dimension_numbers<[1], [0], [0], [1], [0, 0, 1, 1], [], []>} : vector<16x32xf32>, vector<32x8xf32>, vector<16x8xf32> -> vector<16x8xf32>
    %c1_65 = arith.constant 1 : index
    %c0_66 = arith.constant 0 : index
    %c0_67 = arith.constant 0 : index
    %103 = vector.load %arg11[%c1_65, %c0_66, %c0_67] : memref<4x1x8xf32, #tpu.memory_space<vmem>>, vector<1x1x8xf32>
    %104 = vector.shape_cast %103 : vector<1x1x8xf32> to vector<1x8xf32>
    %105 = vector.broadcast %104 : vector<1x8xf32> to vector<16x8xf32>
    %106 = arith.addf %102, %105 : vector<16x8xf32>
    %c1_68 = arith.constant 1 : index
    %c0_69 = arith.constant 0 : index
    %c0_70 = arith.constant 0 : index
    %107 = vector.load %arg9[%c1_68, %c0_69, %c0_70] : memref<4x32x8xf32, #tpu.memory_space<vmem>>, vector<1x32x8xf32>
    %108 = vector.shape_cast %107 : vector<1x32x8xf32> to vector<32x8xf32>
    %cst_71 = arith.constant dense<0.000000e+00> : vector<16x8xf32>
    %109 = tpu.matmul %51, %108, %cst_71 {dimension_numbers = #tpu.dot_dimension_numbers<[1], [0], [0], [1], [0, 0, 1, 1], [], []>} : vector<16x32xf32>, vector<32x8xf32>, vector<16x8xf32> -> vector<16x8xf32>
    %c1_72 = arith.constant 1 : index
    %c0_73 = arith.constant 0 : index
    %c0_74 = arith.constant 0 : index
    %110 = vector.load %arg12[%c1_72, %c0_73, %c0_74] : memref<4x1x8xf32, #tpu.memory_space<vmem>>, vector<1x1x8xf32>
    %111 = vector.shape_cast %110 : vector<1x1x8xf32> to vector<1x8xf32>
    %112 = vector.broadcast %111 : vector<1x8xf32> to vector<16x8xf32>
    %113 = arith.addf %109, %112 : vector<16x8xf32>
    %cst_75 = arith.constant dense<0.000000e+00> : vector<4x16xf32>
    %114 = tpu.matmul %99, %106, %cst_75 {dimension_numbers = #tpu.dot_dimension_numbers<[1], [1], [0], [0], [0, 0, 1, 0], [], []>} : vector<4x8xf32>, vector<16x8xf32>, vector<4x16xf32> -> vector<4x16xf32>
    %cst_76 = arith.constant 0.353553385 : f32
    %115 = vector.broadcast %cst_76 : f32 to vector<4x16xf32>
    %116 = arith.mulf %114, %115 : vector<4x16xf32>
    %cst_77 = arith.constant dense<0xFF800000> : vector<4xf32>
    %117 = vector.multi_reduction <maximumf>, %116, %cst_77 [1] : vector<4x16xf32> to vector<4xf32>
    %118 = vector.shape_cast %117 : vector<4xf32> to vector<4x1xf32>
    %119 = vector.broadcast %118 : vector<4x1xf32> to vector<4x16xf32>
    %120 = arith.subf %116, %119 : vector<4x16xf32>
    %121 = math.exp %120 : vector<4x16xf32>
    %cst_78 = arith.constant dense<0.000000e+00> : vector<4xf32>
    %122 = vector.multi_reduction <add>, %121, %cst_78 [1] : vector<4x16xf32> to vector<4xf32>
    %123 = vector.shape_cast %122 : vector<4xf32> to vector<4x1xf32>
    %124 = tpu.reciprocal %123 {approx = true} : vector<4x1xf32> -> vector<4x1xf32>
    %125 = vector.broadcast %124 : vector<4x1xf32> to vector<4x16xf32>
    %126 = arith.mulf %121, %125 : vector<4x16xf32>
    %cst_79 = arith.constant dense<0.000000e+00> : vector<4x8xf32>
    %127 = tpu.matmul %126, %113, %cst_79 {dimension_numbers = #tpu.dot_dimension_numbers<[1], [0], [0], [1], [0, 0, 1, 1], [], []>} : vector<4x16xf32>, vector<16x8xf32>, vector<4x8xf32> -> vector<4x8xf32>
    %c1_80 = arith.constant 1 : index
    %c0_81 = arith.constant 0 : index
    %c0_82 = arith.constant 0 : index
    %128 = vector.load %arg13[%c1_80, %c0_81, %c0_82] : memref<4x8x32xf32, #tpu.memory_space<vmem>>, vector<1x8x32xf32>
    %129 = vector.shape_cast %128 : vector<1x8x32xf32> to vector<8x32xf32>
    %cst_83 = arith.constant dense<0.000000e+00> : vector<4x32xf32>
    %130 = tpu.matmul %127, %129, %cst_83 {dimension_numbers = #tpu.dot_dimension_numbers<[1], [0], [0], [1], [0, 0, 1, 1], [], []>} : vector<4x8xf32>, vector<8x32xf32>, vector<4x32xf32> -> vector<4x32xf32>
    %131 = arith.addf %92, %130 : vector<4x32xf32>
    %c2 = arith.constant 2 : index
    %c0_84 = arith.constant 0 : index
    %c0_85 = arith.constant 0 : index
    %132 = vector.load %arg7[%c2, %c0_84, %c0_85] : memref<4x32x8xf32, #tpu.memory_space<vmem>>, vector<1x32x8xf32>
    %133 = vector.shape_cast %132 : vector<1x32x8xf32> to vector<32x8xf32>
    %cst_86 = arith.constant dense<0.000000e+00> : vector<4x8xf32>
    %134 = tpu.matmul %27, %133, %cst_86 {dimension_numbers = #tpu.dot_dimension_numbers<[1], [0], [0], [1], [0, 0, 1, 1], [], []>} : vector<4x32xf32>, vector<32x8xf32>, vector<4x8xf32> -> vector<4x8xf32>
    %c2_87 = arith.constant 2 : index
    %c0_88 = arith.constant 0 : index
    %c0_89 = arith.constant 0 : index
    %135 = vector.load %arg10[%c2_87, %c0_88, %c0_89] : memref<4x1x8xf32, #tpu.memory_space<vmem>>, vector<1x1x8xf32>
    %136 = vector.shape_cast %135 : vector<1x1x8xf32> to vector<1x8xf32>
    %137 = vector.broadcast %136 : vector<1x8xf32> to vector<4x8xf32>
    %138 = arith.addf %134, %137 : vector<4x8xf32>
    %c2_90 = arith.constant 2 : index
    %c0_91 = arith.constant 0 : index
    %c0_92 = arith.constant 0 : index
    %139 = vector.load %arg8[%c2_90, %c0_91, %c0_92] : memref<4x32x8xf32, #tpu.memory_space<vmem>>, vector<1x32x8xf32>
    %140 = vector.shape_cast %139 : vector<1x32x8xf32> to vector<32x8xf32>
    %cst_93 = arith.constant dense<0.000000e+00> : vector<16x8xf32>
    %141 = tpu.matmul %51, %140, %cst_93 {dimension_numbers = #tpu.dot_dimension_numbers<[1], [0], [0], [1], [0, 0, 1, 1], [], []>} : vector<16x32xf32>, vector<32x8xf32>, vector<16x8xf32> -> vector<16x8xf32>
    %c2_94 = arith.constant 2 : index
    %c0_95 = arith.constant 0 : index
    %c0_96 = arith.constant 0 : index
    %142 = vector.load %arg11[%c2_94, %c0_95, %c0_96] : memref<4x1x8xf32, #tpu.memory_space<vmem>>, vector<1x1x8xf32>
    %143 = vector.shape_cast %142 : vector<1x1x8xf32> to vector<1x8xf32>
    %144 = vector.broadcast %143 : vector<1x8xf32> to vector<16x8xf32>
    %145 = arith.addf %141, %144 : vector<16x8xf32>
    %c2_97 = arith.constant 2 : index
    %c0_98 = arith.constant 0 : index
    %c0_99 = arith.constant 0 : index
    %146 = vector.load %arg9[%c2_97, %c0_98, %c0_99] : memref<4x32x8xf32, #tpu.memory_space<vmem>>, vector<1x32x8xf32>
    %147 = vector.shape_cast %146 : vector<1x32x8xf32> to vector<32x8xf32>
    %cst_100 = arith.constant dense<0.000000e+00> : vector<16x8xf32>
    %148 = tpu.matmul %51, %147, %cst_100 {dimension_numbers = #tpu.dot_dimension_numbers<[1], [0], [0], [1], [0, 0, 1, 1], [], []>} : vector<16x32xf32>, vector<32x8xf32>, vector<16x8xf32> -> vector<16x8xf32>
    %c2_101 = arith.constant 2 : index
    %c0_102 = arith.constant 0 : index
    %c0_103 = arith.constant 0 : index
    %149 = vector.load %arg12[%c2_101, %c0_102, %c0_103] : memref<4x1x8xf32, #tpu.memory_space<vmem>>, vector<1x1x8xf32>
    %150 = vector.shape_cast %149 : vector<1x1x8xf32> to vector<1x8xf32>
    %151 = vector.broadcast %150 : vector<1x8xf32> to vector<16x8xf32>
    %152 = arith.addf %148, %151 : vector<16x8xf32>
    %cst_104 = arith.constant dense<0.000000e+00> : vector<4x16xf32>
    %153 = tpu.matmul %138, %145, %cst_104 {dimension_numbers = #tpu.dot_dimension_numbers<[1], [1], [0], [0], [0, 0, 1, 0], [], []>} : vector<4x8xf32>, vector<16x8xf32>, vector<4x16xf32> -> vector<4x16xf32>
    %cst_105 = arith.constant 0.353553385 : f32
    %154 = vector.broadcast %cst_105 : f32 to vector<4x16xf32>
    %155 = arith.mulf %153, %154 : vector<4x16xf32>
    %cst_106 = arith.constant dense<0xFF800000> : vector<4xf32>
    %156 = vector.multi_reduction <maximumf>, %155, %cst_106 [1] : vector<4x16xf32> to vector<4xf32>
    %157 = vector.shape_cast %156 : vector<4xf32> to vector<4x1xf32>
    %158 = vector.broadcast %157 : vector<4x1xf32> to vector<4x16xf32>
    %159 = arith.subf %155, %158 : vector<4x16xf32>
    %160 = math.exp %159 : vector<4x16xf32>
    %cst_107 = arith.constant dense<0.000000e+00> : vector<4xf32>
    %161 = vector.multi_reduction <add>, %160, %cst_107 [1] : vector<4x16xf32> to vector<4xf32>
    %162 = vector.shape_cast %161 : vector<4xf32> to vector<4x1xf32>
    %163 = tpu.reciprocal %162 {approx = true} : vector<4x1xf32> -> vector<4x1xf32>
    %164 = vector.broadcast %163 : vector<4x1xf32> to vector<4x16xf32>
    %165 = arith.mulf %160, %164 : vector<4x16xf32>
    %cst_108 = arith.constant dense<0.000000e+00> : vector<4x8xf32>
    %166 = tpu.matmul %165, %152, %cst_108 {dimension_numbers = #tpu.dot_dimension_numbers<[1], [0], [0], [1], [0, 0, 1, 1], [], []>} : vector<4x16xf32>, vector<16x8xf32>, vector<4x8xf32> -> vector<4x8xf32>
    %c2_109 = arith.constant 2 : index
    %c0_110 = arith.constant 0 : index
    %c0_111 = arith.constant 0 : index
    %167 = vector.load %arg13[%c2_109, %c0_110, %c0_111] : memref<4x8x32xf32, #tpu.memory_space<vmem>>, vector<1x8x32xf32>
    %168 = vector.shape_cast %167 : vector<1x8x32xf32> to vector<8x32xf32>
    %cst_112 = arith.constant dense<0.000000e+00> : vector<4x32xf32>
    %169 = tpu.matmul %166, %168, %cst_112 {dimension_numbers = #tpu.dot_dimension_numbers<[1], [0], [0], [1], [0, 0, 1, 1], [], []>} : vector<4x8xf32>, vector<8x32xf32>, vector<4x32xf32> -> vector<4x32xf32>
    %170 = arith.addf %131, %169 : vector<4x32xf32>
    %c3 = arith.constant 3 : index
    %c0_113 = arith.constant 0 : index
    %c0_114 = arith.constant 0 : index
    %171 = vector.load %arg7[%c3, %c0_113, %c0_114] : memref<4x32x8xf32, #tpu.memory_space<vmem>>, vector<1x32x8xf32>
    %172 = vector.shape_cast %171 : vector<1x32x8xf32> to vector<32x8xf32>
    %cst_115 = arith.constant dense<0.000000e+00> : vector<4x8xf32>
    %173 = tpu.matmul %27, %172, %cst_115 {dimension_numbers = #tpu.dot_dimension_numbers<[1], [0], [0], [1], [0, 0, 1, 1], [], []>} : vector<4x32xf32>, vector<32x8xf32>, vector<4x8xf32> -> vector<4x8xf32>
    %c3_116 = arith.constant 3 : index
    %c0_117 = arith.constant 0 : index
    %c0_118 = arith.constant 0 : index
    %174 = vector.load %arg10[%c3_116, %c0_117, %c0_118] : memref<4x1x8xf32, #tpu.memory_space<vmem>>, vector<1x1x8xf32>
    %175 = vector.shape_cast %174 : vector<1x1x8xf32> to vector<1x8xf32>
    %176 = vector.broadcast %175 : vector<1x8xf32> to vector<4x8xf32>
    %177 = arith.addf %173, %176 : vector<4x8xf32>
    %c3_119 = arith.constant 3 : index
    %c0_120 = arith.constant 0 : index
    %c0_121 = arith.constant 0 : index
    %178 = vector.load %arg8[%c3_119, %c0_120, %c0_121] : memref<4x32x8xf32, #tpu.memory_space<vmem>>, vector<1x32x8xf32>
    %179 = vector.shape_cast %178 : vector<1x32x8xf32> to vector<32x8xf32>
    %cst_122 = arith.constant dense<0.000000e+00> : vector<16x8xf32>
    %180 = tpu.matmul %51, %179, %cst_122 {dimension_numbers = #tpu.dot_dimension_numbers<[1], [0], [0], [1], [0, 0, 1, 1], [], []>} : vector<16x32xf32>, vector<32x8xf32>, vector<16x8xf32> -> vector<16x8xf32>
    %c3_123 = arith.constant 3 : index
    %c0_124 = arith.constant 0 : index
    %c0_125 = arith.constant 0 : index
    %181 = vector.load %arg11[%c3_123, %c0_124, %c0_125] : memref<4x1x8xf32, #tpu.memory_space<vmem>>, vector<1x1x8xf32>
    %182 = vector.shape_cast %181 : vector<1x1x8xf32> to vector<1x8xf32>
    %183 = vector.broadcast %182 : vector<1x8xf32> to vector<16x8xf32>
    %184 = arith.addf %180, %183 : vector<16x8xf32>
    %c3_126 = arith.constant 3 : index
    %c0_127 = arith.constant 0 : index
    %c0_128 = arith.constant 0 : index
    %185 = vector.load %arg9[%c3_126, %c0_127, %c0_128] : memref<4x32x8xf32, #tpu.memory_space<vmem>>, vector<1x32x8xf32>
    %186 = vector.shape_cast %185 : vector<1x32x8xf32> to vector<32x8xf32>
    %cst_129 = arith.constant dense<0.000000e+00> : vector<16x8xf32>
    %187 = tpu.matmul %51, %186, %cst_129 {dimension_numbers = #tpu.dot_dimension_numbers<[1], [0], [0], [1], [0, 0, 1, 1], [], []>} : vector<16x32xf32>, vector<32x8xf32>, vector<16x8xf32> -> vector<16x8xf32>
    %c3_130 = arith.constant 3 : index
    %c0_131 = arith.constant 0 : index
    %c0_132 = arith.constant 0 : index
    %188 = vector.load %arg12[%c3_130, %c0_131, %c0_132] : memref<4x1x8xf32, #tpu.memory_space<vmem>>, vector<1x1x8xf32>
    %189 = vector.shape_cast %188 : vector<1x1x8xf32> to vector<1x8xf32>
    %190 = vector.broadcast %189 : vector<1x8xf32> to vector<16x8xf32>
    %191 = arith.addf %187, %190 : vector<16x8xf32>
    %cst_133 = arith.constant dense<0.000000e+00> : vector<4x16xf32>
    %192 = tpu.matmul %177, %184, %cst_133 {dimension_numbers = #tpu.dot_dimension_numbers<[1], [1], [0], [0], [0, 0, 1, 0], [], []>} : vector<4x8xf32>, vector<16x8xf32>, vector<4x16xf32> -> vector<4x16xf32>
    %cst_134 = arith.constant 0.353553385 : f32
    %193 = vector.broadcast %cst_134 : f32 to vector<4x16xf32>
    %194 = arith.mulf %192, %193 : vector<4x16xf32>
    %cst_135 = arith.constant dense<0xFF800000> : vector<4xf32>
    %195 = vector.multi_reduction <maximumf>, %194, %cst_135 [1] : vector<4x16xf32> to vector<4xf32>
    %196 = vector.shape_cast %195 : vector<4xf32> to vector<4x1xf32>
    %197 = vector.broadcast %196 : vector<4x1xf32> to vector<4x16xf32>
    %198 = arith.subf %194, %197 : vector<4x16xf32>
    %199 = math.exp %198 : vector<4x16xf32>
    %cst_136 = arith.constant dense<0.000000e+00> : vector<4xf32>
    %200 = vector.multi_reduction <add>, %199, %cst_136 [1] : vector<4x16xf32> to vector<4xf32>
    %201 = vector.shape_cast %200 : vector<4xf32> to vector<4x1xf32>
    %202 = tpu.reciprocal %201 {approx = true} : vector<4x1xf32> -> vector<4x1xf32>
    %203 = vector.broadcast %202 : vector<4x1xf32> to vector<4x16xf32>
    %204 = arith.mulf %199, %203 : vector<4x16xf32>
    %cst_137 = arith.constant dense<0.000000e+00> : vector<4x8xf32>
    %205 = tpu.matmul %204, %191, %cst_137 {dimension_numbers = #tpu.dot_dimension_numbers<[1], [0], [0], [1], [0, 0, 1, 1], [], []>} : vector<4x16xf32>, vector<16x8xf32>, vector<4x8xf32> -> vector<4x8xf32>
    %c3_138 = arith.constant 3 : index
    %c0_139 = arith.constant 0 : index
    %c0_140 = arith.constant 0 : index
    %206 = vector.load %arg13[%c3_138, %c0_139, %c0_140] : memref<4x8x32xf32, #tpu.memory_space<vmem>>, vector<1x8x32xf32>
    %207 = vector.shape_cast %206 : vector<1x8x32xf32> to vector<8x32xf32>
    %cst_141 = arith.constant dense<0.000000e+00> : vector<4x32xf32>
    %208 = tpu.matmul %205, %207, %cst_141 {dimension_numbers = #tpu.dot_dimension_numbers<[1], [0], [0], [1], [0, 0, 1, 1], [], []>} : vector<4x8xf32>, vector<8x32xf32>, vector<4x32xf32> -> vector<4x32xf32>
    %209 = arith.addf %170, %208 : vector<4x32xf32>
    %210 = vector.broadcast %52 : vector<1x32xf32> to vector<4x32xf32>
    %211 = arith.addf %209, %210 : vector<4x32xf32>
    %c0_142 = arith.constant 0 : index
    %c0_143 = arith.constant 0 : index
    %212 = vector.load %arg15[%c0_142, %c0_143] : memref<32x32xf32, #tpu.memory_space<vmem>>, vector<32x32xf32>
    %cst_144 = arith.constant dense<0.000000e+00> : vector<4x32xf32>
    %213 = tpu.matmul %211, %212, %cst_144 {dimension_numbers = #tpu.dot_dimension_numbers<[1], [0], [0], [1], [0, 0, 1, 1], [], []>} : vector<4x32xf32>, vector<32x32xf32>, vector<4x32xf32> -> vector<4x32xf32>
    %c0_145 = arith.constant 0 : index
    %c0_146 = arith.constant 0 : index
    %214 = vector.load %arg16[%c0_145, %c0_146] : memref<1x32xf32, #tpu.memory_space<vmem>>, vector<1x32xf32>
    %215 = vector.broadcast %214 : vector<1x32xf32> to vector<4x32xf32>
    %216 = arith.addf %213, %215 : vector<4x32xf32>
    %217 = arith.addf %27, %216 : vector<4x32xf32>
    %c0_147 = arith.constant 0 : index
    %c0_148 = arith.constant 0 : index
    %218 = vector.load %arg17[%c0_147, %c0_148] : memref<1x32xf32, #tpu.memory_space<vmem>>, vector<1x32xf32>
    %c0_149 = arith.constant 0 : index
    %c0_150 = arith.constant 0 : index
    %219 = vector.load %arg18[%c0_149, %c0_150] : memref<1x32xf32, #tpu.memory_space<vmem>>, vector<1x32xf32>
    %cst_151 = arith.constant dense<0.000000e+00> : vector<4xf32>
    %220 = vector.multi_reduction <add>, %217, %cst_151 [1] : vector<4x32xf32> to vector<4xf32>
    %221 = vector.shape_cast %220 : vector<4xf32> to vector<4x1xf32>
    %cst_152 = arith.constant 3.200000e+01 : f32
    %222 = vector.broadcast %cst_152 : f32 to vector<4x1xf32>
    %223 = arith.divf %221, %222 : vector<4x1xf32>
    %224 = vector.broadcast %223 : vector<4x1xf32> to vector<4x32xf32>
    %225 = arith.subf %217, %224 : vector<4x32xf32>
    %226 = arith.mulf %225, %225 : vector<4x32xf32>
    %cst_153 = arith.constant dense<0.000000e+00> : vector<4xf32>
    %227 = vector.multi_reduction <add>, %226, %cst_153 [1] : vector<4x32xf32> to vector<4xf32>
    %228 = vector.shape_cast %227 : vector<4xf32> to vector<4x1xf32>
    %cst_154 = arith.constant 3.200000e+01 : f32
    %229 = vector.broadcast %cst_154 : f32 to vector<4x1xf32>
    %230 = arith.divf %228, %229 : vector<4x1xf32>
    %231 = vector.broadcast %223 : vector<4x1xf32> to vector<4x32xf32>
    %232 = arith.subf %217, %231 : vector<4x32xf32>
    %cst_155 = arith.constant 9.99999974E-6 : f32
    %233 = vector.broadcast %cst_155 : f32 to vector<4x1xf32>
    %234 = arith.addf %230, %233 : vector<4x1xf32>
    %235 = math.rsqrt %234 : vector<4x1xf32>
    %236 = vector.broadcast %235 : vector<4x1xf32> to vector<4x32xf32>
    %237 = arith.mulf %232, %236 : vector<4x32xf32>
    %238 = vector.broadcast %218 : vector<1x32xf32> to vector<4x32xf32>
    %239 = arith.mulf %237, %238 : vector<4x32xf32>
    %240 = vector.broadcast %219 : vector<1x32xf32> to vector<4x32xf32>
    %241 = arith.addf %239, %240 : vector<4x32xf32>
    %c0_156 = arith.constant 0 : index
    %c0_157 = arith.constant 0 : index
    %242 = vector.load %arg19[%c0_156, %c0_157] : memref<4x32xf32, #tpu.memory_space<vmem>>, vector<4x32xf32>
    %243 = arith.addf %241, %242 : vector<4x32xf32>
    %c0_158 = arith.constant 0 : index
    %c0_159 = arith.constant 0 : index
    %c0_160 = arith.constant 0 : index
    %244 = vector.load %arg20[%c0_158, %c0_159, %c0_160] : memref<1x4x32xf32, #tpu.memory_space<vmem>>, vector<1x4x32xf32>
    %245 = vector.shape_cast %244 : vector<1x4x32xf32> to vector<4x32xf32>
    %246 = vector.shape_cast %243 : vector<4x32xf32> to vector<1x4x32xf32>
    tpu.vector_store %arg20[%c0_158, %c0_159, %c0_160], %246 {strides = array<i32>} : memref<1x4x32xf32, #tpu.memory_space<vmem>>, vector<1x4x32xf32>,
    return
  }
  func.func @transform_0(%arg0: i32) -> (i32, i32, i32) {
    %c0_i32 = arith.constant 0 : i32
    %c0_i32_0 = arith.constant 0 : i32
    %c0_i32_1 = arith.constant 0 : i32
    return %arg0, %c0_i32, %c0_i32_0 : i32, i32, i32
  }
  func.func @transform_1(%arg0: i32) -> (i32, i32) {
    %c0_i32 = arith.constant 0 : i32
    %c0_i32_0 = arith.constant 0 : i32
    %c0_i32_1 = arith.constant 0 : i32
    return %c0_i32, %c0_i32_0 : i32, i32
  }
  func.func @transform_2(%arg0: i32) -> (i32, i32) {
    %c0_i32 = arith.constant 0 : i32
    %c0_i32_0 = arith.constant 0 : i32
    %c0_i32_1 = arith.constant 0 : i32
    return %c0_i32, %c0_i32_0 : i32, i32
  }
  func.func @transform_3(%arg0: i32) -> (i32, i32) {
    %c0_i32 = arith.constant 0 : i32
    %c0_i32_0 = arith.constant 0 : i32
    %c0_i32_1 = arith.constant 0 : i32
    return %c0_i32, %c0_i32_0 : i32, i32
  }
  func.func @transform_4(%arg0: i32) -> (i32, i32) {
    %c0_i32 = arith.constant 0 : i32
    %c0_i32_0 = arith.constant 0 : i32
    %c0_i32_1 = arith.constant 0 : i32
    return %c0_i32, %c0_i32_0 : i32, i32
  }
  func.func @transform_5(%arg0: i32) -> (i32, i32) {
    %c0_i32 = arith.constant 0 : i32
    %c0_i32_0 = arith.constant 0 : i32
    %c0_i32_1 = arith.constant 0 : i32
    return %c0_i32, %c0_i32_0 : i32, i32
  }
  func.func @transform_6(%arg0: i32) -> (i32, i32, i32) {
    %c0_i32 = arith.constant 0 : i32
    %c0_i32_0 = arith.constant 0 : i32
    %c0_i32_1 = arith.constant 0 : i32
    %c0_i32_2 = arith.constant 0 : i32
    return %c0_i32, %c0_i32_0, %c0_i32_1 : i32, i32, i32
  }
  func.func @transform_7(%arg0: i32) -> (i32, i32, i32) {
    %c0_i32 = arith.constant 0 : i32
    %c0_i32_0 = arith.constant 0 : i32
    %c0_i32_1 = arith.constant 0 : i32
    %c0_i32_2 = arith.constant 0 : i32
    return %c0_i32, %c0_i32_0, %c0_i32_1 : i32, i32, i32
  }
  func.func @transform_8(%arg0: i32) -> (i32, i32, i32) {
    %c0_i32 = arith.constant 0 : i32
    %c0_i32_0 = arith.constant 0 : i32
    %c0_i32_1 = arith.constant 0 : i32
    %c0_i32_2 = arith.constant 0 : i32
    return %c0_i32, %c0_i32_0, %c0_i32_1 : i32, i32, i32
  }
  func.func @transform_9(%arg0: i32) -> (i32, i32, i32) {
    %c0_i32 = arith.constant 0 : i32
    %c0_i32_0 = arith.constant 0 : i32
    %c0_i32_1 = arith.constant 0 : i32
    %c0_i32_2 = arith.constant 0 : i32
    return %c0_i32, %c0_i32_0, %c0_i32_1 : i32, i32, i32
  }
  func.func @transform_10(%arg0: i32) -> (i32, i32, i32) {
    %c0_i32 = arith.constant 0 : i32
    %c0_i32_0 = arith.constant 0 : i32
    %c0_i32_1 = arith.constant 0 : i32
    %c0_i32_2 = arith.constant 0 : i32
    return %c0_i32, %c0_i32_0, %c0_i32_1 : i32, i32, i32
  }
  func.func @transform_11(%arg0: i32) -> (i32, i32, i32) {
    %c0_i32 = arith.constant 0 : i32
    %c0_i32_0 = arith.constant 0 : i32
    %c0_i32_1 = arith.constant 0 : i32
    %c0_i32_2 = arith.constant 0 : i32
    return %c0_i32, %c0_i32_0, %c0_i32_1 : i32, i32, i32
  }
  func.func @transform_12(%arg0: i32) -> (i32, i32, i32) {
    %c0_i32 = arith.constant 0 : i32
    %c0_i32_0 = arith.constant 0 : i32
    %c0_i32_1 = arith.constant 0 : i32
    %c0_i32_2 = arith.constant 0 : i32
    return %c0_i32, %c0_i32_0, %c0_i32_1 : i32, i32, i32
  }
  func.func @transform_13(%arg0: i32) -> (i32, i32) {
    %c0_i32 = arith.constant 0 : i32
    %c0_i32_0 = arith.constant 0 : i32
    %c0_i32_1 = arith.constant 0 : i32
    return %c0_i32, %c0_i32_0 : i32, i32
  }
  func.func @transform_14(%arg0: i32) -> (i32, i32) {
    %c0_i32 = arith.constant 0 : i32
    %c0_i32_0 = arith.constant 0 : i32
    %c0_i32_1 = arith.constant 0 : i32
    return %c0_i32, %c0_i32_0 : i32, i32
  }
  func.func @transform_15(%arg0: i32) -> (i32, i32) {
    %c0_i32 = arith.constant 0 : i32
    %c0_i32_0 = arith.constant 0 : i32
    %c0_i32_1 = arith.constant 0 : i32
    return %c0_i32, %c0_i32_0 : i32, i32
  }
  func.func @transform_16(%arg0: i32) -> (i32, i32) {
    %c0_i32 = arith.constant 0 : i32
    %c0_i32_0 = arith.constant 0 : i32
    %c0_i32_1 = arith.constant 0 : i32
    return %c0_i32, %c0_i32_0 : i32, i32
  }
  func.func @transform_17(%arg0: i32) -> (i32, i32) {
    %c0_i32 = arith.constant 0 : i32
    %c0_i32_0 = arith.constant 0 : i32
    %c0_i32_1 = arith.constant 0 : i32
    return %c0_i32, %c0_i32_0 : i32, i32
  }
  func.func @transform_18(%arg0: i32) -> (i32, i32) {
    %c0_i32 = arith.constant 0 : i32
    %c0_i32_0 = arith.constant 0 : i32
    %c0_i32_1 = arith.constant 0 : i32
    return %c0_i32, %c0_i32_0 : i32, i32
  }
  func.func @transform_19(%arg0: i32) -> (i32, i32, i32) {
    %c0_i32 = arith.constant 0 : i32
    %c0_i32_0 = arith.constant 0 : i32
    %c0_i32_1 = arith.constant 0 : i32
    return %arg0, %c0_i32, %c0_i32_0 : i32, i32, i32
  }
}

module attributes {stable_mosaic.version = 11 : i64} {
  func.func @_block_kernel(%arg0: i32, %arg1: memref<1x4x32xf32, #tpu.memory_space<vmem>>, %arg2: memref<1x32xf32, #tpu.memory_space<vmem>>, %arg3: memref<1x32xf32, #tpu.memory_space<vmem>>, %arg4: memref<4x32x8xf32, #tpu.memory_space<vmem>>, %arg5: memref<4x32x8xf32, #tpu.memory_space<vmem>>, %arg6: memref<4x32x8xf32, #tpu.memory_space<vmem>>, %arg7: memref<4x1x8xf32, #tpu.memory_space<vmem>>, %arg8: memref<4x1x8xf32, #tpu.memory_space<vmem>>, %arg9: memref<4x1x8xf32, #tpu.memory_space<vmem>>, %arg10: memref<4x8x32xf32, #tpu.memory_space<vmem>>, %arg11: memref<1x32xf32, #tpu.memory_space<vmem>>, %arg12: memref<1x32xf32, #tpu.memory_space<vmem>>, %arg13: memref<1x32xf32, #tpu.memory_space<vmem>>, %arg14: memref<32x128xf32, #tpu.memory_space<vmem>>, %arg15: memref<1x128xf32, #tpu.memory_space<vmem>>, %arg16: memref<128x32xf32, #tpu.memory_space<vmem>>, %arg17: memref<1x32xf32, #tpu.memory_space<vmem>>, %arg18: memref<1x4x32xf32, #tpu.memory_space<vmem>>) attributes {dimension_semantics = [#tpu.dimension_semantics<parallel>], iteration_bounds = array<i64: 2>, scalar_prefetch = 0 : i64, scratch_operands = 0 : i64, tpu.core_type = #tpu.core_type<tc>, window_params = [{transform_indices = @transform_0, window_bounds = array<i64: 1, 4, 32>}, {pipeline_mode = #tpu.pipeline_mode<synchronous>, transform_indices = @transform_1, window_bounds = array<i64: 1, 32>}, {pipeline_mode = #tpu.pipeline_mode<synchronous>, transform_indices = @transform_2, window_bounds = array<i64: 1, 32>}, {pipeline_mode = #tpu.pipeline_mode<synchronous>, transform_indices = @transform_3, window_bounds = array<i64: 4, 32, 8>}, {pipeline_mode = #tpu.pipeline_mode<synchronous>, transform_indices = @transform_4, window_bounds = array<i64: 4, 32, 8>}, {pipeline_mode = #tpu.pipeline_mode<synchronous>, transform_indices = @transform_5, window_bounds = array<i64: 4, 32, 8>}, {pipeline_mode = #tpu.pipeline_mode<synchronous>, transform_indices = @transform_6, window_bounds = array<i64: 4, 1, 8>}, {pipeline_mode = #tpu.pipeline_mode<synchronous>, transform_indices = @transform_7, window_bounds = array<i64: 4, 1, 8>}, {pipeline_mode = #tpu.pipeline_mode<synchronous>, transform_indices = @transform_8, window_bounds = array<i64: 4, 1, 8>}, {pipeline_mode = #tpu.pipeline_mode<synchronous>, transform_indices = @transform_9, window_bounds = array<i64: 4, 8, 32>}, {pipeline_mode = #tpu.pipeline_mode<synchronous>, transform_indices = @transform_10, window_bounds = array<i64: 1, 32>}, {pipeline_mode = #tpu.pipeline_mode<synchronous>, transform_indices = @transform_11, window_bounds = array<i64: 1, 32>}, {pipeline_mode = #tpu.pipeline_mode<synchronous>, transform_indices = @transform_12, window_bounds = array<i64: 1, 32>}, {pipeline_mode = #tpu.pipeline_mode<synchronous>, transform_indices = @transform_13, window_bounds = array<i64: 32, 128>}, {pipeline_mode = #tpu.pipeline_mode<synchronous>, transform_indices = @transform_14, window_bounds = array<i64: 1, 128>}, {pipeline_mode = #tpu.pipeline_mode<synchronous>, transform_indices = @transform_15, window_bounds = array<i64: 128, 32>}, {pipeline_mode = #tpu.pipeline_mode<synchronous>, transform_indices = @transform_16, window_bounds = array<i64: 1, 32>}, {transform_indices = @transform_17, window_bounds = array<i64: 1, 4, 32>}]} {
    %c0 = arith.constant 0 : index
    %c0_0 = arith.constant 0 : index
    %c0_1 = arith.constant 0 : index
    %0 = vector.load %arg1[%c0, %c0_0, %c0_1] : memref<1x4x32xf32, #tpu.memory_space<vmem>>, vector<1x4x32xf32>
    %1 = vector.shape_cast %0 : vector<1x4x32xf32> to vector<4x32xf32>
    %c0_2 = arith.constant 0 : index
    %c0_3 = arith.constant 0 : index
    %2 = vector.load %arg2[%c0_2, %c0_3] : memref<1x32xf32, #tpu.memory_space<vmem>>, vector<1x32xf32>
    %c0_4 = arith.constant 0 : index
    %c0_5 = arith.constant 0 : index
    %3 = vector.load %arg3[%c0_4, %c0_5] : memref<1x32xf32, #tpu.memory_space<vmem>>, vector<1x32xf32>
    %cst = arith.constant dense<0.000000e+00> : vector<4xf32>
    %4 = vector.multi_reduction <add>, %1, %cst [1] : vector<4x32xf32> to vector<4xf32>
    %5 = vector.shape_cast %4 : vector<4xf32> to vector<4x1xf32>
    %cst_6 = arith.constant 3.200000e+01 : f32
    %6 = vector.broadcast %cst_6 : f32 to vector<4x1xf32>
    %7 = arith.divf %5, %6 : vector<4x1xf32>
    %8 = vector.broadcast %7 : vector<4x1xf32> to vector<4x32xf32>
    %9 = arith.subf %1, %8 : vector<4x32xf32>
    %10 = arith.mulf %9, %9 : vector<4x32xf32>
    %cst_7 = arith.constant dense<0.000000e+00> : vector<4xf32>
    %11 = vector.multi_reduction <add>, %10, %cst_7 [1] : vector<4x32xf32> to vector<4xf32>
    %12 = vector.shape_cast %11 : vector<4xf32> to vector<4x1xf32>
    %cst_8 = arith.constant 3.200000e+01 : f32
    %13 = vector.broadcast %cst_8 : f32 to vector<4x1xf32>
    %14 = arith.divf %12, %13 : vector<4x1xf32>
    %15 = vector.broadcast %7 : vector<4x1xf32> to vector<4x32xf32>
    %16 = arith.subf %1, %15 : vector<4x32xf32>
    %cst_9 = arith.constant 9.99999974E-6 : f32
    %17 = vector.broadcast %cst_9 : f32 to vector<4x1xf32>
    %18 = arith.addf %14, %17 : vector<4x1xf32>
    %19 = math.rsqrt %18 : vector<4x1xf32>
    %20 = vector.broadcast %19 : vector<4x1xf32> to vector<4x32xf32>
    %21 = arith.mulf %16, %20 : vector<4x32xf32>
    %22 = vector.broadcast %2 : vector<1x32xf32> to vector<4x32xf32>
    %23 = arith.mulf %21, %22 : vector<4x32xf32>
    %24 = vector.broadcast %3 : vector<1x32xf32> to vector<4x32xf32>
    %25 = arith.addf %23, %24 : vector<4x32xf32>
    %c0_10 = arith.constant 0 : index
    %c0_11 = arith.constant 0 : index
    %26 = vector.load %arg11[%c0_10, %c0_11] : memref<1x32xf32, #tpu.memory_space<vmem>>, vector<1x32xf32>
    %cst_12 = arith.constant 0.000000e+00 : f32
    %27 = vector.broadcast %cst_12 : f32 to vector<4x32xf32>
    %c0_13 = arith.constant 0 : index
    %c0_14 = arith.constant 0 : index
    %c0_15 = arith.constant 0 : index
    %28 = vector.load %arg4[%c0_13, %c0_14, %c0_15] : memref<4x32x8xf32, #tpu.memory_space<vmem>>, vector<1x32x8xf32>
    %29 = vector.shape_cast %28 : vector<1x32x8xf32> to vector<32x8xf32>
    %cst_16 = arith.constant dense<0.000000e+00> : vector<4x8xf32>
    %30 = tpu.matmul %25, %29, %cst_16 {dimension_numbers = #tpu.dot_dimension_numbers<[1], [0], [0], [1], [0, 0, 1, 1], [], []>} : vector<4x32xf32>, vector<32x8xf32>, vector<4x8xf32> -> vector<4x8xf32>
    %c0_17 = arith.constant 0 : index
    %c0_18 = arith.constant 0 : index
    %c0_19 = arith.constant 0 : index
    %31 = vector.load %arg7[%c0_17, %c0_18, %c0_19] : memref<4x1x8xf32, #tpu.memory_space<vmem>>, vector<1x1x8xf32>
    %32 = vector.shape_cast %31 : vector<1x1x8xf32> to vector<1x8xf32>
    %33 = vector.broadcast %32 : vector<1x8xf32> to vector<4x8xf32>
    %34 = arith.addf %30, %33 : vector<4x8xf32>
    %c0_20 = arith.constant 0 : index
    %c0_21 = arith.constant 0 : index
    %c0_22 = arith.constant 0 : index
    %35 = vector.load %arg5[%c0_20, %c0_21, %c0_22] : memref<4x32x8xf32, #tpu.memory_space<vmem>>, vector<1x32x8xf32>
    %36 = vector.shape_cast %35 : vector<1x32x8xf32> to vector<32x8xf32>
    %cst_23 = arith.constant dense<0.000000e+00> : vector<4x8xf32>
    %37 = tpu.matmul %25, %36, %cst_23 {dimension_numbers = #tpu.dot_dimension_numbers<[1], [0], [0], [1], [0, 0, 1, 1], [], []>} : vector<4x32xf32>, vector<32x8xf32>, vector<4x8xf32> -> vector<4x8xf32>
    %c0_24 = arith.constant 0 : index
    %c0_25 = arith.constant 0 : index
    %c0_26 = arith.constant 0 : index
    %38 = vector.load %arg8[%c0_24, %c0_25, %c0_26] : memref<4x1x8xf32, #tpu.memory_space<vmem>>, vector<1x1x8xf32>
    %39 = vector.shape_cast %38 : vector<1x1x8xf32> to vector<1x8xf32>
    %40 = vector.broadcast %39 : vector<1x8xf32> to vector<4x8xf32>
    %41 = arith.addf %37, %40 : vector<4x8xf32>
    %c0_27 = arith.constant 0 : index
    %c0_28 = arith.constant 0 : index
    %c0_29 = arith.constant 0 : index
    %42 = vector.load %arg6[%c0_27, %c0_28, %c0_29] : memref<4x32x8xf32, #tpu.memory_space<vmem>>, vector<1x32x8xf32>
    %43 = vector.shape_cast %42 : vector<1x32x8xf32> to vector<32x8xf32>
    %cst_30 = arith.constant dense<0.000000e+00> : vector<4x8xf32>
    %44 = tpu.matmul %25, %43, %cst_30 {dimension_numbers = #tpu.dot_dimension_numbers<[1], [0], [0], [1], [0, 0, 1, 1], [], []>} : vector<4x32xf32>, vector<32x8xf32>, vector<4x8xf32> -> vector<4x8xf32>
    %c0_31 = arith.constant 0 : index
    %c0_32 = arith.constant 0 : index
    %c0_33 = arith.constant 0 : index
    %45 = vector.load %arg9[%c0_31, %c0_32, %c0_33] : memref<4x1x8xf32, #tpu.memory_space<vmem>>, vector<1x1x8xf32>
    %46 = vector.shape_cast %45 : vector<1x1x8xf32> to vector<1x8xf32>
    %47 = vector.broadcast %46 : vector<1x8xf32> to vector<4x8xf32>
    %48 = arith.addf %44, %47 : vector<4x8xf32>
    %cst_34 = arith.constant dense<0.000000e+00> : vector<4x4xf32>
    %49 = tpu.matmul %34, %41, %cst_34 {dimension_numbers = #tpu.dot_dimension_numbers<[1], [1], [0], [0], [0, 0, 1, 0], [], []>} : vector<4x8xf32>, vector<4x8xf32>, vector<4x4xf32> -> vector<4x4xf32>
    %cst_35 = arith.constant 0.353553385 : f32
    %50 = vector.broadcast %cst_35 : f32 to vector<4x4xf32>
    %51 = arith.mulf %49, %50 : vector<4x4xf32>
    %cst_36 = arith.constant dense<0xFF800000> : vector<4xf32>
    %52 = vector.multi_reduction <maximumf>, %51, %cst_36 [1] : vector<4x4xf32> to vector<4xf32>
    %53 = vector.shape_cast %52 : vector<4xf32> to vector<4x1xf32>
    %54 = vector.broadcast %53 : vector<4x1xf32> to vector<4x4xf32>
    %55 = arith.subf %51, %54 : vector<4x4xf32>
    %56 = math.exp %55 : vector<4x4xf32>
    %cst_37 = arith.constant dense<0.000000e+00> : vector<4xf32>
    %57 = vector.multi_reduction <add>, %56, %cst_37 [1] : vector<4x4xf32> to vector<4xf32>
    %58 = vector.shape_cast %57 : vector<4xf32> to vector<4x1xf32>
    %59 = tpu.reciprocal %58 {approx = true} : vector<4x1xf32> -> vector<4x1xf32>
    %60 = vector.broadcast %59 : vector<4x1xf32> to vector<4x4xf32>
    %61 = arith.mulf %56, %60 : vector<4x4xf32>
    %cst_38 = arith.constant dense<0.000000e+00> : vector<4x8xf32>
    %62 = tpu.matmul %61, %48, %cst_38 {dimension_numbers = #tpu.dot_dimension_numbers<[1], [0], [0], [1], [0, 0, 1, 1], [], []>} : vector<4x4xf32>, vector<4x8xf32>, vector<4x8xf32> -> vector<4x8xf32>
    %c0_39 = arith.constant 0 : index
    %c0_40 = arith.constant 0 : index
    %c0_41 = arith.constant 0 : index
    %63 = vector.load %arg10[%c0_39, %c0_40, %c0_41] : memref<4x8x32xf32, #tpu.memory_space<vmem>>, vector<1x8x32xf32>
    %64 = vector.shape_cast %63 : vector<1x8x32xf32> to vector<8x32xf32>
    %cst_42 = arith.constant dense<0.000000e+00> : vector<4x32xf32>
    %65 = tpu.matmul %62, %64, %cst_42 {dimension_numbers = #tpu.dot_dimension_numbers<[1], [0], [0], [1], [0, 0, 1, 1], [], []>} : vector<4x8xf32>, vector<8x32xf32>, vector<4x32xf32> -> vector<4x32xf32>
    %66 = arith.addf %27, %65 : vector<4x32xf32>
    %c1 = arith.constant 1 : index
    %c0_43 = arith.constant 0 : index
    %c0_44 = arith.constant 0 : index
    %67 = vector.load %arg4[%c1, %c0_43, %c0_44] : memref<4x32x8xf32, #tpu.memory_space<vmem>>, vector<1x32x8xf32>
    %68 = vector.shape_cast %67 : vector<1x32x8xf32> to vector<32x8xf32>
    %cst_45 = arith.constant dense<0.000000e+00> : vector<4x8xf32>
    %69 = tpu.matmul %25, %68, %cst_45 {dimension_numbers = #tpu.dot_dimension_numbers<[1], [0], [0], [1], [0, 0, 1, 1], [], []>} : vector<4x32xf32>, vector<32x8xf32>, vector<4x8xf32> -> vector<4x8xf32>
    %c1_46 = arith.constant 1 : index
    %c0_47 = arith.constant 0 : index
    %c0_48 = arith.constant 0 : index
    %70 = vector.load %arg7[%c1_46, %c0_47, %c0_48] : memref<4x1x8xf32, #tpu.memory_space<vmem>>, vector<1x1x8xf32>
    %71 = vector.shape_cast %70 : vector<1x1x8xf32> to vector<1x8xf32>
    %72 = vector.broadcast %71 : vector<1x8xf32> to vector<4x8xf32>
    %73 = arith.addf %69, %72 : vector<4x8xf32>
    %c1_49 = arith.constant 1 : index
    %c0_50 = arith.constant 0 : index
    %c0_51 = arith.constant 0 : index
    %74 = vector.load %arg5[%c1_49, %c0_50, %c0_51] : memref<4x32x8xf32, #tpu.memory_space<vmem>>, vector<1x32x8xf32>
    %75 = vector.shape_cast %74 : vector<1x32x8xf32> to vector<32x8xf32>
    %cst_52 = arith.constant dense<0.000000e+00> : vector<4x8xf32>
    %76 = tpu.matmul %25, %75, %cst_52 {dimension_numbers = #tpu.dot_dimension_numbers<[1], [0], [0], [1], [0, 0, 1, 1], [], []>} : vector<4x32xf32>, vector<32x8xf32>, vector<4x8xf32> -> vector<4x8xf32>
    %c1_53 = arith.constant 1 : index
    %c0_54 = arith.constant 0 : index
    %c0_55 = arith.constant 0 : index
    %77 = vector.load %arg8[%c1_53, %c0_54, %c0_55] : memref<4x1x8xf32, #tpu.memory_space<vmem>>, vector<1x1x8xf32>
    %78 = vector.shape_cast %77 : vector<1x1x8xf32> to vector<1x8xf32>
    %79 = vector.broadcast %78 : vector<1x8xf32> to vector<4x8xf32>
    %80 = arith.addf %76, %79 : vector<4x8xf32>
    %c1_56 = arith.constant 1 : index
    %c0_57 = arith.constant 0 : index
    %c0_58 = arith.constant 0 : index
    %81 = vector.load %arg6[%c1_56, %c0_57, %c0_58] : memref<4x32x8xf32, #tpu.memory_space<vmem>>, vector<1x32x8xf32>
    %82 = vector.shape_cast %81 : vector<1x32x8xf32> to vector<32x8xf32>
    %cst_59 = arith.constant dense<0.000000e+00> : vector<4x8xf32>
    %83 = tpu.matmul %25, %82, %cst_59 {dimension_numbers = #tpu.dot_dimension_numbers<[1], [0], [0], [1], [0, 0, 1, 1], [], []>} : vector<4x32xf32>, vector<32x8xf32>, vector<4x8xf32> -> vector<4x8xf32>
    %c1_60 = arith.constant 1 : index
    %c0_61 = arith.constant 0 : index
    %c0_62 = arith.constant 0 : index
    %84 = vector.load %arg9[%c1_60, %c0_61, %c0_62] : memref<4x1x8xf32, #tpu.memory_space<vmem>>, vector<1x1x8xf32>
    %85 = vector.shape_cast %84 : vector<1x1x8xf32> to vector<1x8xf32>
    %86 = vector.broadcast %85 : vector<1x8xf32> to vector<4x8xf32>
    %87 = arith.addf %83, %86 : vector<4x8xf32>
    %cst_63 = arith.constant dense<0.000000e+00> : vector<4x4xf32>
    %88 = tpu.matmul %73, %80, %cst_63 {dimension_numbers = #tpu.dot_dimension_numbers<[1], [1], [0], [0], [0, 0, 1, 0], [], []>} : vector<4x8xf32>, vector<4x8xf32>, vector<4x4xf32> -> vector<4x4xf32>
    %cst_64 = arith.constant 0.353553385 : f32
    %89 = vector.broadcast %cst_64 : f32 to vector<4x4xf32>
    %90 = arith.mulf %88, %89 : vector<4x4xf32>
    %cst_65 = arith.constant dense<0xFF800000> : vector<4xf32>
    %91 = vector.multi_reduction <maximumf>, %90, %cst_65 [1] : vector<4x4xf32> to vector<4xf32>
    %92 = vector.shape_cast %91 : vector<4xf32> to vector<4x1xf32>
    %93 = vector.broadcast %92 : vector<4x1xf32> to vector<4x4xf32>
    %94 = arith.subf %90, %93 : vector<4x4xf32>
    %95 = math.exp %94 : vector<4x4xf32>
    %cst_66 = arith.constant dense<0.000000e+00> : vector<4xf32>
    %96 = vector.multi_reduction <add>, %95, %cst_66 [1] : vector<4x4xf32> to vector<4xf32>
    %97 = vector.shape_cast %96 : vector<4xf32> to vector<4x1xf32>
    %98 = tpu.reciprocal %97 {approx = true} : vector<4x1xf32> -> vector<4x1xf32>
    %99 = vector.broadcast %98 : vector<4x1xf32> to vector<4x4xf32>
    %100 = arith.mulf %95, %99 : vector<4x4xf32>
    %cst_67 = arith.constant dense<0.000000e+00> : vector<4x8xf32>
    %101 = tpu.matmul %100, %87, %cst_67 {dimension_numbers = #tpu.dot_dimension_numbers<[1], [0], [0], [1], [0, 0, 1, 1], [], []>} : vector<4x4xf32>, vector<4x8xf32>, vector<4x8xf32> -> vector<4x8xf32>
    %c1_68 = arith.constant 1 : index
    %c0_69 = arith.constant 0 : index
    %c0_70 = arith.constant 0 : index
    %102 = vector.load %arg10[%c1_68, %c0_69, %c0_70] : memref<4x8x32xf32, #tpu.memory_space<vmem>>, vector<1x8x32xf32>
    %103 = vector.shape_cast %102 : vector<1x8x32xf32> to vector<8x32xf32>
    %cst_71 = arith.constant dense<0.000000e+00> : vector<4x32xf32>
    %104 = tpu.matmul %101, %103, %cst_71 {dimension_numbers = #tpu.dot_dimension_numbers<[1], [0], [0], [1], [0, 0, 1, 1], [], []>} : vector<4x8xf32>, vector<8x32xf32>, vector<4x32xf32> -> vector<4x32xf32>
    %105 = arith.addf %66, %104 : vector<4x32xf32>
    %c2 = arith.constant 2 : index
    %c0_72 = arith.constant 0 : index
    %c0_73 = arith.constant 0 : index
    %106 = vector.load %arg4[%c2, %c0_72, %c0_73] : memref<4x32x8xf32, #tpu.memory_space<vmem>>, vector<1x32x8xf32>
    %107 = vector.shape_cast %106 : vector<1x32x8xf32> to vector<32x8xf32>
    %cst_74 = arith.constant dense<0.000000e+00> : vector<4x8xf32>
    %108 = tpu.matmul %25, %107, %cst_74 {dimension_numbers = #tpu.dot_dimension_numbers<[1], [0], [0], [1], [0, 0, 1, 1], [], []>} : vector<4x32xf32>, vector<32x8xf32>, vector<4x8xf32> -> vector<4x8xf32>
    %c2_75 = arith.constant 2 : index
    %c0_76 = arith.constant 0 : index
    %c0_77 = arith.constant 0 : index
    %109 = vector.load %arg7[%c2_75, %c0_76, %c0_77] : memref<4x1x8xf32, #tpu.memory_space<vmem>>, vector<1x1x8xf32>
    %110 = vector.shape_cast %109 : vector<1x1x8xf32> to vector<1x8xf32>
    %111 = vector.broadcast %110 : vector<1x8xf32> to vector<4x8xf32>
    %112 = arith.addf %108, %111 : vector<4x8xf32>
    %c2_78 = arith.constant 2 : index
    %c0_79 = arith.constant 0 : index
    %c0_80 = arith.constant 0 : index
    %113 = vector.load %arg5[%c2_78, %c0_79, %c0_80] : memref<4x32x8xf32, #tpu.memory_space<vmem>>, vector<1x32x8xf32>
    %114 = vector.shape_cast %113 : vector<1x32x8xf32> to vector<32x8xf32>
    %cst_81 = arith.constant dense<0.000000e+00> : vector<4x8xf32>
    %115 = tpu.matmul %25, %114, %cst_81 {dimension_numbers = #tpu.dot_dimension_numbers<[1], [0], [0], [1], [0, 0, 1, 1], [], []>} : vector<4x32xf32>, vector<32x8xf32>, vector<4x8xf32> -> vector<4x8xf32>
    %c2_82 = arith.constant 2 : index
    %c0_83 = arith.constant 0 : index
    %c0_84 = arith.constant 0 : index
    %116 = vector.load %arg8[%c2_82, %c0_83, %c0_84] : memref<4x1x8xf32, #tpu.memory_space<vmem>>, vector<1x1x8xf32>
    %117 = vector.shape_cast %116 : vector<1x1x8xf32> to vector<1x8xf32>
    %118 = vector.broadcast %117 : vector<1x8xf32> to vector<4x8xf32>
    %119 = arith.addf %115, %118 : vector<4x8xf32>
    %c2_85 = arith.constant 2 : index
    %c0_86 = arith.constant 0 : index
    %c0_87 = arith.constant 0 : index
    %120 = vector.load %arg6[%c2_85, %c0_86, %c0_87] : memref<4x32x8xf32, #tpu.memory_space<vmem>>, vector<1x32x8xf32>
    %121 = vector.shape_cast %120 : vector<1x32x8xf32> to vector<32x8xf32>
    %cst_88 = arith.constant dense<0.000000e+00> : vector<4x8xf32>
    %122 = tpu.matmul %25, %121, %cst_88 {dimension_numbers = #tpu.dot_dimension_numbers<[1], [0], [0], [1], [0, 0, 1, 1], [], []>} : vector<4x32xf32>, vector<32x8xf32>, vector<4x8xf32> -> vector<4x8xf32>
    %c2_89 = arith.constant 2 : index
    %c0_90 = arith.constant 0 : index
    %c0_91 = arith.constant 0 : index
    %123 = vector.load %arg9[%c2_89, %c0_90, %c0_91] : memref<4x1x8xf32, #tpu.memory_space<vmem>>, vector<1x1x8xf32>
    %124 = vector.shape_cast %123 : vector<1x1x8xf32> to vector<1x8xf32>
    %125 = vector.broadcast %124 : vector<1x8xf32> to vector<4x8xf32>
    %126 = arith.addf %122, %125 : vector<4x8xf32>
    %cst_92 = arith.constant dense<0.000000e+00> : vector<4x4xf32>
    %127 = tpu.matmul %112, %119, %cst_92 {dimension_numbers = #tpu.dot_dimension_numbers<[1], [1], [0], [0], [0, 0, 1, 0], [], []>} : vector<4x8xf32>, vector<4x8xf32>, vector<4x4xf32> -> vector<4x4xf32>
    %cst_93 = arith.constant 0.353553385 : f32
    %128 = vector.broadcast %cst_93 : f32 to vector<4x4xf32>
    %129 = arith.mulf %127, %128 : vector<4x4xf32>
    %cst_94 = arith.constant dense<0xFF800000> : vector<4xf32>
    %130 = vector.multi_reduction <maximumf>, %129, %cst_94 [1] : vector<4x4xf32> to vector<4xf32>
    %131 = vector.shape_cast %130 : vector<4xf32> to vector<4x1xf32>
    %132 = vector.broadcast %131 : vector<4x1xf32> to vector<4x4xf32>
    %133 = arith.subf %129, %132 : vector<4x4xf32>
    %134 = math.exp %133 : vector<4x4xf32>
    %cst_95 = arith.constant dense<0.000000e+00> : vector<4xf32>
    %135 = vector.multi_reduction <add>, %134, %cst_95 [1] : vector<4x4xf32> to vector<4xf32>
    %136 = vector.shape_cast %135 : vector<4xf32> to vector<4x1xf32>
    %137 = tpu.reciprocal %136 {approx = true} : vector<4x1xf32> -> vector<4x1xf32>
    %138 = vector.broadcast %137 : vector<4x1xf32> to vector<4x4xf32>
    %139 = arith.mulf %134, %138 : vector<4x4xf32>
    %cst_96 = arith.constant dense<0.000000e+00> : vector<4x8xf32>
    %140 = tpu.matmul %139, %126, %cst_96 {dimension_numbers = #tpu.dot_dimension_numbers<[1], [0], [0], [1], [0, 0, 1, 1], [], []>} : vector<4x4xf32>, vector<4x8xf32>, vector<4x8xf32> -> vector<4x8xf32>
    %c2_97 = arith.constant 2 : index
    %c0_98 = arith.constant 0 : index
    %c0_99 = arith.constant 0 : index
    %141 = vector.load %arg10[%c2_97, %c0_98, %c0_99] : memref<4x8x32xf32, #tpu.memory_space<vmem>>, vector<1x8x32xf32>
    %142 = vector.shape_cast %141 : vector<1x8x32xf32> to vector<8x32xf32>
    %cst_100 = arith.constant dense<0.000000e+00> : vector<4x32xf32>
    %143 = tpu.matmul %140, %142, %cst_100 {dimension_numbers = #tpu.dot_dimension_numbers<[1], [0], [0], [1], [0, 0, 1, 1], [], []>} : vector<4x8xf32>, vector<8x32xf32>, vector<4x32xf32> -> vector<4x32xf32>
    %144 = arith.addf %105, %143 : vector<4x32xf32>
    %c3 = arith.constant 3 : index
    %c0_101 = arith.constant 0 : index
    %c0_102 = arith.constant 0 : index
    %145 = vector.load %arg4[%c3, %c0_101, %c0_102] : memref<4x32x8xf32, #tpu.memory_space<vmem>>, vector<1x32x8xf32>
    %146 = vector.shape_cast %145 : vector<1x32x8xf32> to vector<32x8xf32>
    %cst_103 = arith.constant dense<0.000000e+00> : vector<4x8xf32>
    %147 = tpu.matmul %25, %146, %cst_103 {dimension_numbers = #tpu.dot_dimension_numbers<[1], [0], [0], [1], [0, 0, 1, 1], [], []>} : vector<4x32xf32>, vector<32x8xf32>, vector<4x8xf32> -> vector<4x8xf32>
    %c3_104 = arith.constant 3 : index
    %c0_105 = arith.constant 0 : index
    %c0_106 = arith.constant 0 : index
    %148 = vector.load %arg7[%c3_104, %c0_105, %c0_106] : memref<4x1x8xf32, #tpu.memory_space<vmem>>, vector<1x1x8xf32>
    %149 = vector.shape_cast %148 : vector<1x1x8xf32> to vector<1x8xf32>
    %150 = vector.broadcast %149 : vector<1x8xf32> to vector<4x8xf32>
    %151 = arith.addf %147, %150 : vector<4x8xf32>
    %c3_107 = arith.constant 3 : index
    %c0_108 = arith.constant 0 : index
    %c0_109 = arith.constant 0 : index
    %152 = vector.load %arg5[%c3_107, %c0_108, %c0_109] : memref<4x32x8xf32, #tpu.memory_space<vmem>>, vector<1x32x8xf32>
    %153 = vector.shape_cast %152 : vector<1x32x8xf32> to vector<32x8xf32>
    %cst_110 = arith.constant dense<0.000000e+00> : vector<4x8xf32>
    %154 = tpu.matmul %25, %153, %cst_110 {dimension_numbers = #tpu.dot_dimension_numbers<[1], [0], [0], [1], [0, 0, 1, 1], [], []>} : vector<4x32xf32>, vector<32x8xf32>, vector<4x8xf32> -> vector<4x8xf32>
    %c3_111 = arith.constant 3 : index
    %c0_112 = arith.constant 0 : index
    %c0_113 = arith.constant 0 : index
    %155 = vector.load %arg8[%c3_111, %c0_112, %c0_113] : memref<4x1x8xf32, #tpu.memory_space<vmem>>, vector<1x1x8xf32>
    %156 = vector.shape_cast %155 : vector<1x1x8xf32> to vector<1x8xf32>
    %157 = vector.broadcast %156 : vector<1x8xf32> to vector<4x8xf32>
    %158 = arith.addf %154, %157 : vector<4x8xf32>
    %c3_114 = arith.constant 3 : index
    %c0_115 = arith.constant 0 : index
    %c0_116 = arith.constant 0 : index
    %159 = vector.load %arg6[%c3_114, %c0_115, %c0_116] : memref<4x32x8xf32, #tpu.memory_space<vmem>>, vector<1x32x8xf32>
    %160 = vector.shape_cast %159 : vector<1x32x8xf32> to vector<32x8xf32>
    %cst_117 = arith.constant dense<0.000000e+00> : vector<4x8xf32>
    %161 = tpu.matmul %25, %160, %cst_117 {dimension_numbers = #tpu.dot_dimension_numbers<[1], [0], [0], [1], [0, 0, 1, 1], [], []>} : vector<4x32xf32>, vector<32x8xf32>, vector<4x8xf32> -> vector<4x8xf32>
    %c3_118 = arith.constant 3 : index
    %c0_119 = arith.constant 0 : index
    %c0_120 = arith.constant 0 : index
    %162 = vector.load %arg9[%c3_118, %c0_119, %c0_120] : memref<4x1x8xf32, #tpu.memory_space<vmem>>, vector<1x1x8xf32>
    %163 = vector.shape_cast %162 : vector<1x1x8xf32> to vector<1x8xf32>
    %164 = vector.broadcast %163 : vector<1x8xf32> to vector<4x8xf32>
    %165 = arith.addf %161, %164 : vector<4x8xf32>
    %cst_121 = arith.constant dense<0.000000e+00> : vector<4x4xf32>
    %166 = tpu.matmul %151, %158, %cst_121 {dimension_numbers = #tpu.dot_dimension_numbers<[1], [1], [0], [0], [0, 0, 1, 0], [], []>} : vector<4x8xf32>, vector<4x8xf32>, vector<4x4xf32> -> vector<4x4xf32>
    %cst_122 = arith.constant 0.353553385 : f32
    %167 = vector.broadcast %cst_122 : f32 to vector<4x4xf32>
    %168 = arith.mulf %166, %167 : vector<4x4xf32>
    %cst_123 = arith.constant dense<0xFF800000> : vector<4xf32>
    %169 = vector.multi_reduction <maximumf>, %168, %cst_123 [1] : vector<4x4xf32> to vector<4xf32>
    %170 = vector.shape_cast %169 : vector<4xf32> to vector<4x1xf32>
    %171 = vector.broadcast %170 : vector<4x1xf32> to vector<4x4xf32>
    %172 = arith.subf %168, %171 : vector<4x4xf32>
    %173 = math.exp %172 : vector<4x4xf32>
    %cst_124 = arith.constant dense<0.000000e+00> : vector<4xf32>
    %174 = vector.multi_reduction <add>, %173, %cst_124 [1] : vector<4x4xf32> to vector<4xf32>
    %175 = vector.shape_cast %174 : vector<4xf32> to vector<4x1xf32>
    %176 = tpu.reciprocal %175 {approx = true} : vector<4x1xf32> -> vector<4x1xf32>
    %177 = vector.broadcast %176 : vector<4x1xf32> to vector<4x4xf32>
    %178 = arith.mulf %173, %177 : vector<4x4xf32>
    %cst_125 = arith.constant dense<0.000000e+00> : vector<4x8xf32>
    %179 = tpu.matmul %178, %165, %cst_125 {dimension_numbers = #tpu.dot_dimension_numbers<[1], [0], [0], [1], [0, 0, 1, 1], [], []>} : vector<4x4xf32>, vector<4x8xf32>, vector<4x8xf32> -> vector<4x8xf32>
    %c3_126 = arith.constant 3 : index
    %c0_127 = arith.constant 0 : index
    %c0_128 = arith.constant 0 : index
    %180 = vector.load %arg10[%c3_126, %c0_127, %c0_128] : memref<4x8x32xf32, #tpu.memory_space<vmem>>, vector<1x8x32xf32>
    %181 = vector.shape_cast %180 : vector<1x8x32xf32> to vector<8x32xf32>
    %cst_129 = arith.constant dense<0.000000e+00> : vector<4x32xf32>
    %182 = tpu.matmul %179, %181, %cst_129 {dimension_numbers = #tpu.dot_dimension_numbers<[1], [0], [0], [1], [0, 0, 1, 1], [], []>} : vector<4x8xf32>, vector<8x32xf32>, vector<4x32xf32> -> vector<4x32xf32>
    %183 = arith.addf %144, %182 : vector<4x32xf32>
    %184 = vector.broadcast %26 : vector<1x32xf32> to vector<4x32xf32>
    %185 = arith.addf %183, %184 : vector<4x32xf32>
    %186 = arith.addf %1, %185 : vector<4x32xf32>
    %c0_130 = arith.constant 0 : index
    %c0_131 = arith.constant 0 : index
    %187 = vector.load %arg12[%c0_130, %c0_131] : memref<1x32xf32, #tpu.memory_space<vmem>>, vector<1x32xf32>
    %c0_132 = arith.constant 0 : index
    %c0_133 = arith.constant 0 : index
    %188 = vector.load %arg13[%c0_132, %c0_133] : memref<1x32xf32, #tpu.memory_space<vmem>>, vector<1x32xf32>
    %cst_134 = arith.constant dense<0.000000e+00> : vector<4xf32>
    %189 = vector.multi_reduction <add>, %186, %cst_134 [1] : vector<4x32xf32> to vector<4xf32>
    %190 = vector.shape_cast %189 : vector<4xf32> to vector<4x1xf32>
    %cst_135 = arith.constant 3.200000e+01 : f32
    %191 = vector.broadcast %cst_135 : f32 to vector<4x1xf32>
    %192 = arith.divf %190, %191 : vector<4x1xf32>
    %193 = vector.broadcast %192 : vector<4x1xf32> to vector<4x32xf32>
    %194 = arith.subf %186, %193 : vector<4x32xf32>
    %195 = arith.mulf %194, %194 : vector<4x32xf32>
    %cst_136 = arith.constant dense<0.000000e+00> : vector<4xf32>
    %196 = vector.multi_reduction <add>, %195, %cst_136 [1] : vector<4x32xf32> to vector<4xf32>
    %197 = vector.shape_cast %196 : vector<4xf32> to vector<4x1xf32>
    %cst_137 = arith.constant 3.200000e+01 : f32
    %198 = vector.broadcast %cst_137 : f32 to vector<4x1xf32>
    %199 = arith.divf %197, %198 : vector<4x1xf32>
    %200 = vector.broadcast %192 : vector<4x1xf32> to vector<4x32xf32>
    %201 = arith.subf %186, %200 : vector<4x32xf32>
    %cst_138 = arith.constant 9.99999974E-6 : f32
    %202 = vector.broadcast %cst_138 : f32 to vector<4x1xf32>
    %203 = arith.addf %199, %202 : vector<4x1xf32>
    %204 = math.rsqrt %203 : vector<4x1xf32>
    %205 = vector.broadcast %204 : vector<4x1xf32> to vector<4x32xf32>
    %206 = arith.mulf %201, %205 : vector<4x32xf32>
    %207 = vector.broadcast %187 : vector<1x32xf32> to vector<4x32xf32>
    %208 = arith.mulf %206, %207 : vector<4x32xf32>
    %209 = vector.broadcast %188 : vector<1x32xf32> to vector<4x32xf32>
    %210 = arith.addf %208, %209 : vector<4x32xf32>
    %c0_139 = arith.constant 0 : index
    %c0_140 = arith.constant 0 : index
    %211 = vector.load %arg14[%c0_139, %c0_140] : memref<32x128xf32, #tpu.memory_space<vmem>>, vector<32x128xf32>
    %cst_141 = arith.constant dense<0.000000e+00> : vector<4x128xf32>
    %212 = tpu.matmul %210, %211, %cst_141 {dimension_numbers = #tpu.dot_dimension_numbers<[1], [0], [0], [1], [0, 0, 1, 1], [], []>} : vector<4x32xf32>, vector<32x128xf32>, vector<4x128xf32> -> vector<4x128xf32>
    %c0_142 = arith.constant 0 : index
    %c0_143 = arith.constant 0 : index
    %213 = vector.load %arg15[%c0_142, %c0_143] : memref<1x128xf32, #tpu.memory_space<vmem>>, vector<1x128xf32>
    %214 = vector.broadcast %213 : vector<1x128xf32> to vector<4x128xf32>
    %215 = arith.addf %212, %214 : vector<4x128xf32>
    %cst_144 = arith.constant 5.000000e-01 : f32
    %216 = vector.broadcast %cst_144 : f32 to vector<4x128xf32>
    %217 = arith.mulf %216, %215 : vector<4x128xf32>
    %cst_145 = arith.constant 0.707106769 : f32
    %218 = vector.broadcast %cst_145 : f32 to vector<4x128xf32>
    %219 = arith.mulf %215, %218 : vector<4x128xf32>
    %cst_146 = arith.constant 0.000000e+00 : f32
    %220 = vector.broadcast %cst_146 : f32 to vector<4x128xf32>
    %221 = arith.cmpf olt, %219, %220 : vector<4x128xf32>
    %cst_147 = arith.constant -1.000000e+00 : f32
    %cst_148 = arith.constant 1.000000e+00 : f32
    %222 = vector.broadcast %cst_147 : f32 to vector<4x128xf32>
    %223 = vector.broadcast %cst_148 : f32 to vector<4x128xf32>
    %224 = arith.select %221, %222, %223 : vector<4x128xi1>, vector<4x128xf32>
    %225 = math.absf %219 : vector<4x128xf32>
    %cst_149 = arith.constant 0.327591091 : f32
    %226 = vector.broadcast %cst_149 : f32 to vector<4x128xf32>
    %227 = arith.mulf %226, %225 : vector<4x128xf32>
    %cst_150 = arith.constant 1.000000e+00 : f32
    %228 = vector.broadcast %cst_150 : f32 to vector<4x128xf32>
    %229 = arith.addf %228, %227 : vector<4x128xf32>
    %cst_151 = arith.constant 1.000000e+00 : f32
    %230 = vector.broadcast %cst_151 : f32 to vector<4x128xf32>
    %231 = arith.divf %230, %229 : vector<4x128xf32>
    %cst_152 = arith.constant 1.06140542 : f32
    %232 = vector.broadcast %cst_152 : f32 to vector<4x128xf32>
    %233 = arith.mulf %232, %231 : vector<4x128xf32>
    %cst_153 = arith.constant -1.45315206 : f32
    %234 = vector.broadcast %cst_153 : f32 to vector<4x128xf32>
    %235 = arith.addf %233, %234 : vector<4x128xf32>
    %236 = arith.mulf %235, %231 : vector<4x128xf32>
    %cst_154 = arith.constant 1.42141378 : f32
    %237 = vector.broadcast %cst_154 : f32 to vector<4x128xf32>
    %238 = arith.addf %236, %237 : vector<4x128xf32>
    %239 = arith.mulf %238, %231 : vector<4x128xf32>
    %cst_155 = arith.constant -0.284496725 : f32
    %240 = vector.broadcast %cst_155 : f32 to vector<4x128xf32>
    %241 = arith.addf %239, %240 : vector<4x128xf32>
    %242 = arith.mulf %241, %231 : vector<4x128xf32>
    %cst_156 = arith.constant 0.254829586 : f32
    %243 = vector.broadcast %cst_156 : f32 to vector<4x128xf32>
    %244 = arith.addf %242, %243 : vector<4x128xf32>
    %245 = arith.mulf %244, %231 : vector<4x128xf32>
    %cst_157 = arith.constant 0.000000e+00 : f32
    %246 = vector.broadcast %cst_157 : f32 to vector<4x128xf32>
    %247 = arith.subf %246, %225 : vector<4x128xf32>
    %248 = arith.mulf %247, %225 : vector<4x128xf32>
    %249 = math.exp %248 : vector<4x128xf32>
    %250 = arith.mulf %245, %249 : vector<4x128xf32>
    %cst_158 = arith.constant 1.000000e+00 : f32
    %251 = vector.broadcast %cst_158 : f32 to vector<4x128xf32>
    %252 = arith.subf %251, %250 : vector<4x128xf32>
    %253 = arith.mulf %224, %252 : vector<4x128xf32>
    %cst_159 = arith.constant 1.000000e+00 : f32
    %254 = vector.broadcast %cst_159 : f32 to vector<4x128xf32>
    %255 = arith.addf %254, %253 : vector<4x128xf32>
    %256 = arith.mulf %217, %255 : vector<4x128xf32>
    %c0_160 = arith.constant 0 : index
    %c0_161 = arith.constant 0 : index
    %257 = vector.load %arg16[%c0_160, %c0_161] : memref<128x32xf32, #tpu.memory_space<vmem>>, vector<128x32xf32>
    %cst_162 = arith.constant dense<0.000000e+00> : vector<4x32xf32>
    %258 = tpu.matmul %256, %257, %cst_162 {dimension_numbers = #tpu.dot_dimension_numbers<[1], [0], [0], [1], [0, 0, 1, 1], [], []>} : vector<4x128xf32>, vector<128x32xf32>, vector<4x32xf32> -> vector<4x32xf32>
    %c0_163 = arith.constant 0 : index
    %c0_164 = arith.constant 0 : index
    %259 = vector.load %arg17[%c0_163, %c0_164] : memref<1x32xf32, #tpu.memory_space<vmem>>, vector<1x32xf32>
    %260 = vector.broadcast %259 : vector<1x32xf32> to vector<4x32xf32>
    %261 = arith.addf %258, %260 : vector<4x32xf32>
    %262 = arith.addf %186, %261 : vector<4x32xf32>
    %c0_165 = arith.constant 0 : index
    %c0_166 = arith.constant 0 : index
    %c0_167 = arith.constant 0 : index
    %263 = vector.load %arg18[%c0_165, %c0_166, %c0_167] : memref<1x4x32xf32, #tpu.memory_space<vmem>>, vector<1x4x32xf32>
    %264 = vector.shape_cast %263 : vector<1x4x32xf32> to vector<4x32xf32>
    %265 = vector.shape_cast %262 : vector<4x32xf32> to vector<1x4x32xf32>
    tpu.vector_store %arg18[%c0_165, %c0_166, %c0_167], %265 {strides = array<i32>} : memref<1x4x32xf32, #tpu.memory_space<vmem>>, vector<1x4x32xf32>,
    return
  }
  func.func @transform_0(%arg0: i32) -> (i32, i32, i32) {
    %c0_i32 = arith.constant 0 : i32
    %c0_i32_0 = arith.constant 0 : i32
    %c0_i32_1 = arith.constant 0 : i32
    return %arg0, %c0_i32, %c0_i32_0 : i32, i32, i32
  }
  func.func @transform_1(%arg0: i32) -> (i32, i32) {
    %c0_i32 = arith.constant 0 : i32
    %c0_i32_0 = arith.constant 0 : i32
    %c0_i32_1 = arith.constant 0 : i32
    return %c0_i32, %c0_i32_0 : i32, i32
  }
  func.func @transform_2(%arg0: i32) -> (i32, i32) {
    %c0_i32 = arith.constant 0 : i32
    %c0_i32_0 = arith.constant 0 : i32
    %c0_i32_1 = arith.constant 0 : i32
    return %c0_i32, %c0_i32_0 : i32, i32
  }
  func.func @transform_3(%arg0: i32) -> (i32, i32, i32) {
    %c0_i32 = arith.constant 0 : i32
    %c0_i32_0 = arith.constant 0 : i32
    %c0_i32_1 = arith.constant 0 : i32
    %c0_i32_2 = arith.constant 0 : i32
    return %c0_i32, %c0_i32_0, %c0_i32_1 : i32, i32, i32
  }
  func.func @transform_4(%arg0: i32) -> (i32, i32, i32) {
    %c0_i32 = arith.constant 0 : i32
    %c0_i32_0 = arith.constant 0 : i32
    %c0_i32_1 = arith.constant 0 : i32
    %c0_i32_2 = arith.constant 0 : i32
    return %c0_i32, %c0_i32_0, %c0_i32_1 : i32, i32, i32
  }
  func.func @transform_5(%arg0: i32) -> (i32, i32, i32) {
    %c0_i32 = arith.constant 0 : i32
    %c0_i32_0 = arith.constant 0 : i32
    %c0_i32_1 = arith.constant 0 : i32
    %c0_i32_2 = arith.constant 0 : i32
    return %c0_i32, %c0_i32_0, %c0_i32_1 : i32, i32, i32
  }
  func.func @transform_6(%arg0: i32) -> (i32, i32, i32) {
    %c0_i32 = arith.constant 0 : i32
    %c0_i32_0 = arith.constant 0 : i32
    %c0_i32_1 = arith.constant 0 : i32
    %c0_i32_2 = arith.constant 0 : i32
    return %c0_i32, %c0_i32_0, %c0_i32_1 : i32, i32, i32
  }
  func.func @transform_7(%arg0: i32) -> (i32, i32, i32) {
    %c0_i32 = arith.constant 0 : i32
    %c0_i32_0 = arith.constant 0 : i32
    %c0_i32_1 = arith.constant 0 : i32
    %c0_i32_2 = arith.constant 0 : i32
    return %c0_i32, %c0_i32_0, %c0_i32_1 : i32, i32, i32
  }
  func.func @transform_8(%arg0: i32) -> (i32, i32, i32) {
    %c0_i32 = arith.constant 0 : i32
    %c0_i32_0 = arith.constant 0 : i32
    %c0_i32_1 = arith.constant 0 : i32
    %c0_i32_2 = arith.constant 0 : i32
    return %c0_i32, %c0_i32_0, %c0_i32_1 : i32, i32, i32
  }
  func.func @transform_9(%arg0: i32) -> (i32, i32, i32) {
    %c0_i32 = arith.constant 0 : i32
    %c0_i32_0 = arith.constant 0 : i32
    %c0_i32_1 = arith.constant 0 : i32
    %c0_i32_2 = arith.constant 0 : i32
    return %c0_i32, %c0_i32_0, %c0_i32_1 : i32, i32, i32
  }
  func.func @transform_10(%arg0: i32) -> (i32, i32) {
    %c0_i32 = arith.constant 0 : i32
    %c0_i32_0 = arith.constant 0 : i32
    %c0_i32_1 = arith.constant 0 : i32
    return %c0_i32, %c0_i32_0 : i32, i32
  }
  func.func @transform_11(%arg0: i32) -> (i32, i32) {
    %c0_i32 = arith.constant 0 : i32
    %c0_i32_0 = arith.constant 0 : i32
    %c0_i32_1 = arith.constant 0 : i32
    return %c0_i32, %c0_i32_0 : i32, i32
  }
  func.func @transform_12(%arg0: i32) -> (i32, i32) {
    %c0_i32 = arith.constant 0 : i32
    %c0_i32_0 = arith.constant 0 : i32
    %c0_i32_1 = arith.constant 0 : i32
    return %c0_i32, %c0_i32_0 : i32, i32
  }
  func.func @transform_13(%arg0: i32) -> (i32, i32) {
    %c0_i32 = arith.constant 0 : i32
    %c0_i32_0 = arith.constant 0 : i32
    %c0_i32_1 = arith.constant 0 : i32
    return %c0_i32, %c0_i32_0 : i32, i32
  }
  func.func @transform_14(%arg0: i32) -> (i32, i32) {
    %c0_i32 = arith.constant 0 : i32
    %c0_i32_0 = arith.constant 0 : i32
    %c0_i32_1 = arith.constant 0 : i32
    return %c0_i32, %c0_i32_0 : i32, i32
  }
  func.func @transform_15(%arg0: i32) -> (i32, i32) {
    %c0_i32 = arith.constant 0 : i32
    %c0_i32_0 = arith.constant 0 : i32
    %c0_i32_1 = arith.constant 0 : i32
    return %c0_i32, %c0_i32_0 : i32, i32
  }
  func.func @transform_16(%arg0: i32) -> (i32, i32) {
    %c0_i32 = arith.constant 0 : i32
    %c0_i32_0 = arith.constant 0 : i32
    %c0_i32_1 = arith.constant 0 : i32
    return %c0_i32, %c0_i32_0 : i32, i32
  }
  func.func @transform_17(%arg0: i32) -> (i32, i32, i32) {
    %c0_i32 = arith.constant 0 : i32
    %c0_i32_0 = arith.constant 0 : i32
    %c0_i32_1 = arith.constant 0 : i32
    return %arg0, %c0_i32, %c0_i32_0 : i32, i32, i32
  }
}

</mosaic_0001>

<bundles_post_ra>
// kernel: _lambda_.7
= control target key start
LH: loop header
LB: loop body
LE: loop exit
PB: predicated region body
PF: predicated region fallthrough
CT: control target
= control target key end

     0   :  { %vm18_vm0 = vcmask 261120   ;;  %s136_s0 = inlined_call_operand.vmem [shape: f32[8,32], index: 0, kind: input, shape index: {}]   ;;  %s137_s1 = inlined_call_operand.vmem [shape: f32[1,32], index: 1, kind: input, shape index: {}]   ;;  %s138_s2 = inlined_call_operand.vmem [shape: f32[1,32], index: 2, kind: input, shape index: {}]   ;;  %s139_s3 = inlined_call_operand.hbm [shape: f32[8,32], index: 3, kind: output, shape index: {}]  }
   0x1   :  { %v15_v0 = vld [vmem:[%s136_s0] sm:$0xff] }
   0x2   :  { %8 = vsyncpa [#allocation3], 0  ;;  %v19_v1 = vsel %vm18_vm0, %v15_v0, 0.0  ;;  %v62_v11 = vld [vmem:[%s137_s1] ss:$0 sm:$0xff]  ;;  %s91_s17 = smov [#allocation2]  }
   0x3   :  { %20 = vadd.xlane.f32.xlu0 %v19_v1  ;;  %v63_v13 = vld [vmem:[%s138_s2] ss:$0 sm:$0xff]  ;;  %s54_s18 = sshll.u32 %s91_s17, 4  ;;  %s55_s18 = int_to_ptr.vmem [resolvable:$true] %s54_s18 }
   0x4   :  { %s67_s19 = scalar_lea.vmem %s55_s18, 128  ;;  %p72_p1 = scmp.lt.s32.totalorder %s55_s18, %s55_s18 }
   0x5   :  { %p68_p0 = scmp.ne.s32.totalorder %s55_s18, %s67_s19  ;;  %p73_p2 = scmp.lt.s32.totalorder %s67_s19, %s67_s19 }
   0x7   :  { %p74_p3 = por %p73_p2, %p72_p1 }
   0x9   :  { %p75_p4 = pnand %p74_p3, %p68_p0 }
  0x90   :  { %v21_v2 = vpop.xlane.xlu0 %20 }
  0x91   :  { %v23_v3 = vmul.f32 0.03125, %v21_v2 }
  0x93   :  { %v24_v4 = vsub.f32 %v15_v0, %v23_v3 }
  0x95   :  { %v25_v5 = vmul.f32 %v24_v4, %v24_v4 }
  0x97   :  { %v26_v6 = vsel %vm18_vm0, %v25_v5, 0.0 }
  0x98   :  { %27 = vadd.xlane.f32.xlu0 %v26_v6 }
 0x125   :  { %v28_v7 = vpop.xlane.xlu0 %27 }
 0x126   :  { %v29_v8 = vmul.f32 0.03125, %v28_v7 }
 0x128   :  { %v30_v9 = vadd.f32 1e-05, %v29_v8 }
 0x12a   :  { %65 = vrsqrt.f32 %v30_v9 }
 0x134   :  { %v66_v10 = vpop.eup %65 }
 0x135   :  { %v32_v12 = vmul.f32 %v66_v10, %v24_v4 }
 0x137   :  { %v39_v14 = vmul.f32 %v62_v11, %v32_v12 }
 0x139   :  { %v46_v15 = vadd.f32 %v63_v13, %v39_v14 }
 0x13b   :  { %47 = vst.msk [vmem:[#allocation2] sm:$0xff] %vm18_vm0, %v46_v15 }
 0x13c   :  { %78 = shalt.err (!%p75_p4)
}
 0x13d   :  { %s79_s21 = scalar_lea.hbm %s139_s3, 128 }
 0x13e   :  { %p80_p5 = scmp.ne.s32.totalorder %s139_s3, %s79_s21  ;;  %p83_p6 = scmp.lt.u32.totalorder %s79_s21, %s139_s3 }
 0x140   :  { %p85_p7 = pnand %p83_p6, %p80_p5 }
 0x142   :  { %88 = shalt.err (!%p85_p7)
}
 0x143   :  { %57 = dma.vmem_to_hbm [thread:$0]  %s55_s18, 128, %s139_s3, [#allocation3]  }
 0x144   :  { %89 = dma.done.wait [#allocation3], 128  }
 0x145   :  { %90 = vsyncadd [#allocation3], 4294967168 }
 0x146   :  { %61 = vsyncpa [#allocation3], 1 }

// kernel: _lambda_.4
= control target key start
LH: loop header
LB: loop body
LE: loop exit
PB: predicated region body
PF: predicated region fallthrough
CT: control target
= control target key end

     0   :  { %s3986_s24 = smov 0   ;;  %s4435_s0 = inlined_call_operand.vmem [shape: f32[2,16,32], index: 0, kind: input, shape index: {}]   ;;  %s4436_s1 = inlined_call_operand.vmem [shape: f32[1,32], index: 1, kind: input, shape index: {}]   ;;  %s4437_s2 = inlined_call_operand.vmem [shape: f32[1,32], index: 2, kind: input, shape index: {}]   ;;  %s4438_s3 = inlined_call_operand.vmem [shape: f32[4,32,8], index: 3, kind: input, shape index: {}]   ;;  %s4439_s4 = inlined_call_operand.vmem [shape: f32[4,32,8], index: 4, kind: input, shape index: {}]   ;;  %s4440_s5 = inlined_call_operand.vmem [shape: f32[4,32,8], index: 5, kind: input, shape index: {}]   ;;  %s4441_s6 = inlined_call_operand.vmem [shape: f32[4,1,8], index: 6, kind: input, shape index: {}]   ;;  %s4442_s7 = inlined_call_operand.vmem [shape: f32[4,1,8], index: 7, kind: input, shape index: {}]   ;;  %s4443_s8 = inlined_call_operand.vmem [shape: f32[4,1,8], index: 8, kind: input, shape index: {}]   ;;  %s4444_s9 = inlined_call_operand.vmem [shape: f32[4,8,32], index: 9, kind: input, shape index: {}]   ;;  %s4445_s10 = inlined_call_operand.vmem [shape: f32[1,32], index: 10, kind: input, shape index: {}]   ;;  %s4446_s11 = inlined_call_operand.vmem [shape: f32[1,32], index: 11, kind: input, shape index: {}]   ;;  %s4447_s12 = inlined_call_operand.vmem [shape: f32[1,32], index: 12, kind: input, shape index: {}]   ;;  %s4448_s13 = inlined_call_operand.vmem [shape: f32[32,128], index: 13, kind: input, shape index: {}]   ;;  %s4449_s14 = inlined_call_operand.vmem [shape: f32[1,128], index: 14, kind: input, shape index: {}]   ;;  %s4450_s15 = inlined_call_operand.vmem [shape: f32[128,32], index: 15, kind: input, shape index: {}]   ;;  %s4451_s16 = inlined_call_operand.vmem [shape: f32[1,32], index: 16, kind: input, shape index: {}]   ;;  %s4452_s17 = inlined_call_operand.vmem [shape: f32[2,16,32], index: 17, kind: output, shape index: {}]  }
   0x1   :  { %4453 = sst [smem:[#allocation2_spill]] %s4435_s0 }
   0x2   :  { %4454 = sst [smem:[#allocation3_spill]] %s4436_s1 }
   0x3 LB: > { %s3116_s25 = sadd.s32 4294967295, %s3893_s24   ;;  %p3120_p0 = scmp.ge.s32.totalorder %s3893_s24, 1  ;;  %s3893_s24 = sphi %s3986_s24, %s27_s24  }
   0x4   : > { %p487_p1 = scmp.lt.s32.totalorder %s3893_s24, 3 }
   0x6   : > { %p488_p2 = pnand %p3120_p0, %p487_p1 }
   0x7   : > { %p539_p3 = scmp.lt.s32.totalorder (!%p488_p2), %s3116_s25, 1  ;;  %vm553_vm0 = vcmask (!%p488_p2), 261120   ;;  %s4455_s29 = sld [smem:[#allocation2_spill]] (!%p488_p2)  ;;  %v598_v14 = vld [vmem:[%s4438_s3] sm:$0xff] (!%p488_p2)  ;;  %v599_v15 = vld [vmem:[%s4438_s3 + $0x8] sm:$0xff] (!%p488_p2)  ;;  %v600_v17 = vld [vmem:[%s4438_s3 + $0x10] sm:$0xff] (!%p488_p2) }
   0x8   : > { %491 = sbr.rel (%p488_p2) target bundleno = 5050 (0x13ba), region = 88  ;;  %v3648_v16 = vpack.c.bf16 (!%p488_p2), %v599_v15, %v598_v14  ;;  %v601_v18 = vld [vmem:[%s4438_s3 + $0x18] sm:$0xff] (!%p488_p2)  ;;  %v690_v20 = vld [vmem:[%s4439_s4] sm:$0xff] (!%p488_p2)  ;;  %v691_v21 = vld [vmem:[%s4439_s4 + $0x8] sm:$0xff] (!%p488_p2)  ;;  %s4456_s19 = sld [smem:[#allocation3_spill]] (!%p488_p2)  ;;  %vm862_vm1 = vcmask (!%p488_p2), 64512  }
   0x9   : > { %v3652_v19 = vpack.c.bf16 (!%p488_p2), %v601_v18, %v600_v17  ;;  %v3656_v22 = vpack.c.bf16 (!%p488_p2), %v691_v21, %v690_v20  ;;  %v3126_v32 = vld [vmem:[%s4437_s2] ss:$0 sm:$0xff] (!%p488_p2)  ;;  %v692_v37 = vld [vmem:[%s4439_s4 + $0x10] sm:$0xff] (!%p488_p2)  ;;  %v693_v38 = vld [vmem:[%s4439_s4 + $0x18] sm:$0xff] (!%p488_p2)  ;;  %vm952_vm3 = vcmask (!%p488_p2), 130048  }
   0xa   : > { %3649 = vmatprep.subr.bf16.mxu1 (!%p488_p2), %v3648_v16  ;;  %v3660_v41 = vpack.c.bf16 (!%p488_p2), %v693_v38, %v692_v37  ;;  %v776_v42 = vld [vmem:[%s4440_s5] sm:$0xff] (!%p488_p2)  ;;  %v777_v43 = vld [vmem:[%s4440_s5 + $0x8] sm:$0xff] (!%p488_p2)  ;;  %v778_v45 = vld [vmem:[%s4440_s5 + $0x10] sm:$0xff] (!%p488_p2) }
   0xb   : > { %3651 = vmatpush3.bf16.msra.mxu1 (!%p488_p2), %v3648_v16  ;;  %v3664_v44 = vpack.c.bf16 (!%p488_p2), %v777_v43, %v776_v42  ;;  %v779_v46 = vld [vmem:[%s4440_s5 + $0x18] sm:$0xff] (!%p488_p2)  ;;  %v3127_v48 = vld [vmem:[%s4441_s6] ss:$0 sm:$0xff] (!%p488_p2)  ;;  %v3143_v57 = vld [vmem:[%s4438_s3 + $0x28] sm:$0xff] (!%p488_p2) }
   0xc   : > { %3653 = vmatprep.subr.bf16.mxu1 (!%p488_p2), %v3652_v19  ;;  %v3668_v47 = vpack.c.bf16 (!%p488_p2), %v779_v46, %v778_v45  ;;  %v3130_v52 = vld [vmem:[%s4442_s7] ss:$0 sm:$0xff] (!%p488_p2)  ;;  %vm4087_vm2 = vmpackc.low (!%p488_p2), %vm862_vm1, %vm862_vm1  ;;  %v3161_v14 = vld [vmem:[%s4440_s5 + $0x38] sm:$0xff] (!%p488_p2) }
   0xd   : > { %v3142_v56 = vld [vmem:[%s4438_s3 + $0x20] sm:$0xff] (!%p488_p2)  ;;  %v3151_v45 = vld [vmem:[%s4439_s4 + $0x28] sm:$0xff] (!%p488_p2) }
   0xe   : > { %v3125_v30 = vld [vmem:[%s4456_s19] ss:$0 sm:$0xff] (!%p488_p2)  ;;  %v3682_v61 = vpack.c.bf16 (!%p488_p2), %v3143_v57, %v3142_v56 }
   0xf   : > { %s4460_s25 = smov (!%p539_p3, %s3116_s25), 1  ;;  %3655 = vmatpush3.bf16.msra.mxu1 %v3652_v19  ;;  %v3133_v62 = vld [vmem:[%s4443_s8] ss:$0 sm:$0xff] }
  0x10   : > { %s3252_s26 = sshll.u32 %s4460_s25, 4  ;;  %3657 = vmatprep.subr.bf16.mxu1 %v3656_v22 }
  0x11   : > { %s543_s0 = scalar_lea.vmem %s4455_s29, %s3252_s26  ;;  %s548_s21 = scalar_lea.vmem %s4452_s17, %s3252_s26 }
  0x12   : > { %v4002_v0 = vld [vmem:[%s543_s0] sm:$0xff]  ;;  %v4004_v1 = vld [vmem:[%s543_s0 + $0x8] sm:$0xff] }
  0x13   : > { %v554_v2 = vsel %vm553_vm0, %v4002_v0, 0.0  ;;  %v557_v3 = vsel %vm553_vm0, %v4004_v1, 0.0 }
  0x14   : > { %555 = vadd.xlane.f32.xlu0 %v554_v2 }
  0x18   : > { %558 = vadd.xlane.f32.xlu0 %v557_v3 }
  0xa1   : > { %v556_v4 = vpop.xlane.xlu0 %555 }
  0xa2   : > { %v561_v5 = vmul.f32 0.03125, %v556_v4  ;;  %v3144_v4 = vld [vmem:[%s4438_s3 + $0x30] sm:$0xff] }
  0xa4   : > { %v563_v6 = vsub.f32 %v4002_v0, %v561_v5  ;;  %v3145_v5 = vld [vmem:[%s4438_s3 + $0x38] sm:$0xff] }
  0xa5   : > { %v559_v7 = vpop.xlane.xlu0 %558 }
  0xa6   : > { %v562_v8 = vmul.f32 0.03125, %v559_v7  ;;  %v565_v9 = vmul.f32 %v563_v6, %v563_v6 }
  0xa8   : > { %v564_v10 = vsub.f32 %v4004_v1, %v562_v8  ;;  %v567_v11 = vsel %vm553_vm0, %v565_v9, 0.0  ;;  %v3686_v9 = vpack.c.bf16 %v3145_v5, %v3144_v4 }
  0xa9   : > { %568 = vadd.xlane.f32.xlu1 %v567_v11  ;;  %v3159_v11 = vld [vmem:[%s4440_s5 + $0x28] sm:$0xff] }
  0xaa   : > { %v566_v12 = vmul.f32 %v564_v10, %v564_v10 }
  0xac   : > { %v570_v13 = vsel %vm553_vm0, %v566_v12, 0.0 }
  0xad   : > { %571 = vadd.xlane.f32.xlu1 %v570_v13  ;;  %v3160_v13 = vld [vmem:[%s4440_s5 + $0x30] sm:$0xff] }
  0xae   : > { %v3702_v15 = vpack.c.bf16 %v3161_v14, %v3160_v13 }
 0x136   : > { %v569_v23 = vpop.xlane.xlu1 %568 }
 0x137   : > { %v573_v24 = vmul.f32 0.03125, %v569_v23 }
 0x139   : > { %v575_v25 = vadd.f32 1e-05, %v573_v24 }
 0x13a   : > { %v572_v26 = vpop.xlane.xlu1 %571 }
 0x13b   : > { %3839 = vrsqrt.f32 %v575_v25  ;;  %v574_v27 = vmul.f32 0.03125, %v572_v26  ;;  %v3163_v26 = vld [vmem:[%s4443_s8 + $0x1] ss:$0 sm:$0xff] }
 0x13d   : > { %v576_v28 = vadd.f32 1e-05, %v574_v27 }
 0x13f   : > { %3841 = vrsqrt.f32 %v576_v28 }
 0x145   : > { %v3840_v29 = vpop.eup %3839 }
 0x146   : > { %v579_v31 = vmul.f32 %v3840_v29, %v563_v6 }
 0x148   : > { %v587_v33 = vmul.f32 %v3125_v30, %v579_v31 }
 0x149   : > { %v3842_v34 = vpop.eup %3841 }
 0x14a   : > { %v4038_v35 = vadd.f32 %v3126_v32, %v587_v33  ;;  %v580_v36 = vmul.f32 %v3842_v34, %v564_v10  ;;  %v3158_v10 = vld [vmem:[%s4440_s5 + $0x20] sm:$0xff] }
 0x14b   : > { %v3698_v12 = vpack.c.bf16 %v3159_v11, %v3158_v10 }
 0x14c   : > { %v588_v39 = vmul.f32 %v3125_v30, %v580_v36  ;;  %3402 = vmatprep.mubr.msk.f32.mxu1 %vm553_vm0, %v4038_v35 }
 0x14e   : > { %v4048_v40 = vadd.f32 %v3126_v32, %v588_v39 }
 0x150   : > { %3403 = vmatmul.mubr.msk.f32.vlgmr.msra.gmra.mrb[0].mxu1 %vm553_vm0, %v4048_v40 }
 0x151   : > { %3659 = vmatpush3.bf16.msra.mxu1 %v3656_v22  ;;  %3413 = vmatprep.mubr.msk.f32.mxu1 %vm553_vm0, %v4038_v35  ;;  %v3147_v22 = vld [vmem:[%s4441_s6 + $0x1] ss:$0 sm:$0xff] }
 0x152   : > { %3661 = vmatprep.subr.bf16.mxu1 %v3660_v41 }
 0x155   : > { %3663 = vmatpush3.bf16.msra.mxu1 %v3660_v41 }
 0x156   : > { %3665 = vmatprep.subr.bf16.mxu1 %v3664_v44 }
 0x158   : > { %3414 = vmatmul.mubr.msk.f32.vlgmr.msra.gmra.mrb[2].mxu1 %vm553_vm0, %v4048_v40 }
 0x159   : > { %3667 = vmatpush3.bf16.msra.mxu1 %v3664_v44  ;;  %3424 = vmatprep.mubr.msk.f32.mxu1 %vm553_vm0, %v4038_v35  ;;  %v3150_v44 = vld [vmem:[%s4439_s4 + $0x20] sm:$0xff] }
 0x15a   : > { %3669 = vmatprep.subr.bf16.mxu1 %v3668_v47  ;;  %v3690_v46 = vpack.c.bf16 %v3151_v45, %v3150_v44 }
 0x15d   : > { %3671 = vmatpush3.bf16.msra.mxu1 %v3668_v47 }
 0x160   : > { %3425 = vmatmul.mubr.msk.f32.vlgmr.msra.gmra.mrb[4].mxu1 %vm553_vm0, %v4048_v40 }
 0x223   : > { %v3404_v49 = vpop.f32.mrb[0].mxu1 }
 0x224   : > { %v681_v50 = vpop.f32.mrb[1].mxu1  ;;  %v687_v7 = vadd.f32 %v3404_v49, %v3127_v48 }
 0x225   : > { %v682_v51 = vadd.f32 %v3127_v48, %v681_v50  ;;  %v3152_v50 = vld [vmem:[%s4439_s4 + $0x30] sm:$0xff] }
 0x227   : > { %3431 = vmatprep.mubr.msk.f32.mxu1 %vm862_vm1, %v682_v51  ;;  %v3153_v51 = vld [vmem:[%s4439_s4 + $0x38] sm:$0xff] }
 0x22b   : > { %v3415_v53 = vpop.f32.mrb[2].mxu1 }
 0x22c   : > { %v773_v54 = vadd.f32 %v3415_v53, %v3130_v52  ;;  %v767_v55 = vpop.f32.mrb[3].mxu1 }
 0x22d   : > { %v768_v58 = vadd.f32 %v3130_v52, %v767_v55  ;;  %v3694_v55 = vpack.c.bf16 %v3153_v51, %v3152_v50 }
 0x22f   : > { %v3672_v60 = vpack.c.bf16 %v773_v54, %v768_v58 }
 0x231   : > { %3674 = vmatprep.subr.msk.bf16.mxu1 %vm4087_vm2, %v3672_v60 }
 0x232   : > { %3677 = vmatpush3.bf16.xpose.msk.msra.mxu1 %vm4087_vm2, %v3672_v60  ;;  %v3155_v60 = vld [vmem:[%s4442_s7 + $0x1] ss:$0 sm:$0xff] }
 0x233   : > { %v3426_v63 = vpop.f32.mrb[4].mxu1  ;;  %3683 = vmatprep.subr.bf16.mxu1 %v3682_v61 }
 0x234   : > { %v859_v2 = vadd.f32 %v3426_v63, %v3133_v62  ;;  %v853_v3 = vpop.f32.mrb[5].mxu1 }
 0x235   : > { %v854_v6 = vadd.f32 %v3133_v62, %v853_v3 }
 0x237   : > { %v3678_v8 = vpack.c.bf16 %v859_v2, %v854_v6 }
 0x239   : > { %3432 = vmatmul.mubr.msk.f32.vlgmr.msra.gmra.mrb[6].mxu1 %vm862_vm1, %v687_v7  ;;  %3679 = vmatprep.subr.bf16.mxu0 %v3678_v8 }
 0x23a   : > { %3681 = vmatpush3.bf16.msra.mxu0 %v3678_v8  ;;  %3685 = vmatpush3.bf16.msra.mxu1 %v3682_v61 }
 0x23b   : > { %3449 = vmatprep.mubr.msk.f32.mxu1 %vm553_vm0, %v4038_v35  ;;  %3687 = vmatprep.subr.bf16.mxu1 %v3686_v9 }
 0x23c   : > { %3691 = vmatprep.subr.bf16.mxu0 %v3690_v46 }
 0x23e   : > { %3689 = vmatpush3.bf16.msra.mxu1 %v3686_v9 }
 0x23f   : > { %3699 = vmatprep.subr.bf16.mxu1 %v3698_v12 }
 0x241   : > { %3450 = vmatmul.mubr.msk.f32.vlgmr.msra.gmra.mrb[8].mxu1 %vm553_vm0, %v4048_v40 }
 0x242   : > { %3701 = vmatpush3.bf16.msra.mxu1 %v3698_v12  ;;  %3471 = vmatprep.mubr.msk.f32.mxu1 %vm553_vm0, %v4038_v35 }
 0x243   : > { %3703 = vmatprep.subr.bf16.mxu1 %v3702_v15 }
 0x246   : > { %3705 = vmatpush3.bf16.msra.mxu1 %v3702_v15 }
 0x249   : > { %3472 = vmatmul.mubr.msk.f32.vlgmr.msra.gmra.mrb[10].mxu1 %vm553_vm0, %v4048_v40 }
 0x30c   : > { %v3433_v16 = vpop.f32.mrb[6].mxu1 }
 0x30d   : > { %v951_v17 = vmul.f32 0.35355338, %v3433_v16  ;;  %v941_v18 = vpop.f32.mrb[7].mxu1 }
 0x30e   : > { %v950_v19 = vmul.f32 0.35355338, %v941_v18 }
 0x30f   : > { %v956_v20 = vsel %vm952_vm3, %v951_v17, -inf }
 0x310   : > { %957 = vmax.xlane.f32.xlu1 %v956_v20  ;;  %v953_v21 = vsel %vm952_vm3, %v950_v19, -inf  ;;  %v3177_v20 = vld [vmem:[%s4438_s3 + $0x40] sm:$0xff] }
 0x311   : > { %954 = vmax.xlane.f32.xlu0 %v953_v21  ;;  %v3178_v21 = vld [vmem:[%s4438_s3 + $0x48] sm:$0xff] }
 0x314   : > { %v3451_v23 = vpop.f32.mrb[8].mxu1 }
 0x315   : > { %v1142_v24 = vadd.f32 %v3451_v23, %v3147_v22  ;;  %v1136_v25 = vpop.f32.mrb[9].mxu1  ;;  %v3172_v23 = vld [vmem:[%s4444_s9 + $0x8] sm:$0xff] }
 0x316   : > { %v1137_v56 = vadd.f32 %v3147_v22, %v1136_v25  ;;  %v3716_v22 = vpack.c.bf16 %v3178_v21, %v3177_v20 }
 0x31c   : > { %v3473_v27 = vpop.f32.mrb[10].mxu1 }
 0x31d   : > { %v1318_v28 = vadd.f32 %v3473_v27, %v3163_v26  ;;  %v1312_v29 = vpop.f32.mrb[11].mxu1  ;;  %v3179_v27 = vld [vmem:[%s4438_s3 + $0x50] sm:$0xff] }
 0x31e   : > { %v1313_v30 = vadd.f32 %v3163_v26, %v1312_v29 }
 0x320   : > { %v3712_v31 = vpack.c.bf16 %v1318_v28, %v1313_v30  ;;  %v3180_v28 = vld [vmem:[%s4438_s3 + $0x58] sm:$0xff] }
 0x322   : > { %3713 = vmatprep.subr.bf16.mxu1 %v3712_v31 }
 0x323   : > { %3715 = vmatpush3.bf16.msra.mxu1 %v3712_v31 }
 0x324   : > { %3717 = vmatprep.subr.bf16.mxu1 %v3716_v22 }
 0x39d   : > { %v958_v32 = vpop.xlane.xlu1 %957 }
 0x39e   : > { %v960_v33 = vsub.f32 %v951_v17, %v958_v32  ;;  %v955_v34 = vpop.xlane.xlu0 %954  ;;  %v3720_v32 = vpack.c.bf16 %v3180_v28, %v3179_v27 }
 0x39f   : > { %v959_v36 = vsub.f32 %v950_v19, %v955_v34  ;;  %v3194_v34 = vld [vmem:[%s4440_s5 + $0x48] sm:$0xff] }
 0x3a0   : > { %v963_v37 = vmul.f32 1.442695, %v960_v33  ;;  %v3193_v33 = vld [vmem:[%s4440_s5 + $0x40] sm:$0xff] }
 0x3a1   : > { %v961_v38 = vmul.f32 1.442695, %v959_v36  ;;  %v3732_v36 = vpack.c.bf16 %v3194_v34, %v3193_v33 }
 0x3a2   : > { %3843 = vpow2.f32 %v963_v37  ;;  %v3195_v37 = vld [vmem:[%s4440_s5 + $0x50] sm:$0xff] }
 0x3a3   : > { %3845 = vpow2.f32 %v961_v38  ;;  %v3196_v38 = vld [vmem:[%s4440_s5 + $0x58] sm:$0xff] }
 0x3ac   : > { %v3844_v39 = vpop.eup %3843 }
 0x3ad   : > { %v3846_v41 = vpop.eup %3845  ;;  %v968_v42 = vsel %vm952_vm3, %v3844_v39, 0.0 }
 0x3ae   : > { %969 = vadd.xlane.f32.xlu1 %v968_v42  ;;  %v965_v43 = vsel %vm952_vm3, %v3846_v41, 0.0  ;;  %v3185_v42 = vld [vmem:[%s4439_s4 + $0x40] sm:$0xff] }
 0x3af   : > { %966 = vadd.xlane.f32.xlu0 %v965_v43  ;;  %v3186_v43 = vld [vmem:[%s4439_s4 + $0x48] sm:$0xff] }
 0x43b   : > { %v970_v47 = vpop.xlane.xlu1 %969 }
 0x43c   : > { %3847 = vrcp.f32 %v970_v47  ;;  %v967_v48 = vpop.xlane.xlu0 %966  ;;  %v3182_v47 = vld [vmem:[%s4441_s6 + $0x2] ss:$0 sm:$0xff] }
 0x43d   : > { %3849 = vrcp.f32 %v967_v48  ;;  %v3187_v48 = vld [vmem:[%s4439_s4 + $0x50] sm:$0xff] }
 0x446   : > { %v3848_v49 = vpop.eup %3847 }
 0x447   : > { %v3850_v52 = vpop.eup %3849  ;;  %v974_v54 = vmul.f32 %v3848_v49, %v3844_v39  ;;  %v3736_v39 = vpack.c.bf16 %v3196_v38, %v3195_v37  ;;  %v3188_v49 = vld [vmem:[%s4439_s4 + $0x58] sm:$0xff]  ;;  %v3227_v37 = vld [vmem:[%s4440_s5 + $0x68] sm:$0xff] }
 0x448   : > { %v973_v53 = vmul.f32 %v3850_v52, %v3846_v41  ;;  %v1056_v41 = vld [vmem:[%s4444_s9] sm:$0xff] }
 0x44a   : > { %3438 = vmatprep.mubr.msk.f32.mxu0 %vm952_vm3, %v973_v53  ;;  %v3728_v53 = vpack.c.bf16 %v3188_v49, %v3187_v48 }
 0x44b   : > { %3439 = vmatmul.mubr.msk.f32.vlgmr.msra.gmra.mrb[0].mxu0 %vm952_vm3, %v974_v54  ;;  %v3198_v54 = vld [vmem:[%s4443_s8 + $0x2] ss:$0 sm:$0xff] }
 0x44c   : > { %3693 = vmatpush3.bf16.msra.mxu0 %v3690_v46  ;;  %3460 = vmatprep.mubr.msk.f32.mxu0 %vm553_vm0, %v4038_v35  ;;  %v3724_v46 = vpack.c.bf16 %v3186_v43, %v3185_v42  ;;  %v3218_v43 = vld [vmem:[%s4439_s4 + $0x60] sm:$0xff] }
 0x44d   : > { %3695 = vmatprep.subr.bf16.mxu0 %v3694_v55 }
 0x450   : > { %3697 = vmatpush3.bf16.msra.mxu0 %v3694_v55 }
 0x453   : > { %3461 = vmatmul.mubr.msk.f32.vlgmr.msra.gmra.mrb[2].mxu0 %vm553_vm0, %v4048_v40 }
 0x454   : > { %3478 = vmatprep.mubr.msk.f32.mxu0 %vm862_vm1, %v1137_v56 }
 0x51e   : > { %v4154_v57 = vpop.f32.mrb[0].mxu0 }
 0x51f   : > { %v4156_v58 = vpop.f32.mrb[1].mxu0 }
 0x526   : > { %v3462_v61 = vpop.f32.mrb[2].mxu0 }
 0x527   : > { %v1230_v62 = vadd.f32 %v3462_v61, %v3155_v60  ;;  %v1224_v63 = vpop.f32.mrb[3].mxu0 }
 0x528   : > { %v1225_v2 = vadd.f32 %v3155_v60, %v1224_v63 }
 0x52a   : > { %v3706_v3 = vpack.c.bf16 %v1230_v62, %v1225_v2 }
 0x52c   : > { %3708 = vmatprep.subr.msk.bf16.mxu0 %vm4087_vm2, %v3706_v3 }
 0x52d   : > { %3711 = vmatpush3.bf16.xpose.msk.msra.mxu0 %vm4087_vm2, %v3706_v3 }
 0x52e   : > { %3488 = vmatprep.subr.mxu0 %v3172_v23 }
 0x534   : > { %3479 = vmatmul.mubr.msk.f32.vlgmr.msra.gmra.mrb[4].mxu0 %vm862_vm1, %v1142_v24 }
 0x535   : > { %3489 = vmatpush3.msra.mxu0 %v3172_v23  ;;  %v3211_v23 = vld [vmem:[%s4438_s3 + $0x68] sm:$0xff] }
 0x536   : > { %3493 = vmatprep.subr.mxu0 %v1056_v41 }
 0x607   : > { %v3480_v4 = vpop.f32.mrb[4].mxu0 }
 0x608   : > { %v1409_v5 = vmul.f32 0.35355338, %v3480_v4  ;;  %v1399_v6 = vpop.f32.mrb[5].mxu0 }
 0x609   : > { %v1408_v7 = vmul.f32 0.35355338, %v1399_v6 }
 0x60a   : > { %v1413_v8 = vsel %vm952_vm3, %v1409_v5, -inf }
 0x60b   : > { %1414 = vmax.xlane.f32.xlu1 %v1413_v8  ;;  %v1410_v9 = vsel %vm952_vm3, %v1408_v7, -inf }
 0x60c   : > { %1411 = vmax.xlane.f32.xlu0 %v1410_v9 }
 0x698   : > { %v1415_v10 = vpop.xlane.xlu1 %1414 }
 0x699   : > { %v1417_v11 = vsub.f32 %v1409_v5, %v1415_v10  ;;  %v1412_v12 = vpop.xlane.xlu0 %1411 }
 0x69a   : > { %v1416_v13 = vsub.f32 %v1408_v7, %v1412_v12 }
 0x69b   : > { %v1420_v14 = vmul.f32 1.442695, %v1417_v11 }
 0x69c   : > { %v1418_v15 = vmul.f32 1.442695, %v1416_v13 }
 0x69d   : > { %3851 = vpow2.f32 %v1420_v14 }
 0x69e   : > { %3853 = vpow2.f32 %v1418_v15 }
 0x6a7   : > { %v3852_v16 = vpop.eup %3851 }
 0x6a8   : > { %v3854_v17 = vpop.eup %3853  ;;  %v1425_v18 = vsel %vm952_vm3, %v3852_v16, 0.0 }
 0x6a9   : > { %1426 = vadd.xlane.f32.xlu1 %v1425_v18  ;;  %v1422_v19 = vsel %vm952_vm3, %v3854_v17, 0.0 }
 0x6aa   : > { %1423 = vadd.xlane.f32.xlu0 %v1422_v19 }
 0x736   : > { %v1427_v24 = vpop.xlane.xlu1 %1426 }
 0x737   : > { %3855 = vrcp.f32 %v1427_v24  ;;  %v1424_v25 = vpop.xlane.xlu0 %1423 }
 0x738   : > { %3857 = vrcp.f32 %v1424_v25  ;;  %v3207_v25 = vld [vmem:[%s4444_s9 + $0x10] sm:$0xff] }
 0x741   : > { %v3856_v26 = vpop.eup %3855 }
 0x742   : > { %v3858_v29 = vpop.eup %3857  ;;  %v1431_v31 = vmul.f32 %v3856_v26, %v3852_v16 }
 0x743   : > { %v1430_v30 = vmul.f32 %v3858_v29, %v3854_v17  ;;  %v3212_v29 = vld [vmem:[%s4438_s3 + $0x70] sm:$0xff] }
 0x745   : > { %3485 = vmatprep.mubr.msk.f32.mxu1 %vm952_vm3, %v1430_v30  ;;  %v3213_v30 = vld [vmem:[%s4438_s3 + $0x78] sm:$0xff] }
 0x746   : > { %3486 = vmatmul.mubr.msk.f32.vlgmr.msra.gmra.mrb[12].mxu1 %vm952_vm3, %v1431_v31  ;;  %v3754_v34 = vpack.c.bf16 %v3213_v30, %v3212_v29  ;;  %v3243_v29 = vld [vmem:[%s4445_s10] ss:$0 sm:$0xff] }
 0x747   : > { %3719 = vmatpush3.bf16.msra.mxu1 %v3716_v22  ;;  %3506 = vmatprep.mubr.msk.f32.mxu1 %vm553_vm0, %v4038_v35  ;;  %v3210_v22 = vld [vmem:[%s4438_s3 + $0x60] sm:$0xff] }
 0x748   : > { %3721 = vmatprep.subr.bf16.mxu1 %v3720_v32  ;;  %v3750_v24 = vpack.c.bf16 %v3211_v23, %v3210_v22 }
 0x74b   : > { %3723 = vmatpush3.bf16.msra.mxu1 %v3720_v32 }
 0x74c   : > { %3733 = vmatprep.subr.bf16.mxu1 %v3732_v36 }
 0x74e   : > { %3507 = vmatmul.mubr.msk.f32.vlgmr.msra.gmra.mrb[14].mxu1 %vm553_vm0, %v4048_v40 }
 0x74f   : > { %3735 = vmatpush3.bf16.msra.mxu1 %v3732_v36  ;;  %3528 = vmatprep.mubr.msk.f32.mxu1 %vm553_vm0, %v4038_v35  ;;  %v3226_v36 = vld [vmem:[%s4440_s5 + $0x60] sm:$0xff] }
 0x750   : > { %3737 = vmatprep.subr.bf16.mxu1 %v3736_v39  ;;  %v3766_v38 = vpack.c.bf16 %v3227_v37, %v3226_v36 }
 0x753   : > { %3739 = vmatpush3.bf16.msra.mxu1 %v3736_v39  ;;  %v3228_v39 = vld [vmem:[%s4440_s5 + $0x70] sm:$0xff] }
 0x756   : > { %3529 = vmatmul.mubr.msk.f32.vlgmr.msra.gmra.mrb[16].mxu1 %vm553_vm0, %v4048_v40 }
 0x819   : > { %v3487_v44 = vpop.f32.mrb[12].mxu1 }
 0x81a   : > { %v1504_v45 = vpop.f32.mrb[13].mxu1 }
 0x81b   : > { %3490 = vmatprep.mubr.msk.f32.mxu0 %vm862_vm1, %v1504_v45 }
 0x81c   : > { %3491 = vmatmul.mubr.msk.f32.vlgmr.msra.gmra.mrb[6].mxu0 %vm862_vm1, %v3487_v44  ;;  %v3219_v44 = vld [vmem:[%s4439_s4 + $0x68] sm:$0xff] }
 0x81d   : > { %3494 = vmatpush3.msra.mxu0 %v1056_v41  ;;  %3495 = vmatprep.mubr.msk.f32.mxu0 %vm862_vm1, %v4156_v58  ;;  %v3229_v41 = vld [vmem:[%s4440_s5 + $0x78] sm:$0xff]  ;;  %v3758_v45 = vpack.c.bf16 %v3219_v44, %v3218_v43 }
 0x81e   : > { %3725 = vmatprep.subr.bf16.mxu0 %v3724_v46  ;;  %v3770_v42 = vpack.c.bf16 %v3229_v41, %v3228_v39 }
 0x821   : > { %v3508_v50 = vpop.f32.mrb[14].mxu1 }
 0x822   : > { %v1762_v51 = vadd.f32 %v3508_v50, %v3182_v47  ;;  %v1756_v52 = vpop.f32.mrb[15].mxu1 }
 0x823   : > { %v1757_v60 = vadd.f32 %v3182_v47, %v1756_v52  ;;  %v3221_v47 = vld [vmem:[%s4439_s4 + $0x78] sm:$0xff] }
 0x824   : > { %3496 = vmatmul.mubr.msk.f32.vlgmr.msra.gmra.mrb[6].mxu0 %vm862_vm1, %v4154_v57  ;;  %v3190_v57 = vld [vmem:[%s4442_s7 + $0x2] ss:$0 sm:$0xff] }
 0x825   : > { %3727 = vmatpush3.bf16.msra.mxu0 %v3724_v46  ;;  %3517 = vmatprep.mubr.msk.f32.mxu0 %vm553_vm0, %v4038_v35  ;;  %v3220_v46 = vld [vmem:[%s4439_s4 + $0x70] sm:$0xff] }
 0x826   : > { %3729 = vmatprep.subr.bf16.mxu0 %v3728_v53  ;;  %v3762_v50 = vpack.c.bf16 %v3221_v47, %v3220_v46 }
 0x829   : > { %3731 = vmatpush3.bf16.msra.mxu0 %v3728_v53  ;;  %v3530_v55 = vpop.f32.mrb[16].mxu1 }
 0x82a   : > { %v1938_v56 = vadd.f32 %v3530_v55, %v3198_v54  ;;  %v1932_v58 = vpop.f32.mrb[17].mxu1 }
 0x82b   : > { %v1933_v61 = vadd.f32 %v3198_v54, %v1932_v58 }
 0x82c   : > { %3518 = vmatmul.mubr.msk.f32.vlgmr.msra.gmra.mrb[8].mxu0 %vm553_vm0, %v4048_v40 }
 0x82d   : > { %v3746_v62 = vpack.c.bf16 %v1938_v56, %v1933_v61  ;;  %3535 = vmatprep.mubr.msk.f32.mxu0 %vm862_vm1, %v1757_v60  ;;  %v3231_v56 = vld [vmem:[%s4443_s8 + $0x3] ss:$0 sm:$0xff] }
 0x82f   : > { %3747 = vmatprep.subr.bf16.mxu1 %v3746_v62 }
 0x830   : > { %3749 = vmatpush3.bf16.msra.mxu1 %v3746_v62 }
 0x831   : > { %3751 = vmatprep.subr.bf16.mxu1 %v3750_v24 }
 0x8ff   : > { %v3519_v63 = vpop.f32.mrb[8].mxu0 }
 0x900   : > { %v1850_v2 = vadd.f32 %v3519_v63, %v3190_v57  ;;  %v1844_v3 = vpop.f32.mrb[9].mxu0 }
 0x901   : > { %v1845_v4 = vadd.f32 %v3190_v57, %v1844_v3  ;;  %v3223_v57 = vld [vmem:[%s4442_s7 + $0x3] ss:$0 sm:$0xff] }
 0x903   : > { %v3740_v5 = vpack.c.bf16 %v1850_v2, %v1845_v4 }
 0x905   : > { %3742 = vmatprep.subr.msk.bf16.mxu0 %vm4087_vm2, %v3740_v5 }
 0x906   : > { %3745 = vmatpush3.bf16.xpose.msk.msra.mxu0 %vm4087_vm2, %v3740_v5 }
 0x907   : > { %3545 = vmatprep.subr.mxu0 %v3207_v25 }
 0x90d   : > { %3536 = vmatmul.mubr.msk.f32.vlgmr.msra.gmra.mrb[10].mxu0 %vm862_vm1, %v1762_v51  ;;  %v3215_v51 = vld [vmem:[%s4441_s6 + $0x3] ss:$0 sm:$0xff] }
 0x90e   : > { %3546 = vmatpush3.msra.mxu0 %v3207_v25 }
 0x90f   : > { %3759 = vmatprep.subr.bf16.mxu0 %v3758_v45 }
 0x9e0   : > { %v3537_v6 = vpop.f32.mrb[10].mxu0 }
 0x9e1   : > { %v2029_v7 = vmul.f32 0.35355338, %v3537_v6  ;;  %v2019_v8 = vpop.f32.mrb[11].mxu0 }
 0x9e2   : > { %v2028_v9 = vmul.f32 0.35355338, %v2019_v8 }
 0x9e3   : > { %v2033_v10 = vsel %vm952_vm3, %v2029_v7, -inf }
 0x9e4   : > { %2034 = vmax.xlane.f32.xlu1 %v2033_v10  ;;  %v2030_v11 = vsel %vm952_vm3, %v2028_v9, -inf }
 0x9e5   : > { %2031 = vmax.xlane.f32.xlu0 %v2030_v11 }
 0xa71   : > { %v2035_v12 = vpop.xlane.xlu1 %2034 }
 0xa72   : > { %v2037_v13 = vsub.f32 %v2029_v7, %v2035_v12  ;;  %v2032_v14 = vpop.xlane.xlu0 %2031 }
 0xa73   : > { %v2036_v15 = vsub.f32 %v2028_v9, %v2032_v14 }
 0xa74   : > { %v2040_v16 = vmul.f32 1.442695, %v2037_v13 }
 0xa75   : > { %v2038_v17 = vmul.f32 1.442695, %v2036_v15 }
 0xa76   : > { %3859 = vpow2.f32 %v2040_v16 }
 0xa77   : > { %3861 = vpow2.f32 %v2038_v17 }
 0xa80   : > { %v3860_v18 = vpop.eup %3859 }
 0xa81   : > { %v3862_v19 = vpop.eup %3861  ;;  %v2045_v20 = vsel %vm952_vm3, %v3860_v18, 0.0 }
 0xa82   : > { %2046 = vadd.xlane.f32.xlu1 %v2045_v20  ;;  %v2042_v21 = vsel %vm952_vm3, %v3862_v19, 0.0  ;;  %v3240_v20 = vld [vmem:[%s4444_s9 + $0x18] sm:$0xff] }
 0xa83   : > { %2043 = vadd.xlane.f32.xlu0 %v2042_v21 }
 0xb0f   : > { %v2047_v26 = vpop.xlane.xlu1 %2046 }
 0xb10   : > { %3863 = vrcp.f32 %v2047_v26  ;;  %v2044_v27 = vpop.xlane.xlu0 %2043 }
 0xb11   : > { %3865 = vrcp.f32 %v2044_v27 }
 0xb1a   : > { %v3864_v28 = vpop.eup %3863 }
 0xb1b   : > { %v3866_v31 = vpop.eup %3865  ;;  %v2051_v33 = vmul.f32 %v3864_v28, %v3860_v18 }
 0xb1c   : > { %v2050_v32 = vmul.f32 %v3866_v31, %v3862_v19 }
 0xb1e   : > { %3542 = vmatprep.mubr.msk.f32.mxu1 %vm952_vm3, %v2050_v32 }
 0xb1f   : > { %3543 = vmatmul.mubr.msk.f32.vlgmr.msra.gmra.mrb[18].mxu1 %vm952_vm3, %v2051_v33 }
 0xb20   : > { %3753 = vmatpush3.bf16.msra.mxu1 %v3750_v24  ;;  %3558 = vmatprep.mubr.msk.f32.mxu1 %vm553_vm0, %v4038_v35 }
 0xb21   : > { %3755 = vmatprep.subr.bf16.mxu1 %v3754_v34 }
 0xb24   : > { %3757 = vmatpush3.bf16.msra.mxu1 %v3754_v34 }
 0xb25   : > { %3767 = vmatprep.subr.bf16.mxu1 %v3766_v38 }
 0xb27   : > { %3559 = vmatmul.mubr.msk.f32.vlgmr.msra.gmra.mrb[20].mxu1 %vm553_vm0, %v4048_v40 }
 0xb28   : > { %3769 = vmatpush3.bf16.msra.mxu1 %v3766_v38  ;;  %3580 = vmatprep.mubr.msk.f32.mxu1 %vm553_vm0, %v4038_v35 }
 0xb29   : > { %3771 = vmatprep.subr.bf16.mxu1 %v3770_v42 }
 0xb2c   : > { %3773 = vmatpush3.bf16.msra.mxu1 %v3770_v42 }
 0xb2f   : > { %3581 = vmatmul.mubr.msk.f32.vlgmr.msra.gmra.mrb[22].mxu1 %vm553_vm0, %v4048_v40 }
 0xbf2   : > { %v3544_v48 = vpop.f32.mrb[18].mxu1 }
 0xbf3   : > { %v2124_v49 = vpop.f32.mrb[19].mxu1 }
 0xbf4   : > { %3547 = vmatprep.mubr.msk.f32.mxu0 %vm862_vm1, %v2124_v49  ;;  %v2814_v49 = vld [vmem:[%s4448_s13 + $0x8] sm:$0xff] }
 0xbf5   : > { %3548 = vmatmul.mubr.msk.f32.vlgmr.msra.gmra.mrb[6].mxu0 %vm862_vm1, %v3544_v48  ;;  %v2813_v48 = vld [vmem:[%s4448_s13] sm:$0xff] }
 0xbf6   : > { %3761 = vmatpush3.bf16.msra.mxu0 %v3758_v45  ;;  %3569 = vmatprep.mubr.msk.f32.mxu0 %vm553_vm0, %v4038_v35 }
 0xbf7   : > { %3763 = vmatprep.subr.bf16.mxu0 %v3762_v50 }
 0xbfa   : > { %v3560_v52 = vpop.f32.mrb[20].mxu1  ;;  %3765 = vmatpush3.bf16.msra.mxu0 %v3762_v50  ;;  %v3784_v50 = vpack.c.bf16 %v2814_v49, %v2813_v48 }
 0xbfb   : > { %v2303_v53 = vadd.f32 %v3560_v52, %v3215_v51  ;;  %v2297_v54 = vpop.f32.mrb[21].mxu1  ;;  %v2816_v52 = vld [vmem:[%s4448_s13 + $0x18] sm:$0xff] }
 0xbfc   : > { %v2298_v55 = vadd.f32 %v3215_v51, %v2297_v54  ;;  %v2815_v51 = vld [vmem:[%s4448_s13 + $0x10] sm:$0xff] }
 0xbfd   : > { %3570 = vmatmul.mubr.msk.f32.vlgmr.msra.gmra.mrb[12].mxu0 %vm553_vm0, %v4048_v40 }
 0xbfe   : > { %3587 = vmatprep.mubr.msk.f32.mxu0 %vm862_vm1, %v2298_v55 }
 0xc02   : > { %v3582_v35 = vpop.f32.mrb[22].mxu1 }
 0xc03   : > { %v2479_v58 = vadd.f32 %v3582_v35, %v3231_v56  ;;  %v2473_v60 = vpop.f32.mrb[23].mxu1 }
 0xc04   : > { %v2474_v61 = vadd.f32 %v3231_v56, %v2473_v60 }
 0xc06   : > { %v3780_v62 = vpack.c.bf16 %v2479_v58, %v2474_v61 }
 0xc08   : > { %3781 = vmatprep.subr.bf16.mxu1 %v3780_v62 }
 0xc09   : > { %3783 = vmatpush3.bf16.msra.mxu1 %v3780_v62  ;;  %v3244_v62 = vld [vmem:[%s4446_s11] ss:$0 sm:$0xff] }
 0xc0a   : > { %3785 = vmatprep.subr.bf16.mxu1 %v3784_v50 }
 0xcd0   : > { %v3571_v63 = vpop.f32.mrb[12].mxu0 }
 0xcd1   : > { %v2391_v2 = vadd.f32 %v3571_v63, %v3223_v57  ;;  %v2385_v40 = vpop.f32.mrb[13].mxu0 }
 0xcd2   : > { %v2386_v3 = vadd.f32 %v3223_v57, %v2385_v40  ;;  %v3245_v40 = vld [vmem:[%s4447_s12] ss:$0 sm:$0xff] }
 0xcd4   : > { %v3774_v4 = vpack.c.bf16 %v2391_v2, %v2386_v3 }
 0xcd6   : > { %3776 = vmatprep.subr.msk.bf16.mxu0 %vm4087_vm2, %v3774_v4 }
 0xcd7   : > { %3779 = vmatpush3.bf16.xpose.msk.msra.mxu0 %vm4087_vm2, %v3774_v4 }
 0xcd8   : > { %3597 = vmatprep.subr.mxu0 %v3240_v20 }
 0xcde   : > { %3588 = vmatmul.mubr.msk.f32.vlgmr.msra.gmra.mrb[14].mxu0 %vm862_vm1, %v2303_v53  ;;  %v3788_v53 = vpack.c.bf16 %v2816_v52, %v2815_v51 }
 0xcdf   : > { %3598 = vmatpush3.msra.mxu0 %v3240_v20 }
 0xdb1   : > { %v3589_v5 = vpop.f32.mrb[14].mxu0 }
 0xdb2   : > { %v2570_v6 = vmul.f32 0.35355338, %v3589_v5  ;;  %v2560_v7 = vpop.f32.mrb[15].mxu0 }
 0xdb3   : > { %v2569_v8 = vmul.f32 0.35355338, %v2560_v7  ;;  %v2959_v7 = vld [vmem:[%s4450_s15] sm:$0xff] }
 0xdb4   : > { %v2574_v9 = vsel %vm952_vm3, %v2570_v6, -inf }
 0xdb5   : > { %2575 = vmax.xlane.f32.xlu1 %v2574_v9  ;;  %v2571_v10 = vsel %vm952_vm3, %v2569_v8, -inf }
 0xdb6   : > { %2572 = vmax.xlane.f32.xlu0 %v2571_v10  ;;  %v2961_v10 = vld [vmem:[%s4450_s15 + $0x10] sm:$0xff] }
 0xe42   : > { %v2576_v11 = vpop.xlane.xlu1 %2575 }
 0xe43   : > { %v2578_v12 = vsub.f32 %v2570_v6, %v2576_v11  ;;  %v2573_v13 = vpop.xlane.xlu0 %2572  ;;  %v2962_v11 = vld [vmem:[%s4450_s15 + $0x18] sm:$0xff] }
 0xe44   : > { %v2577_v14 = vsub.f32 %v2569_v8, %v2573_v13  ;;  %v2960_v8 = vld [vmem:[%s4450_s15 + $0x8] sm:$0xff]  ;;  %v2963_v13 = vld [vmem:[%s4450_s15 + $0x20] sm:$0xff] }
 0xe45   : > { %v2581_v15 = vmul.f32 1.442695, %v2578_v12  ;;  %v3792_v9 = vpack.c.bf16 %v2960_v8, %v2959_v7  ;;  %v3796_v12 = vpack.c.bf16 %v2962_v11, %v2961_v10 }
 0xe46   : > { %v2579_v16 = vmul.f32 1.442695, %v2577_v14  ;;  %v2964_v14 = vld [vmem:[%s4450_s15 + $0x28] sm:$0xff] }
 0xe47   : > { %3867 = vpow2.f32 %v2581_v15  ;;  %3793 = vmatprep.subr.bf16.mxu0 %v3792_v9  ;;  %v3800_v15 = vpack.c.bf16 %v2964_v14, %v2963_v13  ;;  %v3895_v13 = vmov 1.0  }
 0xe48   : > { %3869 = vpow2.f32 %v2579_v16  ;;  %v2965_v16 = vld [vmem:[%s4450_s15 + $0x30] sm:$0xff] }
 0xe51   : > { %v3868_v59 = vpop.eup %3867 }
 0xe52   : > { %v3870_v17 = vpop.eup %3869  ;;  %v2586_v18 = vsel %vm952_vm3, %v3868_v59, 0.0 }
 0xe53   : > { %2587 = vadd.xlane.f32.xlu1 %v2586_v18  ;;  %v2583_v19 = vsel %vm952_vm3, %v3870_v17, 0.0  ;;  %v2967_v18 = vld [vmem:[%s4450_s15 + $0x40] sm:$0xff] }
 0xe54   : > { %2584 = vadd.xlane.f32.xlu0 %v2583_v19  ;;  %v2968_v19 = vld [vmem:[%s4450_s15 + $0x48] sm:$0xff] }
 0xe55   : > { %v3808_v20 = vpack.c.bf16 %v2968_v19, %v2967_v18 }
 0xee0   : > { %v2588_v21 = vpop.xlane.xlu1 %2587 }
 0xee1   : > { %3871 = vrcp.f32 %v2588_v21  ;;  %v2585_v22 = vpop.xlane.xlu0 %2584  ;;  %v2969_v21 = vld [vmem:[%s4450_s15 + $0x50] sm:$0xff] }
 0xee2   : > { %3873 = vrcp.f32 %v2585_v22  ;;  %v2970_v22 = vld [vmem:[%s4450_s15 + $0x58] sm:$0xff] }
 0xeeb   : > { %v3872_v23 = vpop.eup %3871 }
 0xeec   : > { %v3874_v24 = vpop.eup %3873  ;;  %v2592_v26 = vmul.f32 %v3872_v23, %v3868_v59  ;;  %v2966_v59 = vld [vmem:[%s4450_s15 + $0x38] sm:$0xff]  ;;  %v3812_v23 = vpack.c.bf16 %v2970_v22, %v2969_v21 }
 0xeed   : > { %v2591_v25 = vmul.f32 %v3874_v24, %v3870_v17  ;;  %v3804_v17 = vpack.c.bf16 %v2966_v59, %v2965_v16  ;;  %v2971_v24 = vld [vmem:[%s4450_s15 + $0x60] sm:$0xff] }
 0xeef   : > { %3594 = vmatprep.mubr.msk.f32.mxu1 %vm952_vm3, %v2591_v25  ;;  %v2972_v25 = vld [vmem:[%s4450_s15 + $0x68] sm:$0xff] }
 0xef0   : > { %3595 = vmatmul.mubr.msk.f32.vlgmr.msra.gmra.mrb[24].mxu1 %vm952_vm3, %v2592_v26  ;;  %v3816_v26 = vpack.c.bf16 %v2972_v25, %v2971_v24  ;;  %v3249_v24 = vld [vmem:[%s4451_s16] ss:$0 sm:$0xff] }
 0xef1   : > { %3787 = vmatpush3.bf16.msra.mxu1 %v3784_v50 }
 0xef2   : > { %3789 = vmatprep.subr.bf16.mxu1 %v3788_v53 }
 0xef5   : > { %3791 = vmatpush3.bf16.msra.mxu1 %v3788_v53 }
 0xfc3   : > { %v3596_v27 = vpop.f32.mrb[24].mxu1 }
 0xfc4   : > { %v2665_v28 = vpop.f32.mrb[25].mxu1 }
 0xfc5   : > { %3599 = vmatprep.mubr.msk.f32.mxu0 %vm862_vm1, %v2665_v28  ;;  %v2974_v28 = vld [vmem:[%s4450_s15 + $0x78] sm:$0xff] }
 0xfc6   : > { %3600 = vmatmul.mubr.msk.f32.vlgmr.msra.gmra.mrb[6].mxu0 %vm862_vm1, %v3596_v27  ;;  %v2973_v27 = vld [vmem:[%s4450_s15 + $0x70] sm:$0xff] }
 0xfc7   : > { %3795 = vmatpush3.bf16.msra.mxu0 %v3792_v9 }
 0xfc8   : > { %3797 = vmatprep.subr.bf16.mxu0 %v3796_v12 }
 0xfcb   : > { %3799 = vmatpush3.bf16.msra.mxu0 %v3796_v12 }
 0xfcc   : > { %3801 = vmatprep.subr.bf16.mxu0 %v3800_v15 }
 0xfcf   : > { %3803 = vmatpush3.bf16.msra.mxu0 %v3800_v15 }
 0xfd0   : > { %3805 = vmatprep.subr.bf16.mxu0 %v3804_v17 }
 0xfd3   : > { %3807 = vmatpush3.bf16.msra.mxu0 %v3804_v17 }
 0xfd4   : > { %3809 = vmatprep.subr.bf16.mxu0 %v3808_v20 }
 0xfd7   : > { %3811 = vmatpush3.bf16.msra.mxu0 %v3808_v20 }
 0xfd8   : > { %3813 = vmatprep.subr.bf16.mxu0 %v3812_v23 }
 0xfdb   : > { %3815 = vmatpush3.bf16.msra.mxu0 %v3812_v23 }
 0xfdc   : > { %3817 = vmatprep.subr.bf16.mxu0 %v3816_v26 }
 0xfdf   : > { %3819 = vmatpush3.bf16.msra.mxu0 %v3816_v26 }
0x1099   : > { %v3601_v30 = vpop.f32.mrb[6].mxu0 }
0x109a   : > { %v2766_v31 = vadd.f32 %v3601_v30, %v3243_v29  ;;  %v2748_v32 = vpop.f32.mrb[7].mxu0  ;;  %v3246_v30 = vld [vmem:[%s4449_s14] ss:$0 sm:$0xff] }
0x109b   : > { %v2765_v33 = vadd.f32 %v3243_v29, %v2748_v32  ;;  %v3820_v29 = vpack.c.bf16 %v2974_v28, %v2973_v27 }
0x109c   : > { %v4336_v34 = vadd.f32 %v2766_v31, %v4004_v1 }
0x109d   : > { %v4339_v36 = vadd.f32 %v2765_v33, %v4002_v0  ;;  %3821 = vmatprep.subr.bf16.mxu0 %v3820_v29 }
0x109e   : > { %v2774_v37 = vsel %vm553_vm0, %v4336_v34, 0.0  ;;  %3823 = vmatpush3.bf16.msra.mxu0 %v3820_v29 }
0x109f   : > { %2775 = vadd.xlane.f32.xlu1 %v2774_v37  ;;  %v2771_v38 = vsel %vm553_vm0, %v4339_v36, 0.0 }
0x10a0   : > { %2772 = vadd.xlane.f32.xlu0 %v2771_v38 }
0x112c   : > { %v2776_v39 = vpop.xlane.xlu1 %2775 }
0x112d   : > { %v2778_v41 = vmul.f32 0.03125, %v2776_v39  ;;  %v2773_v42 = vpop.xlane.xlu0 %2772 }
0x112e   : > { %v2777_v43 = vmul.f32 0.03125, %v2773_v42 }
0x112f   : > { %v2780_v44 = vsub.f32 %v4336_v34, %v2778_v41 }
0x1130   : > { %v2779_v1 = vsub.f32 %v4339_v36, %v2777_v43 }
0x1131   : > { %v2782_v45 = vmul.f32 %v2780_v44, %v2780_v44 }
0x1132   : > { %v2781_v46 = vmul.f32 %v2779_v1, %v2779_v1 }
0x1133   : > { %v2786_v0 = vsel %vm553_vm0, %v2782_v45, 0.0 }
0x1134   : > { %2787 = vadd.xlane.f32.xlu1 %v2786_v0  ;;  %v2783_v47 = vsel %vm553_vm0, %v2781_v46, 0.0 }
0x1135   : > { %2784 = vadd.xlane.f32.xlu0 %v2783_v47 }
0x11c1   : > { %v2788_v54 = vpop.xlane.xlu1 %2787 }
0x11c2   : > { %v2790_v55 = vmul.f32 0.03125, %v2788_v54  ;;  %v2785_v56 = vpop.xlane.xlu0 %2784 }
0x11c3   : > { %v2789_v35 = vmul.f32 0.03125, %v2785_v56 }
0x11c4   : > { %v2792_v58 = vadd.f32 1e-05, %v2790_v55 }
0x11c5   : > { %v2791_v60 = vadd.f32 1e-05, %v2789_v35 }
0x11c6   : > { %3875 = vrsqrt.f32 %v2792_v58 }
0x11c7   : > { %3877 = vrsqrt.f32 %v2791_v60 }
0x11d0   : > { %v3876_v61 = vpop.eup %3875 }
0x11d1   : > { %v3878_v57 = vpop.eup %3877  ;;  %v2796_v63 = vmul.f32 %v3876_v61, %v2780_v44 }
0x11d2   : > { %v2795_v2 = vmul.f32 %v3878_v57, %v2779_v1 }
0x11d3   : > { %v2804_v3 = vmul.f32 %v3244_v62, %v2796_v63 }
0x11d4   : > { %v2803_v4 = vmul.f32 %v3244_v62, %v2795_v2 }
0x11d5   : > { %v2812_v6 = vadd.f32 %v3245_v40, %v2804_v3 }
0x11d6   : > { %v2811_v5 = vadd.f32 %v3245_v40, %v2803_v4 }
0x11d8   : > { %3610 = vmatprep.mubr.msk.f32.mxu1 %vm553_vm0, %v2811_v5 }
0x11d9   : > { %3611 = vmatmul.mubr.msk.f32.vlgmr.msra.gmra.mrb[26].mxu1 %vm553_vm0, %v2812_v6 }
0x12ac   : > { %v3612_v31 = vpop.f32.mrb[26].mxu1 }
0x12ad   : > { %v2902_v32 = vadd.f32 %v3612_v31, %v3246_v30  ;;  %v2896_v33 = vpop.f32.mrb[27].mxu1 }
0x12ae   : > { %v2897_v37 = vadd.f32 %v3246_v30, %v2896_v33 }
0x12af   : > { %v2908_v38 = vmul.f32 0.70710677, %v2902_v32  ;;  %v2906_v21 = vmul.f32 0.5, %v2902_v32 }
0x12b0   : > { %v2907_v39 = vmul.f32 0.70710677, %v2897_v37  ;;  %v2905_v19 = vmul.f32 0.5, %v2897_v37 }
0x12b1   : > { %v2914_v41 = vand.u32 2147483647, %v2908_v38  ;;  %vm2910_vm4 = vcmp.lt.f32.partialorder %v2908_v38, 0.0 }
0x12b2   : > { %v2913_v42 = vand.u32 2147483647, %v2907_v39  ;;  %vm2909_vm5 = vcmp.lt.f32.partialorder %v2907_v39, 0.0  ;;  %v2912_v14 = vsel %vm2910_vm4, -1.0, %v3895_v13 }
0x12b3   : > { %v2916_v43 = vmul.f32 0.3275911, %v2914_v41  ;;  %v2942_v46 = vsub.f32 0.0, %v2914_v41  ;;  %v2911_v59 = vsel %vm2909_vm5, -1.0, %v3895_v13 }
0x12b4   : > { %v2915_v44 = vmul.f32 0.3275911, %v2913_v42  ;;  %v2941_v0 = vsub.f32 0.0, %v2913_v42 }
0x12b5   : > { %v2918_v1 = vadd.f32 1.0, %v2916_v43  ;;  %v2944_v48 = vmul.f32 %v2942_v46, %v2914_v41 }
0x12b6   : > { %v2917_v45 = vadd.f32 1.0, %v2915_v44  ;;  %v2943_v51 = vmul.f32 %v2941_v0, %v2913_v42 }
0x12b7   : > { %3879 = vrcp.f32 %v2918_v1  ;;  %v2947_v54 = vmul.f32 1.442695, %v2944_v48 }
0x12b8   : > { %3881 = vrcp.f32 %v2917_v45  ;;  %v2945_v35 = vmul.f32 1.442695, %v2943_v51 }
0x12b9   : > { %3883 = vpow2.f32 %v2947_v54 }
0x12ba   : > { %3885 = vpow2.f32 %v2945_v35 }
0x12c1   : > { %v3880_v47 = vpop.eup %3879 }
0x12c2   : > { %v3882_v49 = vpop.eup %3881  ;;  %v2924_v50 = vmul.f32 1.0614054, %v3880_v47 }
0x12c3   : > { %v2923_v52 = vmul.f32 1.0614054, %v3882_v49  ;;  %v3884_v7 = vpop.eup %3883 }
0x12c4   : > { %v2926_v53 = vadd.f32 -1.4531521, %v2924_v50  ;;  %v3886_v9 = vpop.eup %3885 }
0x12c5   : > { %v2925_v55 = vadd.f32 -1.4531521, %v2923_v52 }
0x12c6   : > { %v2928_v56 = vmul.f32 %v3880_v47, %v2926_v53 }
0x12c7   : > { %v2927_v58 = vmul.f32 %v3882_v49, %v2925_v55 }
0x12c8   : > { %v2930_v60 = vadd.f32 1.4214138, %v2928_v56 }
0x12c9   : > { %v2929_v61 = vadd.f32 1.4214138, %v2927_v58 }
0x12ca   : > { %v2932_v62 = vmul.f32 %v3880_v47, %v2930_v60 }
0x12cb   : > { %v2931_v57 = vmul.f32 %v3882_v49, %v2929_v61 }
0x12cc   : > { %v2934_v63 = vadd.f32 -0.28449672, %v2932_v62 }
0x12cd   : > { %v2933_v2 = vadd.f32 -0.28449672, %v2931_v57 }
0x12ce   : > { %v2936_v40 = vmul.f32 %v3880_v47, %v2934_v63 }
0x12cf   : > { %v2935_v3 = vmul.f32 %v3882_v49, %v2933_v2 }
0x12d0   : > { %v2938_v4 = vadd.f32 0.2548296, %v2936_v40 }
0x12d1   : > { %v2937_v5 = vadd.f32 0.2548296, %v2935_v3 }
0x12d2   : > { %v2940_v6 = vmul.f32 %v3880_v47, %v2938_v4 }
0x12d3   : > { %v2939_v8 = vmul.f32 %v3882_v49, %v2937_v5 }
0x12d4   : > { %v2950_v10 = vmul.f32 %v3884_v7, %v2940_v6 }
0x12d5   : > { %v2949_v11 = vmul.f32 %v3886_v9, %v2939_v8 }
0x12d6   : > { %v2952_v12 = vsub.f32 1.0, %v2950_v10 }
0x12d7   : > { %v2951_v15 = vsub.f32 1.0, %v2949_v11 }
0x12d8   : > { %v2954_v16 = vmul.f32 %v2952_v12, %v2912_v14 }
0x12d9   : > { %v2953_v17 = vmul.f32 %v2951_v15, %v2911_v59 }
0x12da   : > { %v2956_v18 = vadd.f32 1.0, %v2954_v16 }
0x12db   : > { %v2955_v20 = vadd.f32 1.0, %v2953_v17 }
0x12dc   : > { %v2958_v23 = vmul.f32 %v2956_v18, %v2906_v21 }
0x12dd   : > { %v2957_v22 = vmul.f32 %v2955_v20, %v2905_v19 }
0x12df   : > { %3645 = vmatprep.mubr.f32.mxu0 %v2957_v22 }
0x12e0   : > { %3646 = vmatmul.mubr.f32.vlgmr.msra.gmra.mrb[16].mxu0 %v2958_v23 }
0x13b3   : > { %v3647_v25 = vpop.f32.mrb[16].mxu0 }
0x13b4   : > { %v3054_v26 = vadd.f32 %v3647_v25, %v3249_v24  ;;  %v3048_v27 = vpop.f32.mrb[17].mxu0 }
0x13b5   : > { %v3049_v28 = vadd.f32 %v3249_v24, %v3048_v27 }
0x13b6   : > { %v3058_v29 = vadd.f32 %v3054_v26, %v4336_v34 }
0x13b7   : > { %v3057_v30 = vadd.f32 %v3049_v28, %v4339_v36 }
0x13b8   : > { %3060 = vst.msk [vmem:[%s548_s21 + $0x8] sm:$0xff] %vm553_vm0, %v3058_v29 }
0x13b9   : > { %3059 = vst.msk [vmem:[%s548_s21] sm:$0xff] %vm553_vm0, %v3057_v30 }
0x13ba PF: > { %s27_s24 = sadd.s32 1, %s3893_s24  }
0x13bb   : > { %p24_p4 = scmp.ge.s32.totalorder %s27_s24, 4  }
0x13bd   :  { %26 = sbr.rel (!%p24_p4) target bundleno = 3 (0x3), region = 139 }

// kernel: _lambda_.5
= control target key start
LH: loop header
LB: loop body
LE: loop exit
PB: predicated region body
PF: predicated region fallthrough
CT: control target
= control target key end

     0   :  { %s4065_s0 = inlined_call_operand.vmem [shape: f32[2,16,32], index: 0, kind: input, shape index: {}]   ;;  %s4066_s1 = inlined_call_operand.vmem [shape: f32[4,16], index: 1, kind: input, shape index: {}]   ;;  %s4067_s2 = inlined_call_operand.vmem [shape: f32[1,32], index: 2, kind: input, shape index: {}]   ;;  %s4068_s3 = inlined_call_operand.vmem [shape: f32[1,32], index: 3, kind: input, shape index: {}]   ;;  %s4069_s4 = inlined_call_operand.vmem [shape: f32[1,32], index: 4, kind: input, shape index: {}]   ;;  %s4070_s5 = inlined_call_operand.vmem [shape: f32[1,32], index: 5, kind: input, shape index: {}]   ;;  %s4071_s6 = inlined_call_operand.vmem [shape: f32[4,32,8], index: 6, kind: input, shape index: {}]   ;;  %s4072_s7 = inlined_call_operand.vmem [shape: f32[4,32,8], index: 7, kind: input, shape index: {}]   ;;  %s4073_s8 = inlined_call_operand.vmem [shape: f32[4,32,8], index: 8, kind: input, shape index: {}]   ;;  %s4074_s9 = inlined_call_operand.vmem [shape: f32[4,1,8], index: 9, kind: input, shape index: {}]   ;;  %s4075_s10 = inlined_call_operand.vmem [shape: f32[4,1,8], index: 10, kind: input, shape index: {}]   ;;  %s4076_s11 = inlined_call_operand.vmem [shape: f32[4,1,8], index: 11, kind: input, shape index: {}]   ;;  %s4077_s12 = inlined_call_operand.vmem [shape: f32[4,8,32], index: 12, kind: input, shape index: {}]   ;;  %s4078_s13 = inlined_call_operand.vmem [shape: f32[1,32], index: 13, kind: input, shape index: {}]   ;;  %s4079_s14 = inlined_call_operand.vmem [shape: f32[32,32], index: 14, kind: input, shape index: {}]   ;;  %s4080_s15 = inlined_call_operand.vmem [shape: f32[1,32], index: 15, kind: input, shape index: {}]   ;;  %s4081_s16 = inlined_call_operand.vmem [shape: f32[1,32], index: 16, kind: input, shape index: {}]   ;;  %s4082_s17 = inlined_call_operand.vmem [shape: f32[1,32], index: 17, kind: input, shape index: {}]   ;;  %s4083_s18 = inlined_call_operand.vmem [shape: f32[4,32], index: 18, kind: input, shape index: {}]   ;;  %s4084_s19 = inlined_call_operand.vmem [shape: f32[2,4,32], index: 19, kind: output, shape index: {}]  }
   0x1   :  { %4085 = sst [smem:[#allocation2_spill]] %s4065_s0  ;;  %s3656_s0 = smov 0  }
   0x2   :  { %4086 = sst [smem:[#allocation3_spill]] %s4066_s1 }
   0x3   :  { %4087 = sst [smem:[#allocation4_spill]] %s4067_s2 }
   0x4   :  { %4088 = sst [smem:[#allocation5_spill]] %s4068_s3 }
   0x5 LB: > { %s2930_s30 = sadd.s32 4294967295, %s3551_s0   ;;  %p2934_p0 = scmp.ge.s32.totalorder %s3551_s0, 1  ;;  %s3551_s0 = sphi %s3656_s0, %s29_s0  }
   0x6   : > { %p537_p1 = scmp.lt.s32.totalorder %s3551_s0, 3 }
   0x8   : > { %p538_p2 = pnand %p2934_p0, %p537_p1 }
   0x9   : > { %p592_p3 = scmp.lt.s32.totalorder (!%p538_p2), %s2930_s30, 1  ;;  %v3553_v0 = vmov (!%p538_p2), 0.0|0.0   ;;  %vm3554_vm0 = vmmov (!%p538_p2), 0   ;;  %v3555_v1 = vmov (!%p538_p2), 0.0   ;;  %vm711_vm1 = vcmask (!%p538_p2), 261120   ;;  %s4089_s22 = sld [smem:[#allocation2_spill]] (!%p538_p2) }
   0xa   : > { %541 = sbr.rel (%p538_p2) target bundleno = 4947 (0x1353), region = 96  ;;  %3385 = vmatprep.subr.bf16.mxu0 (!%p538_p2), %v3553_v0  ;;  %3163 = vmatprep.mubr.msk.f32.mxu0 (!%p538_p2), %vm3554_vm0, %v3555_v1  ;;  %s4090_s25 = sld [smem:[#allocation3_spill]] (!%p538_p2)  ;;  %vm604_vm2 = vcmask (!%p538_p2), 130048   ;;  %vm680_vm3 = vcmask (!%p538_p2), 257024   ;;  %v839_v21 = vld [vmem:[%s4072_s7] sm:$0xff] (!%p538_p2)  ;;  %v840_v22 = vld [vmem:[%s4072_s7 + $0x8] sm:$0xff] (!%p538_p2) }
   0xb   : > { %3388 = vmatprep.subr.bf16.mxu1 (!%p538_p2), %v3553_v0  ;;  %3174 = vmatprep.mubr.msk.f32.mxu1 (!%p538_p2), %vm3554_vm0, %v3555_v1  ;;  %v3394_v23 = vpack.c.bf16 (!%p538_p2), %v840_v22, %v839_v21  ;;  %v841_v24 = vld [vmem:[%s4072_s7 + $0x10] sm:$0xff] (!%p538_p2)  ;;  %v842_v25 = vld [vmem:[%s4072_s7 + $0x18] sm:$0xff] (!%p538_p2)  ;;  %v2941_v40 = vld [vmem:[%s4069_s4] ss:$0 sm:$0xff] (!%p538_p2)  ;;  %s4091_s3 = sld [smem:[#allocation4_spill]] (!%p538_p2)  ;;  %s4092_s28 = sld [smem:[#allocation5_spill]] (!%p538_p2) }
   0xc   : > { %v3398_v26 = vpack.c.bf16 (!%p538_p2), %v842_v25, %v841_v24  ;;  %v2942_v44 = vld [vmem:[%s4070_s5] ss:$0 sm:$0xff] (!%p538_p2)  ;;  %v756_v49 = vld [vmem:[%s4071_s6 + $0x8] sm:$0xff] (!%p538_p2)  ;;  %v757_v51 = vld [vmem:[%s4071_s6 + $0x10] sm:$0xff] (!%p538_p2)  ;;  %vm1017_vm4 = vcmask (!%p538_p2), 64512   ;;  %vm1098_vm6 = vcmask (!%p538_p2), 125952  }
   0xd   : > { %v755_v48 = vld [vmem:[%s4071_s6] sm:$0xff] (!%p538_p2)  ;;  %v758_v52 = vld [vmem:[%s4071_s6 + $0x18] sm:$0xff] (!%p538_p2)  ;;  %v932_v55 = vld [vmem:[%s4073_s8 + $0x8] sm:$0xff] (!%p538_p2) }
   0xe   : > { %v3389_v50 = vpack.c.bf16 (!%p538_p2), %v756_v49, %v755_v48  ;;  %v3392_v53 = vpack.c.bf16 (!%p538_p2), %v758_v52, %v757_v51  ;;  %v931_v54 = vld [vmem:[%s4073_s8] sm:$0xff] (!%p538_p2)  ;;  %vm3762_vm5 = vmpackc.low (!%p538_p2), %vm1017_vm4, %vm1017_vm4  ;;  %v2957_v21 = vld [vmem:[%s4071_s6 + $0x30] sm:$0xff] (!%p538_p2) }
   0xf   : > { %v3402_v56 = vpack.c.bf16 (!%p538_p2), %v932_v55, %v931_v54  ;;  %v2958_v22 = vld [vmem:[%s4071_s6 + $0x38] sm:$0xff] (!%p538_p2)  ;;  %v2971_v24 = vld [vmem:[%s4073_s8 + $0x28] sm:$0xff] (!%p538_p2)  ;;  %v2962_v55 = vld [vmem:[%s4072_s7 + $0x20] sm:$0xff] (!%p538_p2) }
  0x10   : > { %v603_v6 = vld [vmem:[%s4090_s25] sm:$0xf] (!%p538_p2)  ;;  %3390 = vmatpush3.bf16.msra.mxu1 (!%p538_p2), %v3389_v50  ;;  %v3421_v25 = vpack.c.bf16 (!%p538_p2), %v2958_v22, %v2957_v21 }
  0x11   : > { %s4096_s30 = smov (!%p592_p3, %s2930_s30), 1  ;;  %3391 = vmatprep.subr.bf16.mxu1 %v3553_v0  ;;  %v2939_v61 = vld [vmem:[%s4091_s3] ss:$0 sm:$0xff] }
  0x12   : > { %s3050_s20 = sshll.u32 %s4096_s30, 4  ;;  %v2940_v63 = vld [vmem:[%s4092_s28] ss:$0 sm:$0xff]  ;;  %s2937_s24 = sshll.u32 %s4096_s30, 2 }
  0x13   : > { %s596_s2 = scalar_lea.vmem %s4089_s22, %s3050_s20  ;;  %s600_s28 = scalar_lea.vmem %s4084_s19, %s2937_s24 }
  0x14   : > { %v601_v2 = vld [vmem:[%s596_s2] sm:$0xff]  ;;  %v602_v3 = vld [vmem:[%s596_s2 + $0x8] sm:$0xff]  ;;  %3393 = vmatpush3.bf16.msra.mxu1 %v3392_v53 }
  0x15   : > { %v3386_v4 = vpack.c.bf16 %v602_v3, %v601_v2  ;;  %v712_v5 = vsel %vm711_vm1, %v601_v2, 0.0  ;;  %v715_v7 = vsel %vm711_vm1, %v602_v3, 0.0  ;;  %3403 = vmatprep.subr.bf16.mxu1 %v3402_v56 }
  0x16   : > { %713 = vadd.xlane.f32.xlu0 %v712_v5 }
  0x17   : > { %3387 = vmatpush3.bf16.msra.mxu0 %v3386_v4 }
  0x18   : > { %3395 = vmatprep.subr.bf16.mxu0 %v3394_v23 }
  0x1a   : > { %3164 = vmatmul.mubr.msk.f32.vlgmr.msra.gmra.mrb[0].mxu0 %vm604_vm2, %v603_v6  ;;  %716 = vadd.xlane.f32.xlu0 %v715_v7  ;;  %v2945_v7 = vld [vmem:[%s4075_s10] ss:$0 sm:$0xff] }
  0x1b   : > { %3397 = vmatpush3.bf16.msra.mxu0 %v3394_v23  ;;  %v2970_v23 = vld [vmem:[%s4073_s8 + $0x20] sm:$0xff] }
  0x1c   : > { %3399 = vmatprep.subr.bf16.mxu0 %v3398_v26 }
  0x1f   : > { %3401 = vmatpush3.bf16.msra.mxu0 %v3398_v26  ;;  %v3431_v26 = vpack.c.bf16 %v2971_v24, %v2970_v23  ;;  %v2982_v23 = vld [vmem:[%s4077_s12 + $0x8] sm:$0xff] }
  0x20   : > { %3410 = vmatprep.subr.bf16.mxu0 %v3553_v0 }
  0xa3   : > { %v714_v8 = vpop.xlane.xlu0 %713 }
  0xa4   : > { %v718_v14 = vmul.f32 0.03125, %v714_v8 }
  0xa6   : > { %v720_v15 = vsub.f32 %v601_v2, %v718_v14  ;;  %v933_v2 = vld [vmem:[%s4073_s8 + $0x10] sm:$0xff]  ;;  %v2955_v14 = vld [vmem:[%s4071_s6 + $0x20] sm:$0xff] }
  0xa7   : > { %v717_v9 = vpop.xlane.xlu0 %716 }
  0xa8   : > { %v719_v10 = vmul.f32 0.03125, %v717_v9  ;;  %v722_v16 = vmul.f32 %v720_v15, %v720_v15 }
  0xaa   : > { %v721_v11 = vsub.f32 %v602_v3, %v719_v10  ;;  %v724_v20 = vsel %vm711_vm1, %v722_v16, 0.0  ;;  %v934_v3 = vld [vmem:[%s4073_s8 + $0x18] sm:$0xff]  ;;  %v2943_v16 = vld [vmem:[%s4074_s9] ss:$0 sm:$0xff] }
  0xab   : > { %v3406_v6 = vpack.c.bf16 %v934_v3, %v933_v2 }
  0xac   : > { %v723_v12 = vmul.f32 %v721_v11, %v721_v11 }
  0xae   : > { %v727_v13 = vsel %vm711_vm1, %v723_v12, 0.0 }
  0xaf   : > { %728 = vadd.xlane.f32.xlu0 %v727_v13 }
  0xed   : > { %v674_v17 = vpop.f32.mrb[0].mxu0 }
  0xee   : > { %v3165_v18 = vpop.f32.mrb[1].mxu0  ;;  %v681_v19 = vsel %vm680_vm3, %v674_v17, 0.0 }
  0xef   : > { %682 = vadd.xlane.f32.xlu1 %v681_v19 }
  0xf3   : > { %725 = vadd.xlane.f32.xlu1 %v724_v20 }
 0x13c   : > { %v729_v27 = vpop.xlane.xlu0 %728 }
 0x13d   : > { %v731_v28 = vmul.f32 0.03125, %v729_v27  ;;  %v2948_v27 = vld [vmem:[%s4076_s11] ss:$0 sm:$0xff] }
 0x13f   : > { %v733_v29 = vadd.f32 1e-05, %v731_v28  ;;  %v2972_v28 = vld [vmem:[%s4073_s8 + $0x30] sm:$0xff] }
 0x141   : > { %3521 = vrsqrt.f32 %v733_v29  ;;  %v2973_v29 = vld [vmem:[%s4073_s8 + $0x38] sm:$0xff] }
 0x14b   : > { %v3522_v38 = vpop.eup %3521 }
 0x14c   : > { %v737_v39 = vmul.f32 %v3522_v38, %v721_v11 }
 0x14e   : > { %v745_v43 = vmul.f32 %v2941_v40, %v737_v39 }
 0x150   : > { %v3707_v47 = vadd.f32 %v2942_v44, %v745_v43 }
 0x17c   : > { %v683_v30 = vpop.xlane.xlu1 %682 }
 0x17d   : > { %v685_v31 = vmul.f32 0.03125, %v683_v30 }
 0x17f   : > { %v686_v32 = vsub.f32 %v674_v17, %v685_v31 }
 0x180   : > { %v726_v33 = vpop.xlane.xlu1 %725 }
 0x181   : > { %v730_v34 = vmul.f32 0.03125, %v726_v33  ;;  %v687_v35 = vmul.f32 %v686_v32, %v686_v32  ;;  %v3435_v33 = vpack.c.bf16 %v2973_v29, %v2972_v28  ;;  %v1183_v29 = vld [vmem:[%s4077_s12] sm:$0xff] }
 0x183   : > { %v732_v36 = vadd.f32 1e-05, %v730_v34  ;;  %v688_v37 = vsel %vm680_vm3, %v687_v35, 0.0 }
 0x184   : > { %689 = vadd.xlane.f32.xlu1 %v688_v37 }
 0x185   : > { %3523 = vrsqrt.f32 %v732_v36 }
 0x18f   : > { %v3524_v41 = vpop.eup %3523 }
 0x190   : > { %v736_v42 = vmul.f32 %v3524_v41, %v720_v15  ;;  %v2956_v15 = vld [vmem:[%s4071_s6 + $0x28] sm:$0xff] }
 0x191   : > { %v3418_v18 = vpack.c.bf16 %v2956_v15, %v2955_v14 }
 0x192   : > { %v744_v45 = vmul.f32 %v2941_v40, %v736_v42  ;;  %v2975_v42 = vld [vmem:[%s4076_s11 + $0x1] ss:$0 sm:$0xff] }
 0x194   : > { %v3705_v46 = vadd.f32 %v2942_v44, %v744_v45 }
 0x196   : > { %3185 = vmatprep.mubr.msk.f32.mxu0 %vm711_vm1, %v3705_v46 }
 0x197   : > { %3186 = vmatmul.mubr.msk.f32.vlgmr.msra.gmra.mrb[2].mxu0 %vm711_vm1, %v3707_v47 }
 0x198   : > { %3203 = vmatprep.mubr.msk.f32.mxu0 %vm3554_vm0, %v3555_v1 }
 0x211   : > { %v690_v57 = vpop.xlane.xlu1 %689 }
 0x212   : > { %v691_v58 = vmul.f32 0.03125, %v690_v57 }
 0x214   : > { %v692_v59 = vadd.f32 1e-05, %v691_v58 }
 0x216   : > { %3525 = vrsqrt.f32 %v692_v59  ;;  %v2964_v59 = vld [vmem:[%s4072_s7 + $0x30] sm:$0xff] }
 0x220   : > { %v3526_v60 = vpop.eup %3525 }
 0x221   : > { %v694_v62 = vmul.f32 %v3526_v60, %v686_v32  ;;  %v2965_v60 = vld [vmem:[%s4072_s7 + $0x38] sm:$0xff] }
 0x223   : > { %v701_v4 = vmul.f32 %v2939_v61, %v694_v62 }
 0x225   : > { %v3746_v5 = vadd.f32 %v2940_v63, %v701_v4  ;;  %v3427_v63 = vpack.c.bf16 %v2965_v60, %v2964_v59  ;;  %v2967_v4 = vld [vmem:[%s4075_s10 + $0x1] ss:$0 sm:$0xff] }
 0x227   : > { %3175 = vmatmul.mubr.msk.f32.vlgmr.msra.gmra.mrb[0].mxu1 %vm711_vm1, %v3746_v5 }
 0x228   : > { %3405 = vmatpush3.bf16.msra.mxu1 %v3402_v56  ;;  %3196 = vmatprep.mubr.msk.f32.mxu1 %vm711_vm1, %v3705_v46  ;;  %v2963_v56 = vld [vmem:[%s4072_s7 + $0x28] sm:$0xff] }
 0x229   : > { %3407 = vmatprep.subr.bf16.mxu1 %v3406_v6  ;;  %v3423_v57 = vpack.c.bf16 %v2963_v56, %v2962_v55 }
 0x22c   : > { %3409 = vmatpush3.bf16.msra.mxu1 %v3406_v6 }
 0x22d   : > { %3414 = vmatprep.subr.bf16.mxu1 %v3553_v0 }
 0x22f   : > { %3197 = vmatmul.mubr.msk.f32.vlgmr.msra.gmra.mrb[2].mxu1 %vm711_vm1, %v3707_v47 }
 0x230   : > { %3210 = vmatprep.mubr.msk.f32.mxu1 %vm3554_vm0, %v3555_v1 }
 0x26a   : > { %v3187_v8 = vpop.f32.mrb[2].mxu0 }
 0x26b   : > { %v928_v9 = vadd.f32 %v3187_v8, %v2945_v7  ;;  %v922_v10 = vpop.f32.mrb[3].mxu0 }
 0x26c   : > { %v923_v11 = vadd.f32 %v2945_v7, %v922_v10 }
 0x26e   : > { %v3411_v13 = vpack.c.bf16 %v928_v9, %v923_v11  ;;  %v2960_v11 = vld [vmem:[%s4074_s9 + $0x1] ss:$0 sm:$0xff] }
 0x270   : > { %3413 = vmatpush3.bf16.xpose.msk.msra.mxu0 %vm3762_vm5, %v3411_v13 }
 0x271   : > { %3417 = vmatprep.subr.bf16.mxu0 %v3553_v0 }
 0x2fa   : > { %v835_v17 = vpop.f32.mrb[0].mxu1 }
 0x2fb   : > { %v836_v19 = vadd.f32 %v2943_v16, %v835_v17  ;;  %v3176_v20 = vpop.f32.mrb[1].mxu1 }
 0x2fd   : > { %3204 = vmatmul.mubr.msk.f32.vlgmr.msra.gmra.mrb[4].mxu0 %vm1017_vm4, %v836_v19 }
 0x2fe   : > { %3419 = vmatpush3.bf16.msra.mxu0 %v3418_v18  ;;  %3221 = vmatprep.mubr.msk.f32.mxu0 %vm3554_vm0, %v3555_v1 }
 0x2ff   : > { %3420 = vmatprep.subr.bf16.mxu0 %v3553_v0 }
 0x302   : > { %v3198_v30 = vpop.f32.mrb[2].mxu1  ;;  %3422 = vmatpush3.bf16.msra.mxu0 %v3421_v25  ;;  %v2992_v25 = vld [vmem:[%s4072_s7 + $0x40] sm:$0xff] }
 0x303   : > { %v1014_v31 = vadd.f32 %v3198_v30, %v2948_v27  ;;  %v1008_v32 = vpop.f32.mrb[3].mxu1  ;;  %3432 = vmatprep.subr.bf16.mxu0 %v3431_v26 }
 0x304   : > { %v1009_v34 = vadd.f32 %v2948_v27, %v1008_v32  ;;  %v2995_v32 = vld [vmem:[%s4072_s7 + $0x58] sm:$0xff] }
 0x305   : > { %3222 = vmatmul.mubr.msk.f32.vlgmr.msra.gmra.mrb[6].mxu0 %vm711_vm1, %v3746_v5 }
 0x306   : > { %v3415_v35 = vpack.c.bf16 %v1014_v31, %v1009_v34  ;;  %3434 = vmatpush3.bf16.msra.mxu0 %v3431_v26  ;;  %3243 = vmatprep.mubr.msk.f32.mxu0 %vm711_vm1, %v3705_v46  ;;  %v2993_v26 = vld [vmem:[%s4072_s7 + $0x48] sm:$0xff]  ;;  %v2994_v31 = vld [vmem:[%s4072_s7 + $0x50] sm:$0xff]  ;;  %v2985_v34 = vld [vmem:[%s4071_s6 + $0x40] sm:$0xff] }
 0x307   : > { %3436 = vmatprep.subr.bf16.mxu0 %v3435_v33  ;;  %v3452_v30 = vpack.c.bf16 %v2993_v26, %v2992_v25 }
 0x308   : > { %3416 = vmatpush3.bf16.msra.mxu1 %v3415_v35  ;;  %v2986_v35 = vld [vmem:[%s4071_s6 + $0x48] sm:$0xff] }
 0x309   : > { %3424 = vmatprep.subr.bf16.mxu1 %v3423_v57 }
 0x30a   : > { %3438 = vmatpush3.bf16.msra.mxu0 %v3435_v33  ;;  %v3456_v33 = vpack.c.bf16 %v2995_v32, %v2994_v31 }
 0x30b   : > { %3443 = vmatprep.subr.bf16.mxu0 %v3553_v0 }
 0x30d   : > { %3244 = vmatmul.mubr.msk.f32.vlgmr.msra.gmra.mrb[8].mxu0 %vm711_vm1, %v3707_v47 }
 0x30e   : > { %3257 = vmatprep.mubr.msk.f32.mxu0 %vm3554_vm0, %v3555_v1 }
 0x3d0   : > { %v1093_v36 = vpop.f32.mrb[4].mxu0 }
 0x3d1   : > { %v1097_v37 = vmul.f32 0.35355338, %v1093_v36  ;;  %v3205_v38 = vpop.f32.mrb[5].mxu0  ;;  %v3447_v36 = vpack.c.bf16 %v2986_v35, %v2985_v34  ;;  %v3032_v34 = vld [vmem:[%s4073_s8 + $0x78] sm:$0xff] }
 0x3d2   : > { %v2988_v38 = vld [vmem:[%s4071_s6 + $0x58] sm:$0xff] }
 0x3d3   : > { %v1099_v39 = vsel %vm1098_vm6, %v1097_v37, -inf }
 0x3d4   : > { %1100 = vmax.xlane.f32.xlu0 %v1099_v39 }
 0x3d8   : > { %v1263_v40 = vpop.f32.mrb[6].mxu0 }
 0x3d9   : > { %v3223_v41 = vpop.f32.mrb[7].mxu0  ;;  %v1264_v13 = vadd.f32 %v2960_v11, %v1263_v40  ;;  %v3000_v40 = vld [vmem:[%s4073_s8 + $0x40] sm:$0xff] }
 0x3da   : > { %v3001_v41 = vld [vmem:[%s4073_s8 + $0x48] sm:$0xff] }
 0x3e0   : > { %v3245_v43 = vpop.f32.mrb[8].mxu0 }
 0x3e1   : > { %v1440_v44 = vadd.f32 %v3245_v43, %v2975_v42  ;;  %v1434_v45 = vpop.f32.mrb[9].mxu0 }
 0x3e2   : > { %v1435_v48 = vadd.f32 %v2975_v42, %v1434_v45 }
 0x3e4   : > { %v3444_v49 = vpack.c.bf16 %v1440_v44, %v1435_v48  ;;  %v3460_v44 = vpack.c.bf16 %v3001_v41, %v3000_v40  ;;  %v3002_v48 = vld [vmem:[%s4073_s8 + $0x50] sm:$0xff]  ;;  %v3024_v40 = vld [vmem:[%s4072_s7 + $0x78] sm:$0xff] }
 0x3e6   : > { %3445 = vmatpush3.bf16.msra.mxu0 %v3444_v49  ;;  %v3003_v49 = vld [vmem:[%s4073_s8 + $0x58] sm:$0xff] }
 0x3e7   : > { %3265 = vmatprep.subr.mxu0 %v3555_v1 }
 0x461   : > { %v1101_v50 = vpop.xlane.xlu0 %1100 }
 0x462   : > { %v1102_v51 = vsub.f32 %v1097_v37, %v1101_v50  ;;  %v2987_v37 = vld [vmem:[%s4071_s6 + $0x50] sm:$0xff] }
 0x463   : > { %v3450_v43 = vpack.c.bf16 %v2988_v38, %v2987_v37  ;;  %v3022_v37 = vld [vmem:[%s4072_s7 + $0x68] sm:$0xff] }
 0x464   : > { %v1103_v52 = vmul.f32 1.442695, %v1102_v51  ;;  %v3464_v51 = vpack.c.bf16 %v3003_v49, %v3002_v48  ;;  %v3034_v48 = vld [vmem:[%s4076_s11 + $0x3] ss:$0 sm:$0xff] }
 0x466   : > { %3527 = vpow2.f32 %v1103_v52  ;;  %v2997_v52 = vld [vmem:[%s4075_s10 + $0x2] ss:$0 sm:$0xff] }
 0x470   : > { %v3528_v53 = vpop.eup %3527 }
 0x471   : > { %v1105_v54 = vsel %vm1098_vm6, %v3528_v53, 0.0 }
 0x472   : > { %1106 = vadd.xlane.f32.xlu1 %v1105_v54 }
 0x4ff   : > { %v1107_v58 = vpop.xlane.xlu1 %1106 }
 0x500   : > { %3529 = vrcp.f32 %v1107_v58 }
 0x50a   : > { %v3530_v61 = vpop.eup %3529 }
 0x50b   : > { %v1109_v62 = vmul.f32 %v3530_v61, %v3528_v53  ;;  %v2990_v61 = vld [vmem:[%s4074_s9 + $0x2] ss:$0 sm:$0xff] }
 0x50d   : > { %3211 = vmatmul.mubr.msk.f32.vlgmr.msra.gmra.mrb[4].mxu1 %vm604_vm2, %v1109_v62 }
 0x50e   : > { %3426 = vmatpush3.bf16.msra.mxu1 %v3423_v57  ;;  %3232 = vmatprep.mubr.msk.f32.mxu1 %vm711_vm1, %v3705_v46 }
 0x50f   : > { %3428 = vmatprep.subr.bf16.mxu1 %v3427_v63 }
 0x512   : > { %3430 = vmatpush3.bf16.msra.mxu1 %v3427_v63 }
 0x513   : > { %3439 = vmatprep.subr.bf16.mxu1 %v3553_v0 }
 0x515   : > { %3233 = vmatmul.mubr.msk.f32.vlgmr.msra.gmra.mrb[6].mxu1 %vm711_vm1, %v3707_v47 }
 0x516   : > { %3250 = vmatprep.mubr.msk.f32.mxu1 %vm3554_vm0, %v3555_v1 }
 0x5e0   : > { %v1179_v2 = vpop.f32.mrb[4].mxu1 }
 0x5e1   : > { %v3212_v3 = vpop.f32.mrb[5].mxu1 }
 0x5e2   : > { %v3005_v3 = vld [vmem:[%s4076_s11 + $0x2] ss:$0 sm:$0xff] }
 0x5e8   : > { %v3234_v6 = vpop.f32.mrb[6].mxu1 }
 0x5e9   : > { %v1352_v7 = vadd.f32 %v3234_v6, %v2967_v4  ;;  %v1346_v8 = vpop.f32.mrb[7].mxu1 }
 0x5ea   : > { %v1347_v9 = vadd.f32 %v2967_v4, %v1346_v8 }
 0x5ec   : > { %v3440_v10 = vpack.c.bf16 %v1352_v7, %v1347_v9 }
 0x5ee   : > { %3442 = vmatpush3.bf16.xpose.msk.msra.mxu1 %vm3762_vm5, %v3440_v10 }
 0x5ef   : > { %3260 = vmatprep.subr.mxu1 %v3555_v1 }
 0x5f5   : > { %3251 = vmatmul.mubr.msk.f32.vlgmr.msra.gmra.mrb[8].mxu1 %vm1017_vm4, %v1264_v13 }
 0x5f6   : > { %3262 = vmatprep.mubr.msk.f32.mxu1 %vm3554_vm0, %v3555_v1  ;;  %3261 = vmatpush3.msra.mxu1 %v2982_v23  ;;  %v3015_v23 = vld [vmem:[%s4071_s6 + $0x68] sm:$0xff] }
 0x5f7   : > { %3446 = vmatprep.subr.bf16.mxu1 %v3553_v0 }
 0x6c8   : > { %v1518_v14 = vpop.f32.mrb[8].mxu1 }
 0x6c9   : > { %v1522_v15 = vmul.f32 0.35355338, %v1518_v14  ;;  %v3252_v16 = vpop.f32.mrb[9].mxu1 }
 0x6cb   : > { %v1523_v17 = vsel %vm1098_vm6, %v1522_v15, -inf }
 0x6cc   : > { %1524 = vmax.xlane.f32.xlu0 %v1523_v17 }
 0x759   : > { %v1525_v18 = vpop.xlane.xlu0 %1524 }
 0x75a   : > { %v1526_v19 = vsub.f32 %v1522_v15, %v1525_v18 }
 0x75c   : > { %v1527_v20 = vmul.f32 1.442695, %v1526_v19 }
 0x75e   : > { %3531 = vpow2.f32 %v1527_v20  ;;  %v3012_v20 = vld [vmem:[%s4077_s12 + $0x10] sm:$0xff] }
 0x768   : > { %v3532_v21 = vpop.eup %3531 }
 0x769   : > { %v1529_v22 = vsel %vm1098_vm6, %v3532_v21, 0.0 }
 0x76a   : > { %1530 = vadd.xlane.f32.xlu1 %v1529_v22  ;;  %v3014_v22 = vld [vmem:[%s4071_s6 + $0x60] sm:$0xff] }
 0x76b   : > { %v3476_v25 = vpack.c.bf16 %v3015_v23, %v3014_v22  ;;  %v3043_v22 = vld [vmem:[%s4078_s13] ss:$0 sm:$0xff] }
 0x7f7   : > { %v1531_v24 = vpop.xlane.xlu1 %1530 }
 0x7f8   : > { %3533 = vrcp.f32 %v1531_v24 }
 0x802   : > { %v3534_v27 = vpop.eup %3533 }
 0x803   : > { %v1533_v28 = vmul.f32 %v3534_v27, %v3532_v21  ;;  %v3016_v27 = vld [vmem:[%s4071_s6 + $0x70] sm:$0xff] }
 0x805   : > { %3258 = vmatmul.mubr.msk.f32.vlgmr.msra.gmra.mrb[10].mxu0 %vm604_vm2, %v1533_v28  ;;  %v3017_v28 = vld [vmem:[%s4071_s6 + $0x78] sm:$0xff] }
 0x806   : > { %3266 = vmatpush3.msra.mxu0 %v1183_v29  ;;  %3267 = vmatprep.mubr.msk.f32.mxu0 %vm3554_vm0, %v3555_v1  ;;  %v3029_v29 = vld [vmem:[%s4073_s8 + $0x60] sm:$0xff]  ;;  %v3479_v31 = vpack.c.bf16 %v3017_v28, %v3016_v27 }
 0x807   : > { %3453 = vmatprep.subr.bf16.mxu0 %v3452_v30 }
 0x809   : > { %3268 = vmatmul.mubr.msk.f32.vlgmr.msra.gmra.mrb[12].mxu0 %vm1017_vm4, %v1179_v2 }
 0x80a   : > { %3455 = vmatpush3.bf16.msra.mxu0 %v3452_v30  ;;  %3289 = vmatprep.mubr.msk.f32.mxu0 %vm711_vm1, %v3705_v46  ;;  %v3030_v30 = vld [vmem:[%s4073_s8 + $0x68] sm:$0xff] }
 0x80b   : > { %3457 = vmatprep.subr.bf16.mxu0 %v3456_v33  ;;  %v3489_v32 = vpack.c.bf16 %v3030_v30, %v3029_v29 }
 0x80e   : > { %3459 = vmatpush3.bf16.msra.mxu0 %v3456_v33  ;;  %v3031_v33 = vld [vmem:[%s4073_s8 + $0x70] sm:$0xff] }
 0x80f   : > { %3468 = vmatprep.subr.bf16.mxu0 %v3553_v0  ;;  %v3493_v35 = vpack.c.bf16 %v3032_v34, %v3031_v33 }
 0x811   : > { %3290 = vmatmul.mubr.msk.f32.vlgmr.msra.gmra.mrb[14].mxu0 %vm711_vm1, %v3707_v47 }
 0x812   : > { %3307 = vmatprep.mubr.msk.f32.mxu0 %vm3554_vm0, %v3555_v1 }
 0x8d8   : > { %v1603_v39 = vpop.f32.mrb[10].mxu0 }
 0x8d9   : > { %v3259_v42 = vpop.f32.mrb[11].mxu0  ;;  %3263 = vmatmul.mubr.msk.f32.vlgmr.msra.gmra.mrb[10].mxu1 %vm1017_vm4, %v1603_v39  ;;  %v3023_v39 = vld [vmem:[%s4072_s7 + $0x70] sm:$0xff] }
 0x8da   : > { %3448 = vmatpush3.bf16.msra.mxu1 %v3447_v36  ;;  %3278 = vmatprep.mubr.msk.f32.mxu1 %vm3554_vm0, %v3555_v1  ;;  %v3021_v36 = vld [vmem:[%s4072_s7 + $0x60] sm:$0xff]  ;;  %v3485_v41 = vpack.c.bf16 %v3024_v40, %v3023_v39 }
 0x8db   : > { %3449 = vmatprep.subr.bf16.mxu1 %v3553_v0  ;;  %v3481_v38 = vpack.c.bf16 %v3022_v37, %v3021_v36 }
 0x8dc   : > { %v1751_v45 = vpop.f32.mrb[12].mxu0 }
 0x8dd   : > { %v3269_v50 = vpop.f32.mrb[13].mxu0 }
 0x8de   : > { %3451 = vmatpush3.bf16.msra.mxu1 %v3450_v43 }
 0x8df   : > { %3461 = vmatprep.subr.bf16.mxu1 %v3460_v44 }
 0x8e1   : > { %3279 = vmatmul.mubr.msk.f32.vlgmr.msra.gmra.mrb[12].mxu1 %vm711_vm1, %v3746_v5 }
 0x8e2   : > { %3463 = vmatpush3.bf16.msra.mxu1 %v3460_v44  ;;  %3300 = vmatprep.mubr.msk.f32.mxu1 %vm711_vm1, %v3705_v46 }
 0x8e3   : > { %3465 = vmatprep.subr.bf16.mxu1 %v3464_v51 }
 0x8e4   : > { %v3291_v53 = vpop.f32.mrb[14].mxu0 }
 0x8e5   : > { %v1923_v54 = vadd.f32 %v3291_v53, %v2997_v52  ;;  %v1917_v55 = vpop.f32.mrb[15].mxu0 }
 0x8e6   : > { %v1918_v56 = vadd.f32 %v2997_v52, %v1917_v55  ;;  %3467 = vmatpush3.bf16.msra.mxu1 %v3464_v51 }
 0x8e7   : > { %3472 = vmatprep.subr.bf16.mxu1 %v3553_v0 }
 0x8e8   : > { %v3469_v57 = vpack.c.bf16 %v1923_v54, %v1918_v56 }
 0x8e9   : > { %3301 = vmatmul.mubr.msk.f32.vlgmr.msra.gmra.mrb[14].mxu1 %vm711_vm1, %v3707_v47 }
 0x8ea   : > { %3471 = vmatpush3.bf16.xpose.msk.msra.mxu0 %vm3762_vm5, %v3469_v57  ;;  %3314 = vmatprep.mubr.msk.f32.mxu1 %vm3554_vm0, %v3555_v1 }
 0x8eb   : > { %3317 = vmatprep.subr.mxu0 %v3555_v1 }
 0x9ac   : > { %v1678_v58 = vpop.f32.mrb[10].mxu1 }
 0x9ad   : > { %v3925_v59 = vadd.f32 %v1751_v45, %v1678_v58  ;;  %v3264_v60 = vpop.f32.mrb[11].mxu1 }
 0x9b4   : > { %v1834_v62 = vpop.f32.mrb[12].mxu1 }
 0x9b5   : > { %v1835_v63 = vadd.f32 %v2990_v61, %v1834_v62  ;;  %v3280_v2 = vpop.f32.mrb[13].mxu1  ;;  %v3019_v62 = vld [vmem:[%s4074_s9 + $0x3] ss:$0 sm:$0xff] }
 0x9b7   : > { %3308 = vmatmul.mubr.msk.f32.vlgmr.msra.gmra.mrb[16].mxu0 %vm1017_vm4, %v1835_v63 }
 0x9b8   : > { %3319 = vmatprep.mubr.msk.f32.mxu0 %vm3554_vm0, %v3555_v1  ;;  %3318 = vmatpush3.msra.mxu0 %v3012_v20  ;;  %v2763_v20 = vld [vmem:[%s4079_s14 + $0x18] sm:$0xff] }
 0x9b9   : > { %3482 = vmatprep.subr.bf16.mxu0 %v3481_v38 }
 0x9bc   : > { %v3302_v4 = vpop.f32.mrb[14].mxu1 }
 0x9bd   : > { %v2011_v6 = vadd.f32 %v3302_v4, %v3005_v3  ;;  %v2005_v7 = vpop.f32.mrb[15].mxu1 }
 0x9be   : > { %v2006_v8 = vadd.f32 %v3005_v3, %v2005_v7 }
 0x9c0   : > { %v3473_v9 = vpack.c.bf16 %v2011_v6, %v2006_v8 }
 0x9c2   : > { %3474 = vmatpush3.bf16.msra.mxu1 %v3473_v9 }
 0x9c3   : > { %3475 = vmatprep.subr.bf16.mxu1 %v3553_v0 }
 0xa8a   : > { %v2089_v10 = vpop.f32.mrb[16].mxu0 }
 0xa8b   : > { %v2093_v11 = vmul.f32 0.35355338, %v2089_v10  ;;  %v3309_v13 = vpop.f32.mrb[17].mxu0  ;;  %v3041_v10 = vld [vmem:[%s4077_s12 + $0x18] sm:$0xff] }
 0xa8d   : > { %v2094_v14 = vsel %vm1098_vm6, %v2093_v11, -inf }
 0xa8e   : > { %2095 = vmax.xlane.f32.xlu0 %v2094_v14 }
 0xb1b   : > { %v2096_v15 = vpop.xlane.xlu0 %2095 }
 0xb1c   : > { %v2097_v16 = vsub.f32 %v2093_v11, %v2096_v15  ;;  %v2760_v15 = vld [vmem:[%s4079_s14] sm:$0xff] }
 0xb1e   : > { %v2098_v17 = vmul.f32 1.442695, %v2097_v16  ;;  %v2761_v16 = vld [vmem:[%s4079_s14 + $0x8] sm:$0xff] }
 0xb20   : > { %3535 = vpow2.f32 %v2098_v17  ;;  %v3505_v17 = vpack.c.bf16 %v2761_v16, %v2760_v15 }
 0xb2a   : > { %v3536_v18 = vpop.eup %3535 }
 0xb2b   : > { %v2100_v19 = vsel %vm1098_vm6, %v3536_v18, 0.0 }
 0xb2c   : > { %2101 = vadd.xlane.f32.xlu1 %v2100_v19 }
 0xbb9   : > { %v2102_v21 = vpop.xlane.xlu1 %2101 }
 0xbba   : > { %3537 = vrcp.f32 %v2102_v21 }
 0xbc4   : > { %v3538_v24 = vpop.eup %3537 }
 0xbc5   : > { %v2104_v26 = vmul.f32 %v3538_v24, %v3536_v18 }
 0xbc7   : > { %3315 = vmatmul.mubr.msk.f32.vlgmr.msra.gmra.mrb[16].mxu1 %vm604_vm2, %v2104_v26  ;;  %v3044_v26 = vld [vmem:[%s4080_s15] ss:$0 sm:$0xff] }
 0xbc8   : > { %3477 = vmatpush3.bf16.msra.mxu1 %v3476_v25  ;;  %3330 = vmatprep.mubr.msk.f32.mxu1 %vm3554_vm0, %v3555_v1 }
 0xbc9   : > { %3478 = vmatprep.subr.bf16.mxu1 %v3553_v0 }
 0xbcc   : > { %3480 = vmatpush3.bf16.msra.mxu1 %v3479_v31 }
 0xbcd   : > { %3490 = vmatprep.subr.bf16.mxu1 %v3489_v32 }
 0xbcf   : > { %3331 = vmatmul.mubr.msk.f32.vlgmr.msra.gmra.mrb[18].mxu1 %vm711_vm1, %v3746_v5 }
 0xbd0   : > { %3492 = vmatpush3.bf16.msra.mxu1 %v3489_v32  ;;  %3352 = vmatprep.mubr.msk.f32.mxu1 %vm711_vm1, %v3705_v46 }
 0xbd1   : > { %3494 = vmatprep.subr.bf16.mxu1 %v3493_v35 }
 0xbd4   : > { %3496 = vmatpush3.bf16.msra.mxu1 %v3493_v35 }
 0xbd5   : > { %3501 = vmatprep.subr.bf16.mxu1 %v3553_v0 }
 0xbd7   : > { %3353 = vmatmul.mubr.msk.f32.vlgmr.msra.gmra.mrb[20].mxu1 %vm711_vm1, %v3707_v47 }
 0xbd8   : > { %3366 = vmatprep.mubr.msk.f32.mxu1 %vm3554_vm0, %v3555_v1 }
 0xc9a   : > { %v2174_v42 = vpop.f32.mrb[16].mxu1 }
 0xc9b   : > { %v3316_v43 = vpop.f32.mrb[17].mxu1  ;;  %3320 = vmatmul.mubr.msk.f32.vlgmr.msra.gmra.mrb[18].mxu0 %vm1017_vm4, %v2174_v42  ;;  %v3047_v42 = vld [vmem:[%s4082_s17] ss:$0 sm:$0xff] }
 0xc9c   : > { %3484 = vmatpush3.bf16.msra.mxu0 %v3481_v38  ;;  %3341 = vmatprep.mubr.msk.f32.mxu0 %vm711_vm1, %v3705_v46 }
 0xc9d   : > { %3486 = vmatprep.subr.bf16.mxu0 %v3485_v41 }
 0xca0   : > { %3488 = vmatpush3.bf16.msra.mxu0 %v3485_v41 }
 0xca1   : > { %3497 = vmatprep.subr.bf16.mxu0 %v3553_v0 }
 0xca2   : > { %v2333_v44 = vpop.f32.mrb[18].mxu1 }
 0xca3   : > { %v3332_v45 = vpop.f32.mrb[19].mxu1  ;;  %3342 = vmatmul.mubr.msk.f32.vlgmr.msra.gmra.mrb[20].mxu0 %vm711_vm1, %v3707_v47  ;;  %v3026_v47 = vld [vmem:[%s4075_s10 + $0x3] ss:$0 sm:$0xff] }
 0xca4   : > { %3359 = vmatprep.mubr.msk.f32.mxu0 %vm3554_vm0, %v3555_v1 }
 0xcaa   : > { %v3354_v49 = vpop.f32.mrb[20].mxu1 }
 0xcab   : > { %v2510_v50 = vadd.f32 %v3354_v49, %v3034_v48  ;;  %v2504_v51 = vpop.f32.mrb[21].mxu1 }
 0xcac   : > { %v2505_v46 = vadd.f32 %v3034_v48, %v2504_v51 }
 0xcae   : > { %v3502_v52 = vpack.c.bf16 %v2510_v50, %v2505_v46 }
 0xcb0   : > { %3503 = vmatpush3.bf16.msra.mxu1 %v3502_v52 }
 0xcb1   : > { %3504 = vmatprep.subr.bf16.mxu1 %v3553_v0 }
 0xd6e   : > { %v2249_v53 = vpop.f32.mrb[18].mxu0 }
 0xd6f   : > { %v2253_v54 = vadd.f32 %v2249_v53, %v3925_v59  ;;  %v3321_v55 = vpop.f32.mrb[19].mxu0  ;;  %v2334_v59 = vadd.f32 %v3019_v62, %v2333_v44  ;;  %v2874_v44 = vld [vmem:[%s4083_s18] sm:$0xf] }
 0xd76   : > { %v3343_v56 = vpop.f32.mrb[20].mxu0 }
 0xd77   : > { %v2422_v57 = vadd.f32 %v3343_v56, %v3026_v47  ;;  %v2416_v58 = vpop.f32.mrb[21].mxu0 }
 0xd78   : > { %v2417_v60 = vadd.f32 %v3026_v47, %v2416_v58 }
 0xd7a   : > { %v3498_v61 = vpack.c.bf16 %v2422_v57, %v2417_v60 }
 0xd7c   : > { %3500 = vmatpush3.bf16.xpose.msk.msra.mxu0 %vm3762_vm5, %v3498_v61 }
 0xd7d   : > { %3369 = vmatprep.subr.mxu0 %v3555_v1 }
 0xd83   : > { %3360 = vmatmul.mubr.msk.f32.vlgmr.msra.gmra.mrb[22].mxu0 %vm1017_vm4, %v2334_v59 }
 0xd84   : > { %3371 = vmatprep.mubr.msk.f32.mxu0 %vm3554_vm0, %v3555_v1  ;;  %3370 = vmatpush3.msra.mxu0 %v3041_v10 }
 0xe56   : > { %v2588_v63 = vpop.f32.mrb[22].mxu0 }
 0xe57   : > { %v2592_v2 = vmul.f32 0.35355338, %v2588_v63  ;;  %v3361_v3 = vpop.f32.mrb[23].mxu0 }
 0xe59   : > { %v2593_v4 = vsel %vm1098_vm6, %v2592_v2, -inf }
 0xe5a   : > { %2594 = vmax.xlane.f32.xlu0 %v2593_v4 }
 0xee7   : > { %v2595_v12 = vpop.xlane.xlu0 %2594 }
 0xee8   : > { %v2596_v6 = vsub.f32 %v2592_v2, %v2595_v12 }
 0xeea   : > { %v2597_v7 = vmul.f32 1.442695, %v2596_v6 }
 0xeec   : > { %3539 = vpow2.f32 %v2597_v7 }
 0xef6   : > { %v3540_v8 = vpop.eup %3539 }
 0xef7   : > { %v2599_v9 = vsel %vm1098_vm6, %v3540_v8, 0.0 }
 0xef8   : > { %2600 = vadd.xlane.f32.xlu1 %v2599_v9 }
 0xf85   : > { %v2601_v11 = vpop.xlane.xlu1 %2600 }
 0xf86   : > { %3541 = vrcp.f32 %v2601_v11 }
 0xf90   : > { %v3542_v13 = vpop.eup %3541 }
 0xf91   : > { %v2603_v14 = vmul.f32 %v3542_v13, %v3540_v8 }
 0xf93   : > { %3367 = vmatmul.mubr.msk.f32.vlgmr.msra.gmra.mrb[22].mxu1 %vm604_vm2, %v2603_v14 }
 0xf94   : > { %3382 = vmatprep.mubr.msk.f32.mxu1 %vm3554_vm0, %v3555_v1  ;;  %3506 = vmatpush3.bf16.msra.mxu1 %v3505_v17  ;;  %v2762_v1 = vld [vmem:[%s4079_s14 + $0x10] sm:$0xff] }
 0xf95   : > { %3507 = vmatprep.subr.bf16.mxu1 %v3553_v0  ;;  %v3508_v21 = vpack.c.bf16 %v2763_v20, %v2762_v1 }
 0xf98   : > { %3509 = vmatpush3.bf16.msra.mxu1 %v3508_v21 }
0x1066   : > { %v2673_v18 = vpop.f32.mrb[22].mxu1 }
0x1067   : > { %v3368_v19 = vpop.f32.mrb[23].mxu1  ;;  %3372 = vmatmul.mubr.msk.f32.vlgmr.msra.gmra.mrb[24].mxu0 %vm1017_vm4, %v2673_v18 }
0x113a   : > { %v2748_v23 = vpop.f32.mrb[24].mxu0 }
0x113b   : > { %v2752_v0 = vadd.f32 %v2748_v23, %v2253_v54  ;;  %v3373_v24 = vpop.f32.mrb[25].mxu0 }
0x113d   : > { %v2759_v25 = vadd.f32 %v3043_v22, %v2752_v0 }
0x113f   : > { %3383 = vmatmul.mubr.msk.f32.vlgmr.msra.gmra.mrb[24].mxu1 %vm711_vm1, %v2759_v25 }
0x1212   : > { %v2840_v27 = vpop.f32.mrb[24].mxu1 }
0x1213   : > { %v2841_v28 = vadd.f32 %v3044_v26, %v2840_v27  ;;  %v3384_v29 = vpop.f32.mrb[25].mxu1 }
0x1215   : > { %v2844_v30 = vadd.f32 %v2841_v28, %v3746_v5  ;;  %v3046_v5 = vld [vmem:[%s4081_s16] ss:$0 sm:$0xff] }
0x1217   : > { %v2847_v31 = vsel %vm680_vm3, %v2844_v30, 0.0 }
0x1218   : > { %2848 = vadd.xlane.f32.xlu0 %v2847_v31 }
0x12a5   : > { %v2849_v32 = vpop.xlane.xlu0 %2848 }
0x12a6   : > { %v2850_v33 = vmul.f32 0.03125, %v2849_v32 }
0x12a8   : > { %v2851_v34 = vsub.f32 %v2844_v30, %v2850_v33 }
0x12aa   : > { %v2852_v35 = vmul.f32 %v2851_v34, %v2851_v34 }
0x12ac   : > { %v2853_v36 = vsel %vm680_vm3, %v2852_v35, 0.0 }
0x12ad   : > { %2854 = vadd.xlane.f32.xlu1 %v2853_v36 }
0x133a   : > { %v2855_v37 = vpop.xlane.xlu1 %2854 }
0x133b   : > { %v2856_v38 = vmul.f32 0.03125, %v2855_v37 }
0x133d   : > { %v2857_v39 = vadd.f32 1e-05, %v2856_v38 }
0x133f   : > { %3543 = vrsqrt.f32 %v2857_v39 }
0x1349   : > { %v3544_v40 = vpop.eup %3543 }
0x134a   : > { %v2859_v41 = vmul.f32 %v3544_v40, %v2851_v34 }
0x134c   : > { %v2866_v43 = vmul.f32 %v3046_v5, %v2859_v41 }
0x134e   : > { %v2873_v45 = vadd.f32 %v3047_v42, %v2866_v43 }
0x1350   : > { %v2875_v48 = vadd.f32 %v2874_v44, %v2873_v45 }
0x1352   : > { %2876 = vst.msk [vmem:[%s600_s28] sm:$0xf] %vm680_vm3, %v2875_v48 }
0x1353 PF: > { %s29_s0 = sadd.s32 1, %s3551_s0  }
0x1354   : > { %p26_p4 = scmp.ge.s32.totalorder %s29_s0, 4  }
0x1356   :  { %28 = sbr.rel (!%p26_p4) target bundleno = 5 (0x5), region = 147 }

// kernel: _lambda_.6
= control target key start
LH: loop header
LB: loop body
LE: loop exit
PB: predicated region body
PF: predicated region fallthrough
CT: control target
= control target key end

     0   :  { %s3521_s24 = smov 0   ;;  %s3989_s0 = inlined_call_operand.vmem [shape: f32[2,4,32], index: 0, kind: input, shape index: {}]   ;;  %s3990_s1 = inlined_call_operand.vmem [shape: f32[1,32], index: 1, kind: input, shape index: {}]   ;;  %s3991_s2 = inlined_call_operand.vmem [shape: f32[1,32], index: 2, kind: input, shape index: {}]   ;;  %s3992_s3 = inlined_call_operand.vmem [shape: f32[4,32,8], index: 3, kind: input, shape index: {}]   ;;  %s3993_s4 = inlined_call_operand.vmem [shape: f32[4,32,8], index: 4, kind: input, shape index: {}]   ;;  %s3994_s5 = inlined_call_operand.vmem [shape: f32[4,32,8], index: 5, kind: input, shape index: {}]   ;;  %s3995_s6 = inlined_call_operand.vmem [shape: f32[4,1,8], index: 6, kind: input, shape index: {}]   ;;  %s3996_s7 = inlined_call_operand.vmem [shape: f32[4,1,8], index: 7, kind: input, shape index: {}]   ;;  %s3997_s8 = inlined_call_operand.vmem [shape: f32[4,1,8], index: 8, kind: input, shape index: {}]   ;;  %s3998_s9 = inlined_call_operand.vmem [shape: f32[4,8,32], index: 9, kind: input, shape index: {}]   ;;  %s3999_s10 = inlined_call_operand.vmem [shape: f32[1,32], index: 10, kind: input, shape index: {}]   ;;  %s4000_s11 = inlined_call_operand.vmem [shape: f32[1,32], index: 11, kind: input, shape index: {}]   ;;  %s4001_s12 = inlined_call_operand.vmem [shape: f32[1,32], index: 12, kind: input, shape index: {}]   ;;  %s4002_s13 = inlined_call_operand.vmem [shape: f32[32,128], index: 13, kind: input, shape index: {}]   ;;  %s4003_s14 = inlined_call_operand.vmem [shape: f32[1,128], index: 14, kind: input, shape index: {}]   ;;  %s4004_s15 = inlined_call_operand.vmem [shape: f32[128,32], index: 15, kind: input, shape index: {}]   ;;  %s4005_s16 = inlined_call_operand.vmem [shape: f32[1,32], index: 16, kind: input, shape index: {}]   ;;  %s4006_s17 = inlined_call_operand.vmem [shape: f32[2,4,32], index: 17, kind: output, shape index: {}]  }
   0x1   :  { %4007 = sst [smem:[#allocation2_spill]] %s3989_s0 }
   0x2   :  { %4008 = sst [smem:[#allocation3_spill]] %s3990_s1 }
   0x3 LB: > { %s2828_s25 = sadd.s32 4294967295, %s3425_s24   ;;  %p2832_p0 = scmp.ge.s32.totalorder %s3425_s24, 1  ;;  %s3425_s24 = sphi %s3521_s24, %s27_s24  }
   0x4   : > { %p486_p1 = scmp.lt.s32.totalorder %s3425_s24, 3 }
   0x6   : > { %p487_p2 = pnand %p2832_p0, %p486_p1 }
   0x7   : > { %p536_p3 = scmp.lt.s32.totalorder (!%p487_p2), %s2828_s25, 1  ;;  %vm547_vm0 = vcmask (!%p487_p2), 257024   ;;  %s4009_s29 = sld [smem:[#allocation2_spill]] (!%p487_p2)  ;;  %v577_v7 = vld [vmem:[%s3992_s3] sm:$0xff] (!%p487_p2)  ;;  %v578_v8 = vld [vmem:[%s3992_s3 + $0x8] sm:$0xff] (!%p487_p2)  ;;  %v3427_v10 = vmov (!%p487_p2), 0.0|0.0  }
   0x8   : > { %490 = sbr.rel (%p487_p2) target bundleno = 4986 (0x137a), region = 88  ;;  %v3282_v9 = vpack.c.bf16 (!%p487_p2), %v578_v8, %v577_v7  ;;  %3281 = vmatprep.subr.bf16.mxu0 (!%p487_p2), %v3427_v10  ;;  %v579_v11 = vld [vmem:[%s3992_s3 + $0x10] sm:$0xff] (!%p487_p2)  ;;  %v580_v12 = vld [vmem:[%s3992_s3 + $0x18] sm:$0xff] (!%p487_p2)  ;;  %vm3428_vm1 = vmmov (!%p487_p2), 0   ;;  %v3429_v14 = vmov (!%p487_p2), 0.0   ;;  %v662_v21 = vld [vmem:[%s3993_s4] sm:$0xff] (!%p487_p2) }
   0x9   : > { %v3285_v13 = vpack.c.bf16 (!%p487_p2), %v580_v12, %v579_v11  ;;  %3051 = vmatprep.mubr.msk.f32.mxu0 (!%p487_p2), %vm3428_vm1, %v3429_v14  ;;  %3081 = vmatprep.subr.mxu1 (!%p487_p2), %v3429_v14  ;;  %v663_v22 = vld [vmem:[%s3993_s4 + $0x8] sm:$0xff] (!%p487_p2)  ;;  %v2836_v23 = vld [vmem:[%s3991_s2] ss:$0 sm:$0xff] (!%p487_p2)  ;;  %vm588_vm2 = vcmask (!%p487_p2), 261120   ;;  %v664_v27 = vld [vmem:[%s3993_s4 + $0x10] sm:$0xff] (!%p487_p2)  ;;  %vm824_vm3 = vcmask (!%p487_p2), 64512  }
   0xa   : > { %3283 = vmatpush3.bf16.msra.mxu0 (!%p487_p2), %v3282_v9  ;;  %3083 = vmatprep.mubr.msk.f32.mxu1 (!%p487_p2), %vm3428_vm1, %v3429_v14  ;;  %v3288_v25 = vpack.c.bf16 (!%p487_p2), %v663_v22, %v662_v21  ;;  %v665_v28 = vld [vmem:[%s3993_s4 + $0x18] sm:$0xff] (!%p487_p2)  ;;  %v743_v30 = vld [vmem:[%s3994_s5] sm:$0xff] (!%p487_p2)  ;;  %v744_v31 = vld [vmem:[%s3994_s5 + $0x8] sm:$0xff] (!%p487_p2)  ;;  %vm918_vm4 = vcmask (!%p487_p2), 1043456   ;;  %vm902_vm5 = vcmask (!%p487_p2), 27648   ;;  %vm914_vm6 = vcmask (!%p487_p2), 31744  }
   0xb   : > { %3284 = vmatprep.subr.bf16.mxu0 (!%p487_p2), %v3427_v10  ;;  %v3291_v29 = vpack.c.bf16 (!%p487_p2), %v665_v28, %v664_v27  ;;  %v3294_v32 = vpack.c.bf16 (!%p487_p2), %v744_v31, %v743_v30  ;;  %v745_v33 = vld [vmem:[%s3994_s5 + $0x10] sm:$0xff] (!%p487_p2)  ;;  %v746_v34 = vld [vmem:[%s3994_s5 + $0x18] sm:$0xff] (!%p487_p2)  ;;  %v2839_v38 = vld [vmem:[%s3996_s7] ss:$0 sm:$0xff] (!%p487_p2) }
   0xc   : > { %v3297_v35 = vpack.c.bf16 (!%p487_p2), %v746_v34, %v745_v33  ;;  %v2847_v40 = vld [vmem:[%s3992_s3 + $0x20] sm:$0xff] (!%p487_p2)  ;;  %v2848_v41 = vld [vmem:[%s3992_s3 + $0x28] sm:$0xff] (!%p487_p2)  ;;  %v2849_v47 = vld [vmem:[%s3992_s3 + $0x30] sm:$0xff] (!%p487_p2) }
   0xd   : > { %v2837_v42 = vld [vmem:[%s3995_s6] ss:$0 sm:$0xff] (!%p487_p2)  ;;  %v3300_v45 = vpack.c.bf16 (!%p487_p2), %v2848_v41, %v2847_v40  ;;  %v2850_v48 = vld [vmem:[%s3992_s3 + $0x38] sm:$0xff] (!%p487_p2)  ;;  %v2862_v53 = vld [vmem:[%s3994_s5 + $0x28] sm:$0xff] (!%p487_p2) }
   0xe   : > { %3286 = vmatpush3.bf16.msra.mxu0 (!%p487_p2), %v3285_v13  ;;  %v2841_v49 = vld [vmem:[%s3997_s8] ss:$0 sm:$0xff] (!%p487_p2)  ;;  %v3303_v50 = vpack.c.bf16 (!%p487_p2), %v2850_v48, %v2849_v47  ;;  %v2863_v57 = vld [vmem:[%s3994_s5 + $0x30] sm:$0xff] (!%p487_p2)  ;;  %v2864_v58 = vld [vmem:[%s3994_s5 + $0x38] sm:$0xff] (!%p487_p2) }
   0xf   : > { %s4012_s25 = smov (!%p536_p3, %s2828_s25), 1  ;;  %3287 = vmatprep.subr.bf16.mxu0 %v3427_v10  ;;  %v2861_v52 = vld [vmem:[%s3994_s5 + $0x20] sm:$0xff]  ;;  %v3315_v59 = vpack.c.bf16 %v2864_v58, %v2863_v57  ;;  %v2855_v13 = vld [vmem:[%s3993_s4 + $0x28] sm:$0xff] }
  0x10   : > { %s2833_s26 = sshll.u32 %s4012_s25, 2  ;;  %v3312_v56 = vpack.c.bf16 %v2862_v53, %v2861_v52  ;;  %v2854_v12 = vld [vmem:[%s3993_s4 + $0x20] sm:$0xff]  ;;  %v2872_v41 = vld [vmem:[%s3998_s9 + $0x8] sm:$0xff] }
  0x11   : > { %s539_s0 = scalar_lea.vmem %s4009_s29, %s2833_s26  ;;  %s4010_s29 = sld [smem:[#allocation3_spill]]  ;;  %v2883_v47 = vld [vmem:[%s3993_s4 + $0x48] sm:$0xff]  ;;  %v2875_v52 = vld [vmem:[%s3992_s3 + $0x40] sm:$0xff] }
  0x12   : > { %v3537_v0 = vld [vmem:[%s539_s0] sm:$0xf]  ;;  %v2876_v53 = vld [vmem:[%s3992_s3 + $0x48] sm:$0xff]  ;;  %s543_s21 = scalar_lea.vmem %s4006_s17, %s2833_s26 }
  0x13   : > { %v548_v1 = vsel %vm547_vm0, %v3537_v0, 0.0 }
  0x14   : > { %549 = vadd.xlane.f32.xlu0 %v548_v1 }
  0x17   : > { %v2835_v19 = vld [vmem:[%s4010_s29] ss:$0 sm:$0xff] }
  0xa1   : > { %v550_v2 = vpop.xlane.xlu0 %549 }
  0xa2   : > { %v552_v3 = vmul.f32 0.03125, %v550_v2 }
  0xa4   : > { %v553_v4 = vsub.f32 %v3537_v0, %v552_v3 }
  0xa6   : > { %v554_v5 = vmul.f32 %v553_v4, %v553_v4 }
  0xa8   : > { %v555_v6 = vsel %vm547_vm0, %v554_v5, 0.0 }
  0xa9   : > { %556 = vadd.xlane.f32.xlu0 %v555_v6 }
 0x136   : > { %v557_v15 = vpop.xlane.xlu0 %556 }
 0x137   : > { %v558_v16 = vmul.f32 0.03125, %v557_v15 }
 0x139   : > { %v559_v17 = vadd.f32 1e-05, %v558_v16  ;;  %v3306_v16 = vpack.c.bf16 %v2855_v13, %v2854_v12  ;;  %v2880_v13 = vld [vmem:[%s3995_s6 + $0x2] ss:$0 sm:$0xff] }
 0x13b   : > { %3395 = vrsqrt.f32 %v559_v17 }
 0x145   : > { %v3396_v18 = vpop.eup %3395 }
 0x146   : > { %v561_v20 = vmul.f32 %v3396_v18, %v553_v4  ;;  %v2856_v18 = vld [vmem:[%s3993_s4 + $0x30] sm:$0xff] }
 0x148   : > { %v568_v24 = vmul.f32 %v2835_v19, %v561_v20  ;;  %v2857_v19 = vld [vmem:[%s3993_s4 + $0x38] sm:$0xff] }
 0x149   : > { %v3309_v20 = vpack.c.bf16 %v2857_v19, %v2856_v18  ;;  %v2894_v18 = vld [vmem:[%s3997_s8 + $0x2] ss:$0 sm:$0xff] }
 0x14a   : > { %v3575_v26 = vadd.f32 %v2836_v23, %v568_v24  ;;  %v2859_v23 = vld [vmem:[%s3996_s7 + $0x1] ss:$0 sm:$0xff] }
 0x14c   : > { %3052 = vmatmul.mubr.msk.f32.vlgmr.msra.gmra.mrb[0].mxu0 %vm588_vm2, %v3575_v26 }
 0x14d   : > { %3289 = vmatpush3.bf16.msra.mxu0 %v3288_v25  ;;  %3062 = vmatprep.mubr.msk.f32.mxu0 %vm3428_vm1, %v3429_v14  ;;  %v2852_v25 = vld [vmem:[%s3995_s6 + $0x1] ss:$0 sm:$0xff] }
 0x14e   : > { %3290 = vmatprep.subr.bf16.mxu0 %v3427_v10 }
 0x151   : > { %3292 = vmatpush3.bf16.msra.mxu0 %v3291_v29  ;;  %v2866_v29 = vld [vmem:[%s3997_s8 + $0x1] ss:$0 sm:$0xff] }
 0x152   : > { %3293 = vmatprep.subr.bf16.mxu0 %v3427_v10 }
 0x154   : > { %3063 = vmatmul.mubr.msk.f32.vlgmr.msra.gmra.mrb[2].mxu0 %vm588_vm2, %v3575_v26 }
 0x155   : > { %3295 = vmatpush3.bf16.msra.mxu0 %v3294_v32  ;;  %3073 = vmatprep.mubr.msk.f32.mxu0 %vm3428_vm1, %v3429_v14 }
 0x156   : > { %3296 = vmatprep.subr.bf16.mxu0 %v3427_v10 }
 0x159   : > { %3298 = vmatpush3.bf16.msra.mxu0 %v3297_v35 }
 0x15a   : > { %3076 = vmatprep.subr.mxu0 %v3429_v14 }
 0x15c   : > { %3074 = vmatmul.mubr.msk.f32.vlgmr.msra.gmra.mrb[4].mxu0 %vm588_vm2, %v3575_v26 }
 0x15d   : > { %3078 = vmatprep.mubr.msk.f32.mxu0 %vm3428_vm1, %v3429_v14 }
 0x21f   : > { %v658_v36 = vpop.f32.mrb[0].mxu0 }
 0x220   : > { %v3053_v37 = vpop.f32.mrb[1].mxu0  ;;  %v659_v46 = vadd.f32 %v2837_v42, %v658_v36 }
 0x227   : > { %v739_v39 = vpop.f32.mrb[2].mxu0 }
 0x228   : > { %v740_v43 = vadd.f32 %v2839_v38, %v739_v39  ;;  %v3064_v44 = vpop.f32.mrb[3].mxu0 }
 0x22a   : > { %3077 = vmatpush3.xpose.msk.msra.mxu0 %vm824_vm3, %v740_v43 }
 0x22b   : > { %3299 = vmatprep.subr.bf16.mxu0 %v3427_v10 }
 0x22d   : > { %3079 = vmatmul.mubr.msk.f32.vlgmr.msra.gmra.mrb[6].mxu0 %vm824_vm3, %v659_v46  ;;  %v2882_v46 = vld [vmem:[%s3993_s4 + $0x40] sm:$0xff] }
 0x22e   : > { %3301 = vmatpush3.bf16.msra.mxu0 %v3300_v45  ;;  %3094 = vmatprep.mubr.msk.f32.mxu0 %vm3428_vm1, %v3429_v14  ;;  %v992_v45 = vld [vmem:[%s3998_s9] sm:$0xff]  ;;  %v3324_v48 = vpack.c.bf16 %v2883_v47, %v2882_v46  ;;  %v2919_v46 = vld [vmem:[%s3994_s5 + $0x78] sm:$0xff] }
 0x22f   : > { %v820_v51 = vpop.f32.mrb[4].mxu0  ;;  %3302 = vmatprep.subr.bf16.mxu0 %v3427_v10 }
 0x230   : > { %v821_v54 = vadd.f32 %v2841_v49, %v820_v51  ;;  %v3075_v55 = vpop.f32.mrb[5].mxu0  ;;  %v2884_v49 = vld [vmem:[%s3993_s4 + $0x50] sm:$0xff] }
 0x231   : > { %v2877_v55 = vld [vmem:[%s3992_s3 + $0x50] sm:$0xff] }
 0x232   : > { %3082 = vmatpush3.msk.msra.mxu1 %vm918_vm4, %v821_v54  ;;  %3304 = vmatpush3.bf16.msra.mxu0 %v3303_v50  ;;  %v2885_v50 = vld [vmem:[%s3993_s4 + $0x58] sm:$0xff]  ;;  %v3318_v54 = vpack.c.bf16 %v2876_v53, %v2875_v52 }
 0x233   : > { %3311 = vmatprep.subr.bf16.mxu0 %v3427_v10  ;;  %3305 = vmatprep.subr.bf16.mxu1 %v3427_v10  ;;  %v3327_v51 = vpack.c.bf16 %v2885_v50, %v2884_v49  ;;  %v2910_v49 = vld [vmem:[%s3993_s4 + $0x68] sm:$0xff]  ;;  %v2912_v52 = vld [vmem:[%s3993_s4 + $0x78] sm:$0xff] }
 0x235   : > { %3095 = vmatmul.mubr.msk.f32.vlgmr.msra.gmra.mrb[8].mxu0 %vm588_vm2, %v3575_v26 }
 0x236   : > { %3313 = vmatpush3.bf16.msra.mxu0 %v3312_v56  ;;  %3116 = vmatprep.mubr.msk.f32.mxu0 %vm3428_vm1, %v3429_v14  ;;  %v2878_v56 = vld [vmem:[%s3992_s3 + $0x58] sm:$0xff] }
 0x237   : > { %3314 = vmatprep.subr.bf16.mxu0 %v3427_v10 }
 0x23a   : > { %3316 = vmatpush3.bf16.msra.mxu0 %v3315_v59  ;;  %v3321_v59 = vpack.c.bf16 %v2878_v56, %v2877_v55 }
 0x23b   : > { %3129 = vmatprep.subr.mxu0 %v3429_v14 }
 0x23d   : > { %3117 = vmatmul.mubr.msk.f32.vlgmr.msra.gmra.mrb[10].mxu0 %vm588_vm2, %v3575_v26 }
 0x23e   : > { %3131 = vmatprep.mubr.msk.f32.mxu0 %vm3428_vm1, %v3429_v14  ;;  %3130 = vmatpush3.msra.mxu0 %v2872_v41 }
 0x23f   : > { %3317 = vmatprep.subr.bf16.mxu0 %v3427_v10 }
 0x300   : > { %v897_v60 = vpop.f32.mrb[6].mxu0 }
 0x301   : > { %v901_v61 = vmul.f32 0.35355338, %v897_v60  ;;  %v3080_v62 = vpop.f32.mrb[7].mxu0  ;;  %v2889_v60 = vld [vmem:[%s3994_s5 + $0x40] sm:$0xff] }
 0x303   : > { %v903_v63 = vsel %vm902_vm5, %v901_v61, -inf }
 0x304   : > { %904 = vmax.xlane.f32.xlu1 %v903_v63 }
 0x308   : > { %v1072_v1 = vpop.f32.mrb[8].mxu0 }
 0x309   : > { %v3096_v2 = vpop.f32.mrb[9].mxu0  ;;  %v1073_v30 = vadd.f32 %v2852_v25, %v1072_v1 }
 0x30a   : > { %v2891_v2 = vld [vmem:[%s3994_s5 + $0x50] sm:$0xff] }
 0x310   : > { %v1238_v3 = vpop.f32.mrb[10].mxu0 }
 0x311   : > { %v3118_v4 = vpop.f32.mrb[11].mxu0  ;;  %v1239_v31 = vadd.f32 %v2866_v29, %v1238_v3  ;;  %v2892_v3 = vld [vmem:[%s3994_s5 + $0x58] sm:$0xff] }
 0x312   : > { %v2887_v4 = vld [vmem:[%s3996_s7 + $0x2] ss:$0 sm:$0xff] }
 0x391   : > { %v905_v5 = vpop.xlane.xlu1 %904 }
 0x392   : > { %v906_v6 = vsub.f32 %v901_v61, %v905_v5  ;;  %v2890_v61 = vld [vmem:[%s3994_s5 + $0x48] sm:$0xff]  ;;  %v3333_v5 = vpack.c.bf16 %v2892_v3, %v2891_v2  ;;  %v2907_v2 = vld [vmem:[%s3995_s6 + $0x3] ss:$0 sm:$0xff] }
 0x393   : > { %v3330_v1 = vpack.c.bf16 %v2890_v61, %v2889_v60 }
 0x394   : > { %v907_v7 = vmul.f32 1.442695, %v906_v6 }
 0x396   : > { %3397 = vpow2.f32 %v907_v7 }
 0x3a0   : > { %v3398_v8 = vpop.eup %3397 }
 0x3a1   : > { %v909_v9 = vsel %vm902_vm5, %v3398_v8, 0.0 }
 0x3a2   : > { %910 = vadd.xlane.f32.xlu1 %v909_v9 }
 0x42f   : > { %v911_v11 = vpop.xlane.xlu1 %910 }
 0x430   : > { %3399 = vrcp.f32 %v911_v11 }
 0x43a   : > { %v3400_v15 = vpop.eup %3399 }
 0x43b   : > { %v913_v17 = vmul.f32 %v3400_v15, %v3398_v8 }
 0x43d   : > { %3084 = vmatmul.mubr.msk.f32.vlgmr.msra.gmra.mrb[0].mxu1 %vm914_vm6, %v913_v17 }
 0x43e   : > { %3307 = vmatpush3.bf16.msra.mxu1 %v3306_v16  ;;  %3105 = vmatprep.mubr.msk.f32.mxu1 %vm3428_vm1, %v3429_v14 }
 0x43f   : > { %3308 = vmatprep.subr.bf16.mxu1 %v3427_v10 }
 0x442   : > { %3310 = vmatpush3.bf16.msra.mxu1 %v3309_v20 }
 0x443   : > { %3119 = vmatprep.subr.mxu1 %v3429_v14 }
 0x445   : > { %3106 = vmatmul.mubr.msk.f32.vlgmr.msra.gmra.mrb[2].mxu1 %vm588_vm2, %v3575_v26 }
 0x446   : > { %3121 = vmatprep.mubr.msk.f32.mxu1 %vm3428_vm1, %v3429_v14 }
 0x510   : > { %v988_v21 = vpop.f32.mrb[0].mxu1 }
 0x511   : > { %v3085_v22 = vpop.f32.mrb[1].mxu1 }
 0x518   : > { %v1155_v24 = vpop.f32.mrb[2].mxu1 }
 0x519   : > { %v1156_v27 = vadd.f32 %v2859_v23, %v1155_v24  ;;  %v3107_v28 = vpop.f32.mrb[3].mxu1 }
 0x51b   : > { %3120 = vmatpush3.xpose.msk.msra.mxu1 %vm824_vm3, %v1156_v27 }
 0x51c   : > { %3124 = vmatprep.subr.mxu1 %v3429_v14 }
 0x51e   : > { %3122 = vmatmul.mubr.msk.f32.vlgmr.msra.gmra.mrb[4].mxu1 %vm824_vm3, %v1073_v30 }
 0x51f   : > { %3125 = vmatpush3.msk.msra.mxu1 %vm918_vm4, %v1239_v31  ;;  %3126 = vmatprep.mubr.msk.f32.mxu1 %vm3428_vm1, %v3429_v14 }
 0x520   : > { %3134 = vmatprep.subr.mxu1 %v3429_v14 }
 0x5f1   : > { %v1314_v32 = vpop.f32.mrb[4].mxu1 }
 0x5f2   : > { %v1318_v33 = vmul.f32 0.35355338, %v1314_v32  ;;  %v3123_v34 = vpop.f32.mrb[5].mxu1  ;;  %v2900_v32 = vld [vmem:[%s3998_s9 + $0x10] sm:$0xff] }
 0x5f3   : > { %v2902_v34 = vld [vmem:[%s3992_s3 + $0x60] sm:$0xff] }
 0x5f4   : > { %v1319_v35 = vsel %vm902_vm5, %v1318_v33, -inf }
 0x5f5   : > { %1320 = vmax.xlane.f32.xlu0 %v1319_v35  ;;  %v2903_v35 = vld [vmem:[%s3992_s3 + $0x68] sm:$0xff] }
 0x682   : > { %v1321_v36 = vpop.xlane.xlu0 %1320 }
 0x683   : > { %v1322_v37 = vsub.f32 %v1318_v33, %v1321_v36 }
 0x685   : > { %v1323_v38 = vmul.f32 1.442695, %v1322_v37  ;;  %v3336_v37 = vpack.c.bf16 %v2903_v35, %v2902_v34 }
 0x687   : > { %3401 = vpow2.f32 %v1323_v38 }
 0x691   : > { %v3402_v39 = vpop.eup %3401 }
 0x692   : > { %v1325_v40 = vsel %vm902_vm5, %v3402_v39, 0.0 }
 0x693   : > { %1326 = vadd.xlane.f32.xlu1 %v1325_v40  ;;  %v2905_v40 = vld [vmem:[%s3992_s3 + $0x78] sm:$0xff] }
 0x720   : > { %v1327_v42 = vpop.xlane.xlu1 %1326 }
 0x721   : > { %3403 = vrcp.f32 %v1327_v42  ;;  %v2916_v42 = vld [vmem:[%s3994_s5 + $0x60] sm:$0xff] }
 0x72b   : > { %v3404_v43 = vpop.eup %3403 }
 0x72c   : > { %v1329_v44 = vmul.f32 %v3404_v43, %v3402_v39  ;;  %v2904_v39 = vld [vmem:[%s3992_s3 + $0x70] sm:$0xff]  ;;  %v2917_v43 = vld [vmem:[%s3994_s5 + $0x68] sm:$0xff] }
 0x72d   : > { %v3339_v41 = vpack.c.bf16 %v2905_v40, %v2904_v39  ;;  %v2572_v39 = vld [vmem:[%s4002_s13 + $0x18] sm:$0xff] }
 0x72e   : > { %3127 = vmatmul.mubr.msk.f32.vlgmr.msra.gmra.mrb[6].mxu1 %vm914_vm6, %v1329_v44  ;;  %v3348_v44 = vpack.c.bf16 %v2917_v43, %v2916_v42 }
 0x72f   : > { %3135 = vmatpush3.msra.mxu1 %v992_v45  ;;  %3136 = vmatprep.mubr.msk.f32.mxu1 %vm3428_vm1, %v3429_v14  ;;  %v2918_v45 = vld [vmem:[%s3994_s5 + $0x70] sm:$0xff] }
 0x730   : > { %3323 = vmatprep.subr.bf16.mxu1 %v3427_v10  ;;  %v3351_v47 = vpack.c.bf16 %v2919_v46, %v2918_v45  ;;  %v2930_v45 = vld [vmem:[%s4000_s11] ss:$0 sm:$0xff] }
 0x732   : > { %3137 = vmatmul.mubr.msk.f32.vlgmr.msra.gmra.mrb[8].mxu1 %vm824_vm3, %v988_v21 }
 0x733   : > { %3325 = vmatpush3.bf16.msra.mxu1 %v3324_v48  ;;  %3158 = vmatprep.mubr.msk.f32.mxu1 %vm3428_vm1, %v3429_v14  ;;  %v2909_v48 = vld [vmem:[%s3993_s4 + $0x60] sm:$0xff] }
 0x734   : > { %3326 = vmatprep.subr.bf16.mxu1 %v3427_v10  ;;  %v3342_v50 = vpack.c.bf16 %v2910_v49, %v2909_v48 }
 0x737   : > { %3328 = vmatpush3.bf16.msra.mxu1 %v3327_v51  ;;  %v2911_v51 = vld [vmem:[%s3993_s4 + $0x70] sm:$0xff] }
 0x738   : > { %3172 = vmatprep.subr.mxu1 %v3429_v14  ;;  %v3345_v55 = vpack.c.bf16 %v2912_v52, %v2911_v51  ;;  %v2681_v51 = vld [vmem:[%s4004_s15 + $0x8] sm:$0xff] }
 0x73a   : > { %3159 = vmatmul.mubr.msk.f32.vlgmr.msra.gmra.mrb[10].mxu1 %vm588_vm2, %v3575_v26 }
 0x73b   : > { %3174 = vmatprep.mubr.msk.f32.mxu1 %vm3428_vm1, %v3429_v14 }
 0x801   : > { %v1402_v57 = vpop.f32.mrb[6].mxu1 }
 0x802   : > { %v3128_v58 = vpop.f32.mrb[7].mxu1  ;;  %3132 = vmatmul.mubr.msk.f32.vlgmr.msra.gmra.mrb[12].mxu0 %vm824_vm3, %v1402_v57 }
 0x803   : > { %3319 = vmatpush3.bf16.msra.mxu0 %v3318_v54  ;;  %3147 = vmatprep.mubr.msk.f32.mxu0 %vm3428_vm1, %v3429_v14 }
 0x804   : > { %3320 = vmatprep.subr.bf16.mxu0 %v3427_v10 }
 0x805   : > { %v1550_v62 = vpop.f32.mrb[8].mxu1 }
 0x806   : > { %v3138_v63 = vpop.f32.mrb[9].mxu1 }
 0x807   : > { %3322 = vmatpush3.bf16.msra.mxu0 %v3321_v59  ;;  %v2914_v63 = vld [vmem:[%s3996_s7 + $0x3] ss:$0 sm:$0xff] }
 0x808   : > { %3329 = vmatprep.subr.bf16.mxu0 %v3427_v10 }
 0x80a   : > { %3148 = vmatmul.mubr.msk.f32.vlgmr.msra.gmra.mrb[14].mxu0 %vm588_vm2, %v3575_v26 }
 0x80b   : > { %3331 = vmatpush3.bf16.msra.mxu0 %v3330_v1  ;;  %3169 = vmatprep.mubr.msk.f32.mxu0 %vm3428_vm1, %v3429_v14 }
 0x80c   : > { %3332 = vmatprep.subr.bf16.mxu0 %v3427_v10 }
 0x80d   : > { %v1716_v6 = vpop.f32.mrb[10].mxu1 }
 0x80e   : > { %v1717_v7 = vadd.f32 %v2887_v4, %v1716_v6  ;;  %v3160_v8 = vpop.f32.mrb[11].mxu1  ;;  %v2921_v4 = vld [vmem:[%s3997_s8 + $0x3] ss:$0 sm:$0xff] }
 0x80f   : > { %3334 = vmatpush3.bf16.msra.mxu0 %v3333_v5 }
 0x810   : > { %3173 = vmatpush3.xpose.msk.msra.mxu1 %vm824_vm3, %v1717_v7  ;;  %3182 = vmatprep.subr.mxu0 %v3429_v14 }
 0x811   : > { %3177 = vmatprep.subr.mxu1 %v3429_v14 }
 0x812   : > { %3170 = vmatmul.mubr.msk.f32.vlgmr.msra.gmra.mrb[16].mxu0 %vm588_vm2, %v3575_v26 }
 0x813   : > { %3184 = vmatprep.mubr.msk.f32.mxu0 %vm3428_vm1, %v3429_v14  ;;  %3183 = vmatpush3.msra.mxu0 %v2900_v32 }
 0x814   : > { %3341 = vmatprep.subr.bf16.mxu0 %v3427_v10 }
 0x8d5   : > { %v1477_v9 = vpop.f32.mrb[12].mxu0 }
 0x8d6   : > { %v3780_v11 = vadd.f32 %v1550_v62, %v1477_v9  ;;  %v3133_v12 = vpop.f32.mrb[13].mxu0 }
 0x8dd   : > { %v1633_v15 = vpop.f32.mrb[14].mxu0 }
 0x8de   : > { %v1634_v16 = vadd.f32 %v2880_v13, %v1633_v15  ;;  %v3149_v17 = vpop.f32.mrb[15].mxu0 }
 0x8e0   : > { %3175 = vmatmul.mubr.msk.f32.vlgmr.msra.gmra.mrb[12].mxu1 %vm824_vm3, %v1634_v16 }
 0x8e1   : > { %3179 = vmatprep.mubr.msk.f32.mxu1 %vm3428_vm1, %v3429_v14 }
 0x8e5   : > { %v1799_v19 = vpop.f32.mrb[16].mxu0 }
 0x8e6   : > { %v1800_v20 = vadd.f32 %v2894_v18, %v1799_v19  ;;  %v3171_v21 = vpop.f32.mrb[17].mxu0  ;;  %v2927_v18 = vld [vmem:[%s3998_s9 + $0x18] sm:$0xff] }
 0x8e8   : > { %3178 = vmatpush3.msk.msra.mxu1 %vm918_vm4, %v1800_v20 }
 0x8e9   : > { %3335 = vmatprep.subr.bf16.mxu1 %v3427_v10 }
 0x9b3   : > { %v1875_v22 = vpop.f32.mrb[12].mxu1 }
 0x9b4   : > { %v1879_v23 = vmul.f32 0.35355338, %v1875_v22  ;;  %v3176_v24 = vpop.f32.mrb[13].mxu1 }
 0x9b5   : > { %v2929_v24 = vld [vmem:[%s3999_s10] ss:$0 sm:$0xff] }
 0x9b6   : > { %v1880_v25 = vsel %vm902_vm5, %v1879_v23, -inf }
 0x9b7   : > { %1881 = vmax.xlane.f32.xlu0 %v1880_v25 }
 0xa44   : > { %v1882_v27 = vpop.xlane.xlu0 %1881 }
 0xa45   : > { %v1883_v28 = vsub.f32 %v1879_v23, %v1882_v27 }
 0xa47   : > { %v1884_v29 = vmul.f32 1.442695, %v1883_v28 }
 0xa49   : > { %3405 = vpow2.f32 %v1884_v29 }
 0xa53   : > { %v3406_v30 = vpop.eup %3405 }
 0xa54   : > { %v1886_v31 = vsel %vm902_vm5, %v3406_v30, 0.0 }
 0xa55   : > { %1887 = vadd.xlane.f32.xlu1 %v1886_v31 }
 0xae2   : > { %v1888_v33 = vpop.xlane.xlu1 %1887 }
 0xae3   : > { %3407 = vrcp.f32 %v1888_v33 }
 0xaed   : > { %v3408_v36 = vpop.eup %3407 }
 0xaee   : > { %v1890_v38 = vmul.f32 %v3408_v36, %v3406_v30  ;;  %v2569_v36 = vld [vmem:[%s4002_s13] sm:$0xff] }
 0xaf0   : > { %3180 = vmatmul.mubr.msk.f32.vlgmr.msra.gmra.mrb[14].mxu1 %vm914_vm6, %v1890_v38  ;;  %v2571_v38 = vld [vmem:[%s4002_s13 + $0x10] sm:$0xff] }
 0xaf1   : > { %3337 = vmatpush3.bf16.msra.mxu1 %v3336_v37  ;;  %3195 = vmatprep.mubr.msk.f32.mxu1 %vm3428_vm1, %v3429_v14  ;;  %v3357_v40 = vpack.c.bf16 %v2572_v39, %v2571_v38 }
 0xaf2   : > { %3338 = vmatprep.subr.bf16.mxu1 %v3427_v10 }
 0xaf5   : > { %3340 = vmatpush3.bf16.msra.mxu1 %v3339_v41 }
 0xaf6   : > { %3347 = vmatprep.subr.bf16.mxu1 %v3427_v10 }
 0xaf8   : > { %3196 = vmatmul.mubr.msk.f32.vlgmr.msra.gmra.mrb[16].mxu1 %vm588_vm2, %v3575_v26 }
 0xaf9   : > { %3349 = vmatpush3.bf16.msra.mxu1 %v3348_v44  ;;  %3217 = vmatprep.mubr.msk.f32.mxu1 %vm3428_vm1, %v3429_v14 }
 0xafa   : > { %3350 = vmatprep.subr.bf16.mxu1 %v3427_v10 }
 0xafd   : > { %3352 = vmatpush3.bf16.msra.mxu1 %v3351_v47  ;;  %v2931_v47 = vld [vmem:[%s4001_s12] ss:$0 sm:$0xff] }
 0xafe   : > { %3230 = vmatprep.subr.mxu1 %v3429_v14 }
 0xb00   : > { %3218 = vmatmul.mubr.msk.f32.vlgmr.msra.gmra.mrb[18].mxu1 %vm588_vm2, %v3575_v26 }
 0xb01   : > { %3232 = vmatprep.mubr.msk.f32.mxu1 %vm3428_vm1, %v3429_v14  ;;  %3231 = vmatpush3.msra.mxu1 %v2927_v18 }
 0xb02   : > { %3359 = vmatprep.subr.bf16.mxu1 %v3427_v10 }
 0xbc3   : > { %v1963_v53 = vpop.f32.mrb[14].mxu1 }
 0xbc4   : > { %v3181_v54 = vpop.f32.mrb[15].mxu1  ;;  %3185 = vmatmul.mubr.msk.f32.vlgmr.msra.gmra.mrb[18].mxu0 %vm824_vm3, %v1963_v53  ;;  %v2682_v53 = vld [vmem:[%s4004_s15 + $0x10] sm:$0xff] }
 0xbc5   : > { %3343 = vmatpush3.bf16.msra.mxu0 %v3342_v50  ;;  %3206 = vmatprep.mubr.msk.f32.mxu0 %vm3428_vm1, %v3429_v14  ;;  %v2680_v50 = vld [vmem:[%s4004_s15] sm:$0xff]  ;;  %v2683_v54 = vld [vmem:[%s4004_s15 + $0x18] sm:$0xff] }
 0xbc6   : > { %3344 = vmatprep.subr.bf16.mxu0 %v3427_v10  ;;  %v3360_v52 = vpack.c.bf16 %v2681_v51, %v2680_v50 }
 0xbc9   : > { %3346 = vmatpush3.bf16.msra.mxu0 %v3345_v55  ;;  %v3363_v55 = vpack.c.bf16 %v2683_v54, %v2682_v53 }
 0xbca   : > { %3220 = vmatprep.subr.mxu0 %v3429_v14 }
 0xbcb   : > { %v2122_v56 = vpop.f32.mrb[16].mxu1 }
 0xbcc   : > { %v3197_v57 = vpop.f32.mrb[17].mxu1  ;;  %3207 = vmatmul.mubr.msk.f32.vlgmr.msra.gmra.mrb[20].mxu0 %vm588_vm2, %v3575_v26  ;;  %v2123_v5 = vadd.f32 %v2907_v2, %v2122_v56  ;;  %v2684_v56 = vld [vmem:[%s4004_s15 + $0x20] sm:$0xff]  ;;  %v2690_v2 = vld [vmem:[%s4004_s15 + $0x50] sm:$0xff] }
 0xbcd   : > { %3222 = vmatprep.mubr.msk.f32.mxu0 %vm3428_vm1, %v3429_v14  ;;  %v2685_v57 = vld [vmem:[%s4004_s15 + $0x28] sm:$0xff] }
 0xbd3   : > { %v2288_v58 = vpop.f32.mrb[18].mxu1 }
 0xbd4   : > { %v3219_v59 = vpop.f32.mrb[19].mxu1  ;;  %v2289_v6 = vadd.f32 %v2921_v4, %v2288_v58  ;;  %v3366_v58 = vpack.c.bf16 %v2685_v57, %v2684_v56  ;;  %v2692_v4 = vld [vmem:[%s4004_s15 + $0x60] sm:$0xff] }
 0xbd5   : > { %v2686_v59 = vld [vmem:[%s4004_s15 + $0x30] sm:$0xff] }
 0xc97   : > { %v2038_v60 = vpop.f32.mrb[18].mxu0 }
 0xc98   : > { %v2042_v61 = vadd.f32 %v2038_v60, %v3780_v11  ;;  %v3186_v62 = vpop.f32.mrb[19].mxu0  ;;  %v2687_v60 = vld [vmem:[%s4004_s15 + $0x38] sm:$0xff] }
 0xc99   : > { %v2688_v62 = vld [vmem:[%s4004_s15 + $0x40] sm:$0xff] }
 0xc9f   : > { %v2205_v1 = vpop.f32.mrb[20].mxu0 }
 0xca0   : > { %v2206_v3 = vadd.f32 %v2914_v63, %v2205_v1  ;;  %v3208_v26 = vpop.f32.mrb[21].mxu0  ;;  %v2689_v63 = vld [vmem:[%s4004_s15 + $0x48] sm:$0xff] }
 0xca1   : > { %v3372_v1 = vpack.c.bf16 %v2689_v63, %v2688_v62 }
 0xca2   : > { %3221 = vmatpush3.xpose.msk.msra.mxu0 %vm824_vm3, %v2206_v3  ;;  %v2691_v3 = vld [vmem:[%s4004_s15 + $0x58] sm:$0xff] }
 0xca3   : > { %3225 = vmatprep.subr.mxu0 %v3429_v14  ;;  %v3375_v26 = vpack.c.bf16 %v2691_v3, %v2690_v2 }
 0xca5   : > { %3223 = vmatmul.mubr.msk.f32.vlgmr.msra.gmra.mrb[22].mxu0 %vm824_vm3, %v2123_v5  ;;  %v2693_v5 = vld [vmem:[%s4004_s15 + $0x68] sm:$0xff] }
 0xca6   : > { %3226 = vmatpush3.msk.msra.mxu0 %vm918_vm4, %v2289_v6  ;;  %3227 = vmatprep.mubr.msk.f32.mxu0 %vm3428_vm1, %v3429_v14  ;;  %v3378_v6 = vpack.c.bf16 %v2693_v5, %v2692_v4 }
 0xca7   : > { %3353 = vmatprep.subr.bf16.mxu0 %v3427_v10 }
 0xd78   : > { %v2364_v7 = vpop.f32.mrb[22].mxu0 }
 0xd79   : > { %v2368_v8 = vmul.f32 0.35355338, %v2364_v7  ;;  %v3224_v9 = vpop.f32.mrb[23].mxu0  ;;  %v2694_v7 = vld [vmem:[%s4004_s15 + $0x70] sm:$0xff] }
 0xd7b   : > { %v2369_v11 = vsel %vm902_vm5, %v2368_v8, -inf }
 0xd7c   : > { %2370 = vmax.xlane.f32.xlu0 %v2369_v11  ;;  %v2932_v11 = vld [vmem:[%s4003_s14] ss:$0 sm:$0xff] }
 0xe09   : > { %v2371_v12 = vpop.xlane.xlu0 %2370 }
 0xe0a   : > { %v2372_v13 = vsub.f32 %v2368_v8, %v2371_v12  ;;  %v2695_v8 = vld [vmem:[%s4004_s15 + $0x78] sm:$0xff] }
 0xe0b   : > { %v3381_v9 = vpack.c.bf16 %v2695_v8, %v2694_v7 }
 0xe0c   : > { %v2373_v15 = vmul.f32 1.442695, %v2372_v13 }
 0xe0e   : > { %3409 = vpow2.f32 %v2373_v15 }
 0xe18   : > { %v3410_v16 = vpop.eup %3409 }
 0xe19   : > { %v2375_v17 = vsel %vm902_vm5, %v3410_v16, 0.0 }
 0xe1a   : > { %2376 = vadd.xlane.f32.xlu1 %v2375_v17 }
 0xea7   : > { %v2377_v19 = vpop.xlane.xlu1 %2376 }
 0xea8   : > { %3411 = vrcp.f32 %v2377_v19 }
 0xeb2   : > { %v3412_v20 = vpop.eup %3411 }
 0xeb3   : > { %v2379_v21 = vmul.f32 %v3412_v20, %v3410_v16 }
 0xeb5   : > { %3228 = vmatmul.mubr.msk.f32.vlgmr.msra.gmra.mrb[24].mxu0 %vm914_vm6, %v2379_v21 }
 0xeb6   : > { %3243 = vmatprep.mubr.msk.f32.mxu0 %vm3428_vm1, %v3429_v14 }
 0xf88   : > { %v2452_v22 = vpop.f32.mrb[24].mxu0 }
 0xf89   : > { %v3229_v23 = vpop.f32.mrb[25].mxu0  ;;  %3233 = vmatmul.mubr.msk.f32.vlgmr.msra.gmra.mrb[20].mxu1 %vm824_vm3, %v2452_v22 }
 0xf8a   : > { %3278 = vmatprep.mubr.msk.f32.mxu1 %vm3428_vm1, %v3429_v14  ;;  %3361 = vmatpush3.bf16.msra.mxu1 %v3360_v52 }
 0xf8b   : > { %3362 = vmatprep.subr.bf16.mxu1 %v3427_v10 }
 0xf8e   : > { %3364 = vmatpush3.bf16.msra.mxu1 %v3363_v55 }
 0xf8f   : > { %3365 = vmatprep.subr.bf16.mxu1 %v3427_v10 }
 0xf92   : > { %3367 = vmatpush3.bf16.msra.mxu1 %v3366_v58 }
 0xf93   : > { %3368 = vmatprep.subr.bf16.mxu1 %v3427_v10 }
0x105c   : > { %v2527_v25 = vpop.f32.mrb[20].mxu1 }
0x105d   : > { %v2531_v27 = vadd.f32 %v2527_v25, %v2042_v61  ;;  %v3234_v28 = vpop.f32.mrb[21].mxu1  ;;  %v3369_v61 = vpack.c.bf16 %v2687_v60, %v2686_v59 }
0x105f   : > { %v2538_v29 = vadd.f32 %v2929_v24, %v2531_v27  ;;  %3370 = vmatpush3.bf16.msra.mxu1 %v3369_v61 }
0x1060   : > { %3371 = vmatprep.subr.bf16.mxu1 %v3427_v10 }
0x1061   : > { %v3892_v30 = vadd.f32 %v2538_v29, %v3537_v0  ;;  %v2570_v0 = vld [vmem:[%s4002_s13 + $0x8] sm:$0xff] }
0x1062   : > { %v3354_v37 = vpack.c.bf16 %v2570_v0, %v2569_v36  ;;  %v3430_v36 = vmov 1.0  }
0x1063   : > { %v2542_v31 = vsel %vm547_vm0, %v3892_v30, 0.0  ;;  %3373 = vmatpush3.bf16.msra.mxu1 %v3372_v1 }
0x1064   : > { %2543 = vadd.xlane.f32.xlu0 %v2542_v31  ;;  %3355 = vmatpush3.bf16.msra.mxu0 %v3354_v37 }
0x1065   : > { %3356 = vmatprep.subr.bf16.mxu0 %v3427_v10  ;;  %3374 = vmatprep.subr.bf16.mxu1 %v3427_v10 }
0x1067   : > { %3376 = vmatpush3.bf16.msra.mxu1 %v3375_v26 }
0x1068   : > { %3358 = vmatpush3.bf16.msra.mxu0 %v3357_v40  ;;  %3377 = vmatprep.subr.bf16.mxu1 %v3427_v10 }
0x106b   : > { %3379 = vmatpush3.bf16.msra.mxu1 %v3378_v6 }
0x106c   : > { %3380 = vmatprep.subr.bf16.mxu1 %v3427_v10 }
0x106f   : > { %3382 = vmatpush3.bf16.msra.mxu1 %v3381_v9 }
0x10f1   : > { %v2544_v32 = vpop.xlane.xlu0 %2543 }
0x10f2   : > { %v2545_v33 = vmul.f32 0.03125, %v2544_v32 }
0x10f4   : > { %v2546_v34 = vsub.f32 %v3892_v30, %v2545_v33 }
0x10f6   : > { %v2547_v14 = vmul.f32 %v2546_v34, %v2546_v34 }
0x10f8   : > { %v2548_v35 = vsel %vm547_vm0, %v2547_v14, 0.0 }
0x10f9   : > { %2549 = vadd.xlane.f32.xlu1 %v2548_v35 }
0x1186   : > { %v2550_v41 = vpop.xlane.xlu1 %2549 }
0x1187   : > { %v2551_v42 = vmul.f32 0.03125, %v2550_v41  ;;  %v2934_v41 = vld [vmem:[%s4005_s16] ss:$0 sm:$0xff] }
0x1189   : > { %v2552_v43 = vadd.f32 1e-05, %v2551_v42 }
0x118b   : > { %3413 = vrsqrt.f32 %v2552_v43 }
0x1195   : > { %v3414_v44 = vpop.eup %3413 }
0x1196   : > { %v2554_v46 = vmul.f32 %v3414_v44, %v2546_v34 }
0x1198   : > { %v2561_v48 = vmul.f32 %v2930_v45, %v2554_v46 }
0x119a   : > { %v2568_v49 = vadd.f32 %v2931_v47, %v2561_v48 }
0x119c   : > { %3244 = vmatmul.mubr.msk.f32.vlgmr.msra.gmra.mrb[26].mxu0 %vm588_vm2, %v2568_v49 }
0x126f   : > { %v2649_v12 = vpop.f32.mrb[26].mxu0 }
0x1270   : > { %v2650_v13 = vadd.f32 %v2932_v11, %v2649_v12  ;;  %v3245_v15 = vpop.f32.mrb[27].mxu0 }
0x1272   : > { %v2654_v16 = vmul.f32 0.70710677, %v2650_v13  ;;  %v2653_v38 = vmul.f32 0.5, %v2650_v13 }
0x1274   : > { %v2657_v17 = vand.u32 2147483647, %v2654_v16  ;;  %vm2655_vm7 = vcmp.lt.f32.partialorder %v2654_v16, 0.0 }
0x1275   : > { %v2656_v0 = vsel %vm2655_vm7, -1.0, %v3430_v36 }
0x1276   : > { %v2658_v10 = vmul.f32 0.3275911, %v2657_v17  ;;  %v2671_v19 = vsub.f32 0.0, %v2657_v17 }
0x1278   : > { %v2659_v18 = vadd.f32 1.0, %v2658_v10  ;;  %v2672_v21 = vmul.f32 %v2671_v19, %v2657_v17 }
0x127a   : > { %3415 = vrcp.f32 %v2659_v18  ;;  %v2673_v24 = vmul.f32 1.442695, %v2672_v21 }
0x127c   : > { %3417 = vpow2.f32 %v2673_v24 }
0x1284   : > { %v3416_v20 = vpop.eup %3415 }
0x1285   : > { %v2662_v22 = vmul.f32 1.0614054, %v3416_v20 }
0x1286   : > { %v3418_v34 = vpop.eup %3417 }
0x1287   : > { %v2663_v23 = vadd.f32 -1.4531521, %v2662_v22 }
0x1289   : > { %v2664_v25 = vmul.f32 %v3416_v20, %v2663_v23 }
0x128b   : > { %v2665_v27 = vadd.f32 1.4214138, %v2664_v25 }
0x128d   : > { %v2666_v28 = vmul.f32 %v3416_v20, %v2665_v27 }
0x128f   : > { %v2667_v29 = vadd.f32 -0.28449672, %v2666_v28 }
0x1291   : > { %v2668_v31 = vmul.f32 %v3416_v20, %v2667_v29 }
0x1293   : > { %v2669_v32 = vadd.f32 0.2548296, %v2668_v31 }
0x1295   : > { %v2670_v33 = vmul.f32 %v3416_v20, %v2669_v32 }
0x1297   : > { %v2675_v14 = vmul.f32 %v3418_v34, %v2670_v33 }
0x1299   : > { %v2676_v35 = vsub.f32 1.0, %v2675_v14 }
0x129b   : > { %v2677_v37 = vmul.f32 %v2676_v35, %v2656_v0 }
0x129d   : > { %v2678_v39 = vadd.f32 1.0, %v2677_v37 }
0x129f   : > { %v2679_v40 = vmul.f32 %v2678_v39, %v2653_v38 }
0x12a1   : > { %3279 = vmatmul.mubr.f32.vlgmr.msra.gmra.mrb[22].mxu1 %v2679_v40 }
0x1374   : > { %v2769_v42 = vpop.f32.mrb[22].mxu1 }
0x1375   : > { %v2770_v43 = vadd.f32 %v2934_v41, %v2769_v42  ;;  %v3280_v44 = vpop.f32.mrb[23].mxu1 }
0x1377   : > { %v2773_v45 = vadd.f32 %v2770_v43, %v3892_v30 }
0x1379   : > { %2774 = vst.msk [vmem:[%s543_s21] sm:$0xf] %vm547_vm0, %v2773_v45 }
0x137a PF: > { %s27_s24 = sadd.s32 1, %s3425_s24  }
0x137b   : > { %p24_p4 = scmp.ge.s32.totalorder %s27_s24, 4  }
0x137d   :  { %26 = sbr.rel (!%p24_p4) target bundleno = 3 (0x3), region = 139 }

</bundles_post_ra>
